<compile_context>
chip_gen: v5e
topology: v5e:2x2
jax: 0.10.0
libtpu: 0.0.40
codegen_flags: <defaults>
</compile_context>

<pallas_src>
import jax
import jax.numpy as jnp
from jax import lax
from jax.experimental import pallas as pl
from jax.experimental.pallas import tpu as pltpu


def _rup(n, m):
    return -(-n // m) * m


# -----------------------------------------------------------------------------
# One-time parameter packing (done outside the forward pass)
# -----------------------------------------------------------------------------
def pack_params(params, input_dim):
    lstm = params["lstm"]
    L = len(lstm)
    H = lstm[0][1].shape[0]            # Whh^T is (H, 4H)
    G = 4 * H
    CH = params["wc1"].shape[1]        # attention/classifier hidden width (64)
    LANE = _rup(max(G, CH, 128), 128)  # common lane width of the packed buffers

    def pad_cols(a):
        a = jnp.asarray(a, jnp.float32)
        if a.ndim == 1:
            a = a.reshape(1, -1)
        return jnp.pad(a, ((0, 0), (0, LANE - a.shape[1])))

    # ---- matrices: each block starts at an 8-row boundary (aligned loads) ----
    mats, m_off, row = [], {}, 0

    def add_mat(name, a):
        nonlocal row
        a = pad_cols(a)
        r = a.shape[0]
        m_off[name] = row
        rp = _rup(r, 8)
        if rp > r:
            a = jnp.pad(a, ((0, rp - r), (0, 0)))
        mats.append(a)
        row += rp

    for l, (wih_t, whh_t, _) in enumerate(lstm):
        add_mat(f"wih{l}", wih_t)          # (Din, 4H)
        add_mat(f"whh{l}", whh_t)          # (H, 4H)
    add_mat("wa1", params["wa1"])          # (H, 64) -> (H, 128)
    add_mat("wc1", params["wc1"])          # (H, 64) -> (H, 128)
    wmat = jnp.concatenate(mats, axis=0)

    # ---- 1-row vectors (biases / folded BN / N=1 weights as rows) ------------
    rows_, v_idx = [], {}

    def add_row(name, r):
        v_idx[name] = len(rows_)
        rows_.append(pad_cols(r))

    for l, (_, _, b) in enumerate(lstm):
        add_row(f"b{l}", b)                            # (1, 4H) fused LSTM bias
    add_row("ba1", params["ba1"])                      # attention hidden bias
    add_row("wa2", params["wa2"].reshape(1, -1))       # attention score weights
    # NOTE: ba2 is dropped entirely -- softmax is shift-invariant.
    add_row("bc1", params["bc1"])
    add_row("bns", params["bn_scale"])
    # BN bias with a constant-1 pad lane at CH so bc2 folds into the wc2 row.
    assert CH < LANE
    bnb = pad_cols(params["bn_bias"]).at[0, CH].set(1.0)
    v_idx["bnb"] = len(rows_)
    rows_.append(bnb)
    wc2 = pad_cols(params["wc2"].reshape(1, -1)).at[0, CH].set(
        jnp.asarray(params["bc2"], jnp.float32).reshape(()))
    v_idx["wc2"] = len(rows_)
    rows_.append(wc2)

    vrows = jnp.concatenate(rows_, axis=0)
    nr = vrows.shape[0]
    if nr % 8:
        vrows = jnp.pad(vrows, ((0, 8 - nr % 8), (0, 0)))

    meta = dict(L=L, H=H, G=G, CH=CH, LANE=LANE,
                din=[input_dim] + [H] * (L - 1),
                m_off=m_off, v_idx=v_idx)
    return dict(wmat=wmat, vrows=vrows), meta


# -----------------------------------------------------------------------------
# Kernel
# -----------------------------------------------------------------------------
def make_kernel(meta, B, Bp, T, D):
    L, H, G = meta["L"], meta["H"], meta["G"]
    din = meta["din"]
    mo, vi = meta["m_off"], meta["v_idx"]

    def kernel(x_ref, wmat_ref, vrows_ref, out_ref, xin_scr, seq_scr):
        f32 = jnp.float32
        V = vrows_ref[...]                       # all 1-row params, one vreg load

        # ---- x (B,T,D) -> padded time-major flat (T*Bp, D), in-kernel --------
        xin_scr[...] = jnp.zeros((T * Bp, D), f32)       # zero the pad rows
        for b in range(B):
            xb = x_ref[b]                                # (T, D), aligned tile
            for t in range(T):
                r = t * Bp + b
                xin_scr[r:r + 1, :] = xb[t:t + 1, :]
        cur = xin_scr[...]                               # (T*Bp, Din)

        # ---- stacked LSTM (dropout between layers: identity in eval mode) ----
        hs = []
        for l in range(L):
            o_ih, o_hh = mo[f"wih{l}"], mo[f"whh{l}"]
            wih = wmat_ref[o_ih:o_ih + din[l], 0:G].astype(jnp.bfloat16)
            whh = wmat_ref[o_hh:o_hh + H, 0:G].astype(jnp.bfloat16)
            b_row = V[vi[f"b{l}"]:vi[f"b{l}"] + 1, 0:G]
            # Hoisted input projection: one bf16 matmul for all T steps.
            gates_x = jnp.dot(cur.astype(jnp.bfloat16), wih,
                              preferred_element_type=f32) + b_row    # (T*Bp, 4H)

            h = None
            c = jnp.zeros((Bp, H), f32)
            hs = []
            for t in range(T):                           # fully unrolled
                g = gates_x[t * Bp:(t + 1) * Bp, :]      # aligned full-vreg slice
                if h is not None:                        # h0 == 0: skip matmul
                    g = g + jnp.dot(h.astype(jnp.bfloat16), whh,
                                    preferred_element_type=f32)
                i_g = jax.nn.sigmoid(g[:, 0 * H:1 * H])
                f_g = jax.nn.sigmoid(g[:, 1 * H:2 * H])
                g_g = jnp.tanh(g[:, 2 * H:3 * H])
                o_g = jax.nn.sigmoid(g[:, 3 * H:4 * H])
                c = f_g * c + i_g * g_g
                h = o_g * jnp.tanh(c)
                hs.append(h)
                seq_scr[t * Bp:(t + 1) * Bp, :] = h      # aligned store
            cur = seq_scr[...]                           # (T*Bp, H)

        seq = cur                                        # last-layer sequence

        # ---- attention: Linear(H,64)->tanh, score = <a1, wa2> (off the MXU) --
        wa1 = wmat_ref[mo["wa1"]:mo["wa1"] + H, :]       # (H, 128) lane-padded
        a1 = jnp.tanh(jnp.dot(seq, wa1, preferred_element_type=f32)
                      + V[vi["ba1"]:vi["ba1"] + 1, :])   # (T*Bp, 128)
        scores = jnp.sum(a1 * V[vi["wa2"]:vi["wa2"] + 1, :],
                         axis=-1, keepdims=True)         # (T*Bp, 1); ba2 dropped

        # ---- softmax over time + context: log-depth trees on vreg values -----
        def _tree(vals, op):
            vals = list(vals)
            while len(vals) > 1:
                nxt = [op(vals[i], vals[i + 1])
                       for i in range(0, len(vals) - 1, 2)]
                if len(vals) % 2:
                    nxt.append(vals[-1])
                vals = nxt
            return vals[0]

        rows = [scores[t * Bp:(t + 1) * Bp, :] for t in range(T)]   # (Bp,1) each
        m = _tree(rows, jnp.maximum)
        es = [jnp.exp(r - m) for r in rows]
        inv = 1.0 / _tree(es, jnp.add)                   # exact normalization
        # context from register-resident last-layer h's (no VMEM re-reads)
        context = _tree([(es[t] * inv) * hs[t] for t in range(T)],
                        jnp.add)                         # (Bp, H)

        # ---- classifier: Linear -> BN(eval, folded) -> ReLU -> Linear -> sigm
        wc1 = wmat_ref[mo["wc1"]:mo["wc1"] + H, :]       # (H, 128) lane-padded
        z = jnp.dot(context, wc1, preferred_element_type=f32) \
            + V[vi["bc1"]:vi["bc1"] + 1, :]
        z = z * V[vi["bns"]:vi["bns"] + 1, :] + V[vi["bnb"]:vi["bnb"] + 1, :]
        z = jnp.maximum(z, 0.0)
        # N=1 matmul as mul + lane reduce; bc2 folded into pad lane CH of wc2.
        logits = jnp.sum(z * V[vi["wc2"]:vi["wc2"] + 1, :],
                         axis=-1, keepdims=True)         # (Bp, 1)
        out_ref[...] = jax.nn.sigmoid(logits)[:B, :]

    return kernel


# -----------------------------------------------------------------------------
# Wrapper
# -----------------------------------------------------------------------------
def fall_detection_forward(x_btd, packed, meta):
    """x_btd: [B, T, D] float32 -> [B, 1] float32 sigmoid probabilities."""
    B, T, D = x_btd.shape
    Bp = _rup(B, 8)
    H = meta["H"]
    kernel = make_kernel(meta, B, Bp, T, D)
    vmem = pl.BlockSpec(memory_space=pltpu.MemorySpace.VMEM)
    return pl.pallas_call(
        kernel,
        out_shape=jax.ShapeDtypeStruct((B, 1), jnp.float32),
        in_specs=[vmem, vmem, vmem],
        out_specs=vmem,
        scratch_shapes=[
            pltpu.VMEM((T * Bp, D), jnp.float32),   # padded time-major input
            pltpu.VMEM((T * Bp, H), jnp.float32),   # per-layer output sequence
        ],
    )(x_btd.astype(jnp.float32), packed["wmat"], packed["vrows"])


# -----------------------------------------------------------------------------
# Deterministic parameter init (synthetic; mirrors nn.Module shapes)
# -----------------------------------------------------------------------------
def init_params(key, input_dim, hidden_dim, num_layers):
    def nrm(k, shape, scale=0.1):
        return (scale * jax.random.normal(k, shape)).astype(jnp.float32)

    keys = iter(jax.random.split(key, 8 * num_layers + 32))
    params = {"lstm": []}
    for layer in range(num_layers):
        din = input_dim if layer == 0 else hidden_dim
        wih = nrm(next(keys), (4 * hidden_dim, din))         # weight_ih_l{k}
        whh = nrm(next(keys), (4 * hidden_dim, hidden_dim))  # weight_hh_l{k}
        b_ih = nrm(next(keys), (4 * hidden_dim,))
        b_hh = nrm(next(keys), (4 * hidden_dim,))
        params["lstm"].append((wih.T, whh.T, (b_ih + b_hh).reshape(1, -1)))

    # attention: Linear(H, 64), Linear(64, 1)
    params["wa1"] = nrm(next(keys), (64, hidden_dim)).T
    params["ba1"] = nrm(next(keys), (1, 64))
    params["wa2"] = nrm(next(keys), (1, 64)).T
    params["ba2"] = nrm(next(keys), (1, 1))

    # classifier: Linear(H, 64) -> BatchNorm1d(64) (eval, folded) -> Linear(64, 1)
    params["wc1"] = nrm(next(keys), (64, hidden_dim)).T
    params["bc1"] = nrm(next(keys), (1, 64))
    gamma = 1.0 + nrm(next(keys), (1, 64))
    beta = nrm(next(keys), (1, 64))
    run_mean = nrm(next(keys), (1, 64))
    run_var = 1.0 + jnp.abs(nrm(next(keys), (1, 64)))
    eps = 1e-5
    bn_scale = gamma / jnp.sqrt(run_var + eps)
    params["bn_scale"] = bn_scale.astype(jnp.float32)
    params["bn_bias"] = (beta - run_mean * bn_scale).astype(jnp.float32)
    params["wc2"] = nrm(next(keys), (1, 64)).T
    params["bc2"] = nrm(next(keys), (1, 1))
    return params


# -----------------------------------------------------------------------------
# Pure-JAX reference (eval-mode PyTorch semantics), all f32
# -----------------------------------------------------------------------------
def reference_forward(x_btd, params):
    B, T, D = x_btd.shape
    H = params["lstm"][0][1].shape[0]
    seq = jnp.transpose(x_btd, (1, 0, 2)).astype(jnp.float32)   # (T, B, D)

    for (wih_t, whh_t, b) in params["lstm"]:
        def step(carry, x_t):
            h, c = carry
            gates = x_t @ wih_t + h @ whh_t + b
            i = jax.nn.sigmoid(gates[:, 0 * H:1 * H])
            f = jax.nn.sigmoid(gates[:, 1 * H:2 * H])
            g = jnp.tanh(gates[:, 2 * H:3 * H])
            o = jax.nn.sigmoid(gates[:, 3 * H:4 * H])
            c_new = f * c + i * g
            h_new = o * jnp.tanh(c_new)
            return (h_new, c_new), h_new

        init = (jnp.zeros((B, H), jnp.float32), jnp.zeros((B, H), jnp.float32))
        _, seq = lax.scan(step, init, seq)

    a1 = jnp.tanh(seq @ params["wa1"] + params["ba1"])
    scores = a1 @ params["wa2"] + params["ba2"]            # (T, B, 1)
    w = jax.nn.softmax(scores, axis=0)
    context = jnp.sum(w * seq, axis=0)                     # (B, H)
    z = context @ params["wc1"] + params["bc1"]
    z = z * params["bn_scale"] + params["bn_bias"]
    z = jnp.maximum(z, 0.0)
    return jax.nn.sigmoid(z @ params["wc2"] + params["bc2"])


# -----------------------------------------------------------------------------
if __name__ == "__main__":
    B, T, D, H, NUM_LAYERS = 4, 8, 16, 32, 2

    key = jax.random.PRNGKey(0)
    k_x, k_p = jax.random.split(key)
    x = jax.random.normal(k_x, (B, T, D), dtype=jnp.float32)
    params = init_params(k_p, D, H, NUM_LAYERS)
    packed, meta = pack_params(params, D)        # one-time weight preprocessing

    out = fall_detection_forward(x, packed, meta)
    out = jax.block_until_ready(out)

    ref = jax.block_until_ready(reference_forward(x, params))
    assert out.shape == (B, 1)
    # bf16 recurrent matmuls (f32 accumulate) leave ~1e-3-class deviation from
    # the pure-f32 reference; 5e-3 gives comfortable margin.
    err = float(jnp.max(jnp.abs(out - ref)))
    assert err < 5e-3, (err, out, ref)

    print("KERNEL_OK")
</pallas_src>

<mosaic_0001>
module attributes {stable_mosaic.version = 11 : i64} {
  func.func @kernel(%arg0: memref<4x8x16xf32, #tpu.memory_space<vmem>>, %arg1: memref<176x128xf32, #tpu.memory_space<vmem>>, %arg2: memref<8x128xf32, #tpu.memory_space<vmem>>, %arg3: memref<4x1xf32, #tpu.memory_space<vmem>>, %arg4: memref<64x16xf32, #tpu.memory_space<vmem>>, %arg5: memref<64x32xf32, #tpu.memory_space<vmem>>) attributes {dimension_semantics = [], scalar_prefetch = 0 : i64, scratch_operands = 2 : i64, tpu.core_type = #tpu.core_type<tc>} {
    %c0 = arith.constant 0 : index
    %c0_0 = arith.constant 0 : index
    %0 = vector.load %arg2[%c0, %c0_0] : memref<8x128xf32, #tpu.memory_space<vmem>>, vector<8x128xf32>
    %cst = arith.constant 0.000000e+00 : f32
    %1 = vector.broadcast %cst : f32 to vector<64x16xf32>
    %c0_1 = arith.constant 0 : index
    %c0_2 = arith.constant 0 : index
    %2 = vector.load %arg4[%c0_1, %c0_2] : memref<64x16xf32, #tpu.memory_space<vmem>>, vector<64x16xf32>
    tpu.vector_store %arg4[%c0_1, %c0_2], %1 {strides = array<i32>} : memref<64x16xf32, #tpu.memory_space<vmem>>, vector<64x16xf32>,
    %c0_3 = arith.constant 0 : index
    %c0_4 = arith.constant 0 : index
    %c0_5 = arith.constant 0 : index
    %3 = vector.load %arg0[%c0_3, %c0_4, %c0_5] : memref<4x8x16xf32, #tpu.memory_space<vmem>>, vector<1x8x16xf32>
    %4 = vector.shape_cast %3 : vector<1x8x16xf32> to vector<8x16xf32>
    %5 = vector.extract_strided_slice %4 {offsets = [0, 0], sizes = [1, 16], strides = [1, 1]} : vector<8x16xf32> to vector<1x16xf32>
    %c0_6 = arith.constant 0 : index
    %c0_7 = arith.constant 0 : index
    %6 = vector.load %arg4[%c0_6, %c0_7] : memref<64x16xf32, #tpu.memory_space<vmem>>, vector<1x16xf32>
    tpu.vector_store %arg4[%c0_6, %c0_7], %5 {strides = array<i32>} : memref<64x16xf32, #tpu.memory_space<vmem>>, vector<1x16xf32>,
    %7 = vector.extract_strided_slice %4 {offsets = [1, 0], sizes = [1, 16], strides = [1, 1]} : vector<8x16xf32> to vector<1x16xf32>
    %c8 = arith.constant 8 : index
    %c0_8 = arith.constant 0 : index
    %8 = vector.load %arg4[%c8, %c0_8] : memref<64x16xf32, #tpu.memory_space<vmem>>, vector<1x16xf32>
    tpu.vector_store %arg4[%c8, %c0_8], %7 {strides = array<i32>} : memref<64x16xf32, #tpu.memory_space<vmem>>, vector<1x16xf32>,
    %9 = vector.extract_strided_slice %4 {offsets = [2, 0], sizes = [1, 16], strides = [1, 1]} : vector<8x16xf32> to vector<1x16xf32>
    %c16 = arith.constant 16 : index
    %c0_9 = arith.constant 0 : index
    %10 = vector.load %arg4[%c16, %c0_9] : memref<64x16xf32, #tpu.memory_space<vmem>>, vector<1x16xf32>
    tpu.vector_store %arg4[%c16, %c0_9], %9 {strides = array<i32>} : memref<64x16xf32, #tpu.memory_space<vmem>>, vector<1x16xf32>,
    %11 = vector.extract_strided_slice %4 {offsets = [3, 0], sizes = [1, 16], strides = [1, 1]} : vector<8x16xf32> to vector<1x16xf32>
    %c24 = arith.constant 24 : index
    %c0_10 = arith.constant 0 : index
    %12 = vector.load %arg4[%c24, %c0_10] : memref<64x16xf32, #tpu.memory_space<vmem>>, vector<1x16xf32>
    tpu.vector_store %arg4[%c24, %c0_10], %11 {strides = array<i32>} : memref<64x16xf32, #tpu.memory_space<vmem>>, vector<1x16xf32>,
    %13 = vector.extract_strided_slice %4 {offsets = [4, 0], sizes = [1, 16], strides = [1, 1]} : vector<8x16xf32> to vector<1x16xf32>
    %c32 = arith.constant 32 : index
    %c0_11 = arith.constant 0 : index
    %14 = vector.load %arg4[%c32, %c0_11] : memref<64x16xf32, #tpu.memory_space<vmem>>, vector<1x16xf32>
    tpu.vector_store %arg4[%c32, %c0_11], %13 {strides = array<i32>} : memref<64x16xf32, #tpu.memory_space<vmem>>, vector<1x16xf32>,
    %15 = vector.extract_strided_slice %4 {offsets = [5, 0], sizes = [1, 16], strides = [1, 1]} : vector<8x16xf32> to vector<1x16xf32>
    %c40 = arith.constant 40 : index
    %c0_12 = arith.constant 0 : index
    %16 = vector.load %arg4[%c40, %c0_12] : memref<64x16xf32, #tpu.memory_space<vmem>>, vector<1x16xf32>
    tpu.vector_store %arg4[%c40, %c0_12], %15 {strides = array<i32>} : memref<64x16xf32, #tpu.memory_space<vmem>>, vector<1x16xf32>,
    %17 = vector.extract_strided_slice %4 {offsets = [6, 0], sizes = [1, 16], strides = [1, 1]} : vector<8x16xf32> to vector<1x16xf32>
    %c48 = arith.constant 48 : index
    %c0_13 = arith.constant 0 : index
    %18 = vector.load %arg4[%c48, %c0_13] : memref<64x16xf32, #tpu.memory_space<vmem>>, vector<1x16xf32>
    tpu.vector_store %arg4[%c48, %c0_13], %17 {strides = array<i32>} : memref<64x16xf32, #tpu.memory_space<vmem>>, vector<1x16xf32>,
    %19 = vector.extract_strided_slice %4 {offsets = [7, 0], sizes = [1, 16], strides = [1, 1]} : vector<8x16xf32> to vector<1x16xf32>
    %c56 = arith.constant 56 : index
    %c0_14 = arith.constant 0 : index
    %20 = vector.load %arg4[%c56, %c0_14] : memref<64x16xf32, #tpu.memory_space<vmem>>, vector<1x16xf32>
    tpu.vector_store %arg4[%c56, %c0_14], %19 {strides = array<i32>} : memref<64x16xf32, #tpu.memory_space<vmem>>, vector<1x16xf32>,
    %c1 = arith.constant 1 : index
    %c0_15 = arith.constant 0 : index
    %c0_16 = arith.constant 0 : index
    %21 = vector.load %arg0[%c1, %c0_15, %c0_16] : memref<4x8x16xf32, #tpu.memory_space<vmem>>, vector<1x8x16xf32>
    %22 = vector.shape_cast %21 : vector<1x8x16xf32> to vector<8x16xf32>
    %23 = vector.extract_strided_slice %22 {offsets = [0, 0], sizes = [1, 16], strides = [1, 1]} : vector<8x16xf32> to vector<1x16xf32>
    %c1_17 = arith.constant 1 : index
    %c0_18 = arith.constant 0 : index
    %24 = vector.load %arg4[%c1_17, %c0_18] : memref<64x16xf32, #tpu.memory_space<vmem>>, vector<1x16xf32>
    tpu.vector_store %arg4[%c1_17, %c0_18], %23 {strides = array<i32>} : memref<64x16xf32, #tpu.memory_space<vmem>>, vector<1x16xf32>,
    %25 = vector.extract_strided_slice %22 {offsets = [1, 0], sizes = [1, 16], strides = [1, 1]} : vector<8x16xf32> to vector<1x16xf32>
    %c9 = arith.constant 9 : index
    %c0_19 = arith.constant 0 : index
    %26 = vector.load %arg4[%c9, %c0_19] : memref<64x16xf32, #tpu.memory_space<vmem>>, vector<1x16xf32>
    tpu.vector_store %arg4[%c9, %c0_19], %25 {strides = array<i32>} : memref<64x16xf32, #tpu.memory_space<vmem>>, vector<1x16xf32>,
    %27 = vector.extract_strided_slice %22 {offsets = [2, 0], sizes = [1, 16], strides = [1, 1]} : vector<8x16xf32> to vector<1x16xf32>
    %c17 = arith.constant 17 : index
    %c0_20 = arith.constant 0 : index
    %28 = vector.load %arg4[%c17, %c0_20] : memref<64x16xf32, #tpu.memory_space<vmem>>, vector<1x16xf32>
    tpu.vector_store %arg4[%c17, %c0_20], %27 {strides = array<i32>} : memref<64x16xf32, #tpu.memory_space<vmem>>, vector<1x16xf32>,
    %29 = vector.extract_strided_slice %22 {offsets = [3, 0], sizes = [1, 16], strides = [1, 1]} : vector<8x16xf32> to vector<1x16xf32>
    %c25 = arith.constant 25 : index
    %c0_21 = arith.constant 0 : index
    %30 = vector.load %arg4[%c25, %c0_21] : memref<64x16xf32, #tpu.memory_space<vmem>>, vector<1x16xf32>
    tpu.vector_store %arg4[%c25, %c0_21], %29 {strides = array<i32>} : memref<64x16xf32, #tpu.memory_space<vmem>>, vector<1x16xf32>,
    %31 = vector.extract_strided_slice %22 {offsets = [4, 0], sizes = [1, 16], strides = [1, 1]} : vector<8x16xf32> to vector<1x16xf32>
    %c33 = arith.constant 33 : index
    %c0_22 = arith.constant 0 : index
    %32 = vector.load %arg4[%c33, %c0_22] : memref<64x16xf32, #tpu.memory_space<vmem>>, vector<1x16xf32>
    tpu.vector_store %arg4[%c33, %c0_22], %31 {strides = array<i32>} : memref<64x16xf32, #tpu.memory_space<vmem>>, vector<1x16xf32>,
    %33 = vector.extract_strided_slice %22 {offsets = [5, 0], sizes = [1, 16], strides = [1, 1]} : vector<8x16xf32> to vector<1x16xf32>
    %c41 = arith.constant 41 : index
    %c0_23 = arith.constant 0 : index
    %34 = vector.load %arg4[%c41, %c0_23] : memref<64x16xf32, #tpu.memory_space<vmem>>, vector<1x16xf32>
    tpu.vector_store %arg4[%c41, %c0_23], %33 {strides = array<i32>} : memref<64x16xf32, #tpu.memory_space<vmem>>, vector<1x16xf32>,
    %35 = vector.extract_strided_slice %22 {offsets = [6, 0], sizes = [1, 16], strides = [1, 1]} : vector<8x16xf32> to vector<1x16xf32>
    %c49 = arith.constant 49 : index
    %c0_24 = arith.constant 0 : index
    %36 = vector.load %arg4[%c49, %c0_24] : memref<64x16xf32, #tpu.memory_space<vmem>>, vector<1x16xf32>
    tpu.vector_store %arg4[%c49, %c0_24], %35 {strides = array<i32>} : memref<64x16xf32, #tpu.memory_space<vmem>>, vector<1x16xf32>,
    %37 = vector.extract_strided_slice %22 {offsets = [7, 0], sizes = [1, 16], strides = [1, 1]} : vector<8x16xf32> to vector<1x16xf32>
    %c57 = arith.constant 57 : index
    %c0_25 = arith.constant 0 : index
    %38 = vector.load %arg4[%c57, %c0_25] : memref<64x16xf32, #tpu.memory_space<vmem>>, vector<1x16xf32>
    tpu.vector_store %arg4[%c57, %c0_25], %37 {strides = array<i32>} : memref<64x16xf32, #tpu.memory_space<vmem>>, vector<1x16xf32>,
    %c2 = arith.constant 2 : index
    %c0_26 = arith.constant 0 : index
    %c0_27 = arith.constant 0 : index
    %39 = vector.load %arg0[%c2, %c0_26, %c0_27] : memref<4x8x16xf32, #tpu.memory_space<vmem>>, vector<1x8x16xf32>
    %40 = vector.shape_cast %39 : vector<1x8x16xf32> to vector<8x16xf32>
    %41 = vector.extract_strided_slice %40 {offsets = [0, 0], sizes = [1, 16], strides = [1, 1]} : vector<8x16xf32> to vector<1x16xf32>
    %c2_28 = arith.constant 2 : index
    %c0_29 = arith.constant 0 : index
    %42 = vector.load %arg4[%c2_28, %c0_29] : memref<64x16xf32, #tpu.memory_space<vmem>>, vector<1x16xf32>
    tpu.vector_store %arg4[%c2_28, %c0_29], %41 {strides = array<i32>} : memref<64x16xf32, #tpu.memory_space<vmem>>, vector<1x16xf32>,
    %43 = vector.extract_strided_slice %40 {offsets = [1, 0], sizes = [1, 16], strides = [1, 1]} : vector<8x16xf32> to vector<1x16xf32>
    %c10 = arith.constant 10 : index
    %c0_30 = arith.constant 0 : index
    %44 = vector.load %arg4[%c10, %c0_30] : memref<64x16xf32, #tpu.memory_space<vmem>>, vector<1x16xf32>
    tpu.vector_store %arg4[%c10, %c0_30], %43 {strides = array<i32>} : memref<64x16xf32, #tpu.memory_space<vmem>>, vector<1x16xf32>,
    %45 = vector.extract_strided_slice %40 {offsets = [2, 0], sizes = [1, 16], strides = [1, 1]} : vector<8x16xf32> to vector<1x16xf32>
    %c18 = arith.constant 18 : index
    %c0_31 = arith.constant 0 : index
    %46 = vector.load %arg4[%c18, %c0_31] : memref<64x16xf32, #tpu.memory_space<vmem>>, vector<1x16xf32>
    tpu.vector_store %arg4[%c18, %c0_31], %45 {strides = array<i32>} : memref<64x16xf32, #tpu.memory_space<vmem>>, vector<1x16xf32>,
    %47 = vector.extract_strided_slice %40 {offsets = [3, 0], sizes = [1, 16], strides = [1, 1]} : vector<8x16xf32> to vector<1x16xf32>
    %c26 = arith.constant 26 : index
    %c0_32 = arith.constant 0 : index
    %48 = vector.load %arg4[%c26, %c0_32] : memref<64x16xf32, #tpu.memory_space<vmem>>, vector<1x16xf32>
    tpu.vector_store %arg4[%c26, %c0_32], %47 {strides = array<i32>} : memref<64x16xf32, #tpu.memory_space<vmem>>, vector<1x16xf32>,
    %49 = vector.extract_strided_slice %40 {offsets = [4, 0], sizes = [1, 16], strides = [1, 1]} : vector<8x16xf32> to vector<1x16xf32>
    %c34 = arith.constant 34 : index
    %c0_33 = arith.constant 0 : index
    %50 = vector.load %arg4[%c34, %c0_33] : memref<64x16xf32, #tpu.memory_space<vmem>>, vector<1x16xf32>
    tpu.vector_store %arg4[%c34, %c0_33], %49 {strides = array<i32>} : memref<64x16xf32, #tpu.memory_space<vmem>>, vector<1x16xf32>,
    %51 = vector.extract_strided_slice %40 {offsets = [5, 0], sizes = [1, 16], strides = [1, 1]} : vector<8x16xf32> to vector<1x16xf32>
    %c42 = arith.constant 42 : index
    %c0_34 = arith.constant 0 : index
    %52 = vector.load %arg4[%c42, %c0_34] : memref<64x16xf32, #tpu.memory_space<vmem>>, vector<1x16xf32>
    tpu.vector_store %arg4[%c42, %c0_34], %51 {strides = array<i32>} : memref<64x16xf32, #tpu.memory_space<vmem>>, vector<1x16xf32>,
    %53 = vector.extract_strided_slice %40 {offsets = [6, 0], sizes = [1, 16], strides = [1, 1]} : vector<8x16xf32> to vector<1x16xf32>
    %c50 = arith.constant 50 : index
    %c0_35 = arith.constant 0 : index
    %54 = vector.load %arg4[%c50, %c0_35] : memref<64x16xf32, #tpu.memory_space<vmem>>, vector<1x16xf32>
    tpu.vector_store %arg4[%c50, %c0_35], %53 {strides = array<i32>} : memref<64x16xf32, #tpu.memory_space<vmem>>, vector<1x16xf32>,
    %55 = vector.extract_strided_slice %40 {offsets = [7, 0], sizes = [1, 16], strides = [1, 1]} : vector<8x16xf32> to vector<1x16xf32>
    %c58 = arith.constant 58 : index
    %c0_36 = arith.constant 0 : index
    %56 = vector.load %arg4[%c58, %c0_36] : memref<64x16xf32, #tpu.memory_space<vmem>>, vector<1x16xf32>
    tpu.vector_store %arg4[%c58, %c0_36], %55 {strides = array<i32>} : memref<64x16xf32, #tpu.memory_space<vmem>>, vector<1x16xf32>,
    %c3 = arith.constant 3 : index
    %c0_37 = arith.constant 0 : index
    %c0_38 = arith.constant 0 : index
    %57 = vector.load %arg0[%c3, %c0_37, %c0_38] : memref<4x8x16xf32, #tpu.memory_space<vmem>>, vector<1x8x16xf32>
    %58 = vector.shape_cast %57 : vector<1x8x16xf32> to vector<8x16xf32>
    %59 = vector.extract_strided_slice %58 {offsets = [0, 0], sizes = [1, 16], strides = [1, 1]} : vector<8x16xf32> to vector<1x16xf32>
    %c3_39 = arith.constant 3 : index
    %c0_40 = arith.constant 0 : index
    %60 = vector.load %arg4[%c3_39, %c0_40] : memref<64x16xf32, #tpu.memory_space<vmem>>, vector<1x16xf32>
    tpu.vector_store %arg4[%c3_39, %c0_40], %59 {strides = array<i32>} : memref<64x16xf32, #tpu.memory_space<vmem>>, vector<1x16xf32>,
    %61 = vector.extract_strided_slice %58 {offsets = [1, 0], sizes = [1, 16], strides = [1, 1]} : vector<8x16xf32> to vector<1x16xf32>
    %c11 = arith.constant 11 : index
    %c0_41 = arith.constant 0 : index
    %62 = vector.load %arg4[%c11, %c0_41] : memref<64x16xf32, #tpu.memory_space<vmem>>, vector<1x16xf32>
    tpu.vector_store %arg4[%c11, %c0_41], %61 {strides = array<i32>} : memref<64x16xf32, #tpu.memory_space<vmem>>, vector<1x16xf32>,
    %63 = vector.extract_strided_slice %58 {offsets = [2, 0], sizes = [1, 16], strides = [1, 1]} : vector<8x16xf32> to vector<1x16xf32>
    %c19 = arith.constant 19 : index
    %c0_42 = arith.constant 0 : index
    %64 = vector.load %arg4[%c19, %c0_42] : memref<64x16xf32, #tpu.memory_space<vmem>>, vector<1x16xf32>
    tpu.vector_store %arg4[%c19, %c0_42], %63 {strides = array<i32>} : memref<64x16xf32, #tpu.memory_space<vmem>>, vector<1x16xf32>,
    %65 = vector.extract_strided_slice %58 {offsets = [3, 0], sizes = [1, 16], strides = [1, 1]} : vector<8x16xf32> to vector<1x16xf32>
    %c27 = arith.constant 27 : index
    %c0_43 = arith.constant 0 : index
    %66 = vector.load %arg4[%c27, %c0_43] : memref<64x16xf32, #tpu.memory_space<vmem>>, vector<1x16xf32>
    tpu.vector_store %arg4[%c27, %c0_43], %65 {strides = array<i32>} : memref<64x16xf32, #tpu.memory_space<vmem>>, vector<1x16xf32>,
    %67 = vector.extract_strided_slice %58 {offsets = [4, 0], sizes = [1, 16], strides = [1, 1]} : vector<8x16xf32> to vector<1x16xf32>
    %c35 = arith.constant 35 : index
    %c0_44 = arith.constant 0 : index
    %68 = vector.load %arg4[%c35, %c0_44] : memref<64x16xf32, #tpu.memory_space<vmem>>, vector<1x16xf32>
    tpu.vector_store %arg4[%c35, %c0_44], %67 {strides = array<i32>} : memref<64x16xf32, #tpu.memory_space<vmem>>, vector<1x16xf32>,
    %69 = vector.extract_strided_slice %58 {offsets = [5, 0], sizes = [1, 16], strides = [1, 1]} : vector<8x16xf32> to vector<1x16xf32>
    %c43 = arith.constant 43 : index
    %c0_45 = arith.constant 0 : index
    %70 = vector.load %arg4[%c43, %c0_45] : memref<64x16xf32, #tpu.memory_space<vmem>>, vector<1x16xf32>
    tpu.vector_store %arg4[%c43, %c0_45], %69 {strides = array<i32>} : memref<64x16xf32, #tpu.memory_space<vmem>>, vector<1x16xf32>,
    %71 = vector.extract_strided_slice %58 {offsets = [6, 0], sizes = [1, 16], strides = [1, 1]} : vector<8x16xf32> to vector<1x16xf32>
    %c51 = arith.constant 51 : index
    %c0_46 = arith.constant 0 : index
    %72 = vector.load %arg4[%c51, %c0_46] : memref<64x16xf32, #tpu.memory_space<vmem>>, vector<1x16xf32>
    tpu.vector_store %arg4[%c51, %c0_46], %71 {strides = array<i32>} : memref<64x16xf32, #tpu.memory_space<vmem>>, vector<1x16xf32>,
    %73 = vector.extract_strided_slice %58 {offsets = [7, 0], sizes = [1, 16], strides = [1, 1]} : vector<8x16xf32> to vector<1x16xf32>
    %c59 = arith.constant 59 : index
    %c0_47 = arith.constant 0 : index
    %74 = vector.load %arg4[%c59, %c0_47] : memref<64x16xf32, #tpu.memory_space<vmem>>, vector<1x16xf32>
    tpu.vector_store %arg4[%c59, %c0_47], %73 {strides = array<i32>} : memref<64x16xf32, #tpu.memory_space<vmem>>, vector<1x16xf32>,
    %c0_48 = arith.constant 0 : index
    %c0_49 = arith.constant 0 : index
    %75 = vector.load %arg4[%c0_48, %c0_49] : memref<64x16xf32, #tpu.memory_space<vmem>>, vector<64x16xf32>
    %c0_50 = arith.constant 0 : index
    %c0_51 = arith.constant 0 : index
    %76 = vector.load %arg1[%c0_50, %c0_51] : memref<176x128xf32, #tpu.memory_space<vmem>>, vector<16x128xf32>
    %77 = arith.truncf %76 : vector<16x128xf32> to vector<16x128xbf16>
    %c16_52 = arith.constant 16 : index
    %c0_53 = arith.constant 0 : index
    %78 = vector.load %arg1[%c16_52, %c0_53] : memref<176x128xf32, #tpu.memory_space<vmem>>, vector<32x128xf32>
    %79 = arith.truncf %78 : vector<32x128xf32> to vector<32x128xbf16>
    %80 = vector.extract_strided_slice %0 {offsets = [0, 0], sizes = [1, 128], strides = [1, 1]} : vector<8x128xf32> to vector<1x128xf32>
    %81 = arith.truncf %75 : vector<64x16xf32> to vector<64x16xbf16>
    %cst_54 = arith.constant dense<0.000000e+00> : vector<64x128xf32>
    %82 = tpu.matmul %81, %77, %cst_54 {dimension_numbers = #tpu.dot_dimension_numbers<[1], [0], [0], [1], [0, 0, 1, 1], [], []>} : vector<64x16xbf16>, vector<16x128xbf16>, vector<64x128xf32> -> vector<64x128xf32>
    %83 = vector.broadcast %80 : vector<1x128xf32> to vector<64x128xf32>
    %84 = arith.addf %82, %83 : vector<64x128xf32>
    %cst_55 = arith.constant 0.000000e+00 : f32
    %85 = vector.broadcast %cst_55 : f32 to vector<8x32xf32>
    %86 = vector.extract_strided_slice %84 {offsets = [0, 0], sizes = [8, 128], strides = [1, 1]} : vector<64x128xf32> to vector<8x128xf32>
    %87 = vector.extract_strided_slice %86 {offsets = [0, 0], sizes = [8, 32], strides = [1, 1]} : vector<8x128xf32> to vector<8x32xf32>
    %88 = arith.negf %87 : vector<8x32xf32>
    %89 = math.exp %88 : vector<8x32xf32>
    %cst_56 = arith.constant 1.000000e+00 : f32
    %90 = vector.broadcast %cst_56 : f32 to vector<8x32xf32>
    %91 = arith.addf %90, %89 : vector<8x32xf32>
    %92 = arith.divf %90, %91 : vector<8x32xf32>
    %93 = vector.extract_strided_slice %86 {offsets = [0, 32], sizes = [8, 32], strides = [1, 1]} : vector<8x128xf32> to vector<8x32xf32>
    %94 = arith.negf %93 : vector<8x32xf32>
    %95 = math.exp %94 : vector<8x32xf32>
    %cst_57 = arith.constant 1.000000e+00 : f32
    %96 = vector.broadcast %cst_57 : f32 to vector<8x32xf32>
    %97 = arith.addf %96, %95 : vector<8x32xf32>
    %98 = arith.divf %96, %97 : vector<8x32xf32>
    %99 = vector.extract_strided_slice %86 {offsets = [0, 64], sizes = [8, 32], strides = [1, 1]} : vector<8x128xf32> to vector<8x32xf32>
    %100 = math.tanh %99 : vector<8x32xf32>
    %101 = vector.extract_strided_slice %86 {offsets = [0, 96], sizes = [8, 32], strides = [1, 1]} : vector<8x128xf32> to vector<8x32xf32>
    %102 = arith.negf %101 : vector<8x32xf32>
    %103 = math.exp %102 : vector<8x32xf32>
    %cst_58 = arith.constant 1.000000e+00 : f32
    %104 = vector.broadcast %cst_58 : f32 to vector<8x32xf32>
    %105 = arith.addf %104, %103 : vector<8x32xf32>
    %106 = arith.divf %104, %105 : vector<8x32xf32>
    %107 = arith.mulf %98, %85 : vector<8x32xf32>
    %108 = arith.mulf %92, %100 : vector<8x32xf32>
    %109 = arith.addf %107, %108 : vector<8x32xf32>
    %110 = math.tanh %109 : vector<8x32xf32>
    %111 = arith.mulf %106, %110 : vector<8x32xf32>
    %c0_59 = arith.constant 0 : index
    %c0_60 = arith.constant 0 : index
    %112 = vector.load %arg5[%c0_59, %c0_60] : memref<64x32xf32, #tpu.memory_space<vmem>>, vector<8x32xf32>
    tpu.vector_store %arg5[%c0_59, %c0_60], %111 {strides = array<i32>} : memref<64x32xf32, #tpu.memory_space<vmem>>, vector<8x32xf32>,
    %113 = vector.extract_strided_slice %84 {offsets = [8, 0], sizes = [8, 128], strides = [1, 1]} : vector<64x128xf32> to vector<8x128xf32>
    %114 = arith.truncf %111 : vector<8x32xf32> to vector<8x32xbf16>
    %cst_61 = arith.constant dense<0.000000e+00> : vector<8x128xf32>
    %115 = tpu.matmul %114, %79, %cst_61 {dimension_numbers = #tpu.dot_dimension_numbers<[1], [0], [0], [1], [0, 0, 1, 1], [], []>} : vector<8x32xbf16>, vector<32x128xbf16>, vector<8x128xf32> -> vector<8x128xf32>
    %116 = arith.addf %113, %115 : vector<8x128xf32>
    %117 = vector.extract_strided_slice %116 {offsets = [0, 0], sizes = [8, 32], strides = [1, 1]} : vector<8x128xf32> to vector<8x32xf32>
    %118 = arith.negf %117 : vector<8x32xf32>
    %119 = math.exp %118 : vector<8x32xf32>
    %cst_62 = arith.constant 1.000000e+00 : f32
    %120 = vector.broadcast %cst_62 : f32 to vector<8x32xf32>
    %121 = arith.addf %120, %119 : vector<8x32xf32>
    %122 = arith.divf %120, %121 : vector<8x32xf32>
    %123 = vector.extract_strided_slice %116 {offsets = [0, 32], sizes = [8, 32], strides = [1, 1]} : vector<8x128xf32> to vector<8x32xf32>
    %124 = arith.negf %123 : vector<8x32xf32>
    %125 = math.exp %124 : vector<8x32xf32>
    %cst_63 = arith.constant 1.000000e+00 : f32
    %126 = vector.broadcast %cst_63 : f32 to vector<8x32xf32>
    %127 = arith.addf %126, %125 : vector<8x32xf32>
    %128 = arith.divf %126, %127 : vector<8x32xf32>
    %129 = vector.extract_strided_slice %116 {offsets = [0, 64], sizes = [8, 32], strides = [1, 1]} : vector<8x128xf32> to vector<8x32xf32>
    %130 = math.tanh %129 : vector<8x32xf32>
    %131 = vector.extract_strided_slice %116 {offsets = [0, 96], sizes = [8, 32], strides = [1, 1]} : vector<8x128xf32> to vector<8x32xf32>
    %132 = arith.negf %131 : vector<8x32xf32>
    %133 = math.exp %132 : vector<8x32xf32>
    %cst_64 = arith.constant 1.000000e+00 : f32
    %134 = vector.broadcast %cst_64 : f32 to vector<8x32xf32>
    %135 = arith.addf %134, %133 : vector<8x32xf32>
    %136 = arith.divf %134, %135 : vector<8x32xf32>
    %137 = arith.mulf %128, %109 : vector<8x32xf32>
    %138 = arith.mulf %122, %130 : vector<8x32xf32>
    %139 = arith.addf %137, %138 : vector<8x32xf32>
    %140 = math.tanh %139 : vector<8x32xf32>
    %141 = arith.mulf %136, %140 : vector<8x32xf32>
    %c8_65 = arith.constant 8 : index
    %c0_66 = arith.constant 0 : index
    %142 = vector.load %arg5[%c8_65, %c0_66] : memref<64x32xf32, #tpu.memory_space<vmem>>, vector<8x32xf32>
    tpu.vector_store %arg5[%c8_65, %c0_66], %141 {strides = array<i32>} : memref<64x32xf32, #tpu.memory_space<vmem>>, vector<8x32xf32>,
    %143 = vector.extract_strided_slice %84 {offsets = [16, 0], sizes = [8, 128], strides = [1, 1]} : vector<64x128xf32> to vector<8x128xf32>
    %144 = arith.truncf %141 : vector<8x32xf32> to vector<8x32xbf16>
    %cst_67 = arith.constant dense<0.000000e+00> : vector<8x128xf32>
    %145 = tpu.matmul %144, %79, %cst_67 {dimension_numbers = #tpu.dot_dimension_numbers<[1], [0], [0], [1], [0, 0, 1, 1], [], []>} : vector<8x32xbf16>, vector<32x128xbf16>, vector<8x128xf32> -> vector<8x128xf32>
    %146 = arith.addf %143, %145 : vector<8x128xf32>
    %147 = vector.extract_strided_slice %146 {offsets = [0, 0], sizes = [8, 32], strides = [1, 1]} : vector<8x128xf32> to vector<8x32xf32>
    %148 = arith.negf %147 : vector<8x32xf32>
    %149 = math.exp %148 : vector<8x32xf32>
    %cst_68 = arith.constant 1.000000e+00 : f32
    %150 = vector.broadcast %cst_68 : f32 to vector<8x32xf32>
    %151 = arith.addf %150, %149 : vector<8x32xf32>
    %152 = arith.divf %150, %151 : vector<8x32xf32>
    %153 = vector.extract_strided_slice %146 {offsets = [0, 32], sizes = [8, 32], strides = [1, 1]} : vector<8x128xf32> to vector<8x32xf32>
    %154 = arith.negf %153 : vector<8x32xf32>
    %155 = math.exp %154 : vector<8x32xf32>
    %cst_69 = arith.constant 1.000000e+00 : f32
    %156 = vector.broadcast %cst_69 : f32 to vector<8x32xf32>
    %157 = arith.addf %156, %155 : vector<8x32xf32>
    %158 = arith.divf %156, %157 : vector<8x32xf32>
    %159 = vector.extract_strided_slice %146 {offsets = [0, 64], sizes = [8, 32], strides = [1, 1]} : vector<8x128xf32> to vector<8x32xf32>
    %160 = math.tanh %159 : vector<8x32xf32>
    %161 = vector.extract_strided_slice %146 {offsets = [0, 96], sizes = [8, 32], strides = [1, 1]} : vector<8x128xf32> to vector<8x32xf32>
    %162 = arith.negf %161 : vector<8x32xf32>
    %163 = math.exp %162 : vector<8x32xf32>
    %cst_70 = arith.constant 1.000000e+00 : f32
    %164 = vector.broadcast %cst_70 : f32 to vector<8x32xf32>
    %165 = arith.addf %164, %163 : vector<8x32xf32>
    %166 = arith.divf %164, %165 : vector<8x32xf32>
    %167 = arith.mulf %158, %139 : vector<8x32xf32>
    %168 = arith.mulf %152, %160 : vector<8x32xf32>
    %169 = arith.addf %167, %168 : vector<8x32xf32>
    %170 = math.tanh %169 : vector<8x32xf32>
    %171 = arith.mulf %166, %170 : vector<8x32xf32>
    %c16_71 = arith.constant 16 : index
    %c0_72 = arith.constant 0 : index
    %172 = vector.load %arg5[%c16_71, %c0_72] : memref<64x32xf32, #tpu.memory_space<vmem>>, vector<8x32xf32>
    tpu.vector_store %arg5[%c16_71, %c0_72], %171 {strides = array<i32>} : memref<64x32xf32, #tpu.memory_space<vmem>>, vector<8x32xf32>,
    %173 = vector.extract_strided_slice %84 {offsets = [24, 0], sizes = [8, 128], strides = [1, 1]} : vector<64x128xf32> to vector<8x128xf32>
    %174 = arith.truncf %171 : vector<8x32xf32> to vector<8x32xbf16>
    %cst_73 = arith.constant dense<0.000000e+00> : vector<8x128xf32>
    %175 = tpu.matmul %174, %79, %cst_73 {dimension_numbers = #tpu.dot_dimension_numbers<[1], [0], [0], [1], [0, 0, 1, 1], [], []>} : vector<8x32xbf16>, vector<32x128xbf16>, vector<8x128xf32> -> vector<8x128xf32>
    %176 = arith.addf %173, %175 : vector<8x128xf32>
    %177 = vector.extract_strided_slice %176 {offsets = [0, 0], sizes = [8, 32], strides = [1, 1]} : vector<8x128xf32> to vector<8x32xf32>
    %178 = arith.negf %177 : vector<8x32xf32>
    %179 = math.exp %178 : vector<8x32xf32>
    %cst_74 = arith.constant 1.000000e+00 : f32
    %180 = vector.broadcast %cst_74 : f32 to vector<8x32xf32>
    %181 = arith.addf %180, %179 : vector<8x32xf32>
    %182 = arith.divf %180, %181 : vector<8x32xf32>
    %183 = vector.extract_strided_slice %176 {offsets = [0, 32], sizes = [8, 32], strides = [1, 1]} : vector<8x128xf32> to vector<8x32xf32>
    %184 = arith.negf %183 : vector<8x32xf32>
    %185 = math.exp %184 : vector<8x32xf32>
    %cst_75 = arith.constant 1.000000e+00 : f32
    %186 = vector.broadcast %cst_75 : f32 to vector<8x32xf32>
    %187 = arith.addf %186, %185 : vector<8x32xf32>
    %188 = arith.divf %186, %187 : vector<8x32xf32>
    %189 = vector.extract_strided_slice %176 {offsets = [0, 64], sizes = [8, 32], strides = [1, 1]} : vector<8x128xf32> to vector<8x32xf32>
    %190 = math.tanh %189 : vector<8x32xf32>
    %191 = vector.extract_strided_slice %176 {offsets = [0, 96], sizes = [8, 32], strides = [1, 1]} : vector<8x128xf32> to vector<8x32xf32>
    %192 = arith.negf %191 : vector<8x32xf32>
    %193 = math.exp %192 : vector<8x32xf32>
    %cst_76 = arith.constant 1.000000e+00 : f32
    %194 = vector.broadcast %cst_76 : f32 to vector<8x32xf32>
    %195 = arith.addf %194, %193 : vector<8x32xf32>
    %196 = arith.divf %194, %195 : vector<8x32xf32>
    %197 = arith.mulf %188, %169 : vector<8x32xf32>
    %198 = arith.mulf %182, %190 : vector<8x32xf32>
    %199 = arith.addf %197, %198 : vector<8x32xf32>
    %200 = math.tanh %199 : vector<8x32xf32>
    %201 = arith.mulf %196, %200 : vector<8x32xf32>
    %c24_77 = arith.constant 24 : index
    %c0_78 = arith.constant 0 : index
    %202 = vector.load %arg5[%c24_77, %c0_78] : memref<64x32xf32, #tpu.memory_space<vmem>>, vector<8x32xf32>
    tpu.vector_store %arg5[%c24_77, %c0_78], %201 {strides = array<i32>} : memref<64x32xf32, #tpu.memory_space<vmem>>, vector<8x32xf32>,
    %203 = vector.extract_strided_slice %84 {offsets = [32, 0], sizes = [8, 128], strides = [1, 1]} : vector<64x128xf32> to vector<8x128xf32>
    %204 = arith.truncf %201 : vector<8x32xf32> to vector<8x32xbf16>
    %cst_79 = arith.constant dense<0.000000e+00> : vector<8x128xf32>
    %205 = tpu.matmul %204, %79, %cst_79 {dimension_numbers = #tpu.dot_dimension_numbers<[1], [0], [0], [1], [0, 0, 1, 1], [], []>} : vector<8x32xbf16>, vector<32x128xbf16>, vector<8x128xf32> -> vector<8x128xf32>
    %206 = arith.addf %203, %205 : vector<8x128xf32>
    %207 = vector.extract_strided_slice %206 {offsets = [0, 0], sizes = [8, 32], strides = [1, 1]} : vector<8x128xf32> to vector<8x32xf32>
    %208 = arith.negf %207 : vector<8x32xf32>
    %209 = math.exp %208 : vector<8x32xf32>
    %cst_80 = arith.constant 1.000000e+00 : f32
    %210 = vector.broadcast %cst_80 : f32 to vector<8x32xf32>
    %211 = arith.addf %210, %209 : vector<8x32xf32>
    %212 = arith.divf %210, %211 : vector<8x32xf32>
    %213 = vector.extract_strided_slice %206 {offsets = [0, 32], sizes = [8, 32], strides = [1, 1]} : vector<8x128xf32> to vector<8x32xf32>
    %214 = arith.negf %213 : vector<8x32xf32>
    %215 = math.exp %214 : vector<8x32xf32>
    %cst_81 = arith.constant 1.000000e+00 : f32
    %216 = vector.broadcast %cst_81 : f32 to vector<8x32xf32>
    %217 = arith.addf %216, %215 : vector<8x32xf32>
    %218 = arith.divf %216, %217 : vector<8x32xf32>
    %219 = vector.extract_strided_slice %206 {offsets = [0, 64], sizes = [8, 32], strides = [1, 1]} : vector<8x128xf32> to vector<8x32xf32>
    %220 = math.tanh %219 : vector<8x32xf32>
    %221 = vector.extract_strided_slice %206 {offsets = [0, 96], sizes = [8, 32], strides = [1, 1]} : vector<8x128xf32> to vector<8x32xf32>
    %222 = arith.negf %221 : vector<8x32xf32>
    %223 = math.exp %222 : vector<8x32xf32>
    %cst_82 = arith.constant 1.000000e+00 : f32
    %224 = vector.broadcast %cst_82 : f32 to vector<8x32xf32>
    %225 = arith.addf %224, %223 : vector<8x32xf32>
    %226 = arith.divf %224, %225 : vector<8x32xf32>
    %227 = arith.mulf %218, %199 : vector<8x32xf32>
    %228 = arith.mulf %212, %220 : vector<8x32xf32>
    %229 = arith.addf %227, %228 : vector<8x32xf32>
    %230 = math.tanh %229 : vector<8x32xf32>
    %231 = arith.mulf %226, %230 : vector<8x32xf32>
    %c32_83 = arith.constant 32 : index
    %c0_84 = arith.constant 0 : index
    %232 = vector.load %arg5[%c32_83, %c0_84] : memref<64x32xf32, #tpu.memory_space<vmem>>, vector<8x32xf32>
    tpu.vector_store %arg5[%c32_83, %c0_84], %231 {strides = array<i32>} : memref<64x32xf32, #tpu.memory_space<vmem>>, vector<8x32xf32>,
    %233 = vector.extract_strided_slice %84 {offsets = [40, 0], sizes = [8, 128], strides = [1, 1]} : vector<64x128xf32> to vector<8x128xf32>
    %234 = arith.truncf %231 : vector<8x32xf32> to vector<8x32xbf16>
    %cst_85 = arith.constant dense<0.000000e+00> : vector<8x128xf32>
    %235 = tpu.matmul %234, %79, %cst_85 {dimension_numbers = #tpu.dot_dimension_numbers<[1], [0], [0], [1], [0, 0, 1, 1], [], []>} : vector<8x32xbf16>, vector<32x128xbf16>, vector<8x128xf32> -> vector<8x128xf32>
    %236 = arith.addf %233, %235 : vector<8x128xf32>
    %237 = vector.extract_strided_slice %236 {offsets = [0, 0], sizes = [8, 32], strides = [1, 1]} : vector<8x128xf32> to vector<8x32xf32>
    %238 = arith.negf %237 : vector<8x32xf32>
    %239 = math.exp %238 : vector<8x32xf32>
    %cst_86 = arith.constant 1.000000e+00 : f32
    %240 = vector.broadcast %cst_86 : f32 to vector<8x32xf32>
    %241 = arith.addf %240, %239 : vector<8x32xf32>
    %242 = arith.divf %240, %241 : vector<8x32xf32>
    %243 = vector.extract_strided_slice %236 {offsets = [0, 32], sizes = [8, 32], strides = [1, 1]} : vector<8x128xf32> to vector<8x32xf32>
    %244 = arith.negf %243 : vector<8x32xf32>
    %245 = math.exp %244 : vector<8x32xf32>
    %cst_87 = arith.constant 1.000000e+00 : f32
    %246 = vector.broadcast %cst_87 : f32 to vector<8x32xf32>
    %247 = arith.addf %246, %245 : vector<8x32xf32>
    %248 = arith.divf %246, %247 : vector<8x32xf32>
    %249 = vector.extract_strided_slice %236 {offsets = [0, 64], sizes = [8, 32], strides = [1, 1]} : vector<8x128xf32> to vector<8x32xf32>
    %250 = math.tanh %249 : vector<8x32xf32>
    %251 = vector.extract_strided_slice %236 {offsets = [0, 96], sizes = [8, 32], strides = [1, 1]} : vector<8x128xf32> to vector<8x32xf32>
    %252 = arith.negf %251 : vector<8x32xf32>
    %253 = math.exp %252 : vector<8x32xf32>
    %cst_88 = arith.constant 1.000000e+00 : f32
    %254 = vector.broadcast %cst_88 : f32 to vector<8x32xf32>
    %255 = arith.addf %254, %253 : vector<8x32xf32>
    %256 = arith.divf %254, %255 : vector<8x32xf32>
    %257 = arith.mulf %248, %229 : vector<8x32xf32>
    %258 = arith.mulf %242, %250 : vector<8x32xf32>
    %259 = arith.addf %257, %258 : vector<8x32xf32>
    %260 = math.tanh %259 : vector<8x32xf32>
    %261 = arith.mulf %256, %260 : vector<8x32xf32>
    %c40_89 = arith.constant 40 : index
    %c0_90 = arith.constant 0 : index
    %262 = vector.load %arg5[%c40_89, %c0_90] : memref<64x32xf32, #tpu.memory_space<vmem>>, vector<8x32xf32>
    tpu.vector_store %arg5[%c40_89, %c0_90], %261 {strides = array<i32>} : memref<64x32xf32, #tpu.memory_space<vmem>>, vector<8x32xf32>,
    %263 = vector.extract_strided_slice %84 {offsets = [48, 0], sizes = [8, 128], strides = [1, 1]} : vector<64x128xf32> to vector<8x128xf32>
    %264 = arith.truncf %261 : vector<8x32xf32> to vector<8x32xbf16>
    %cst_91 = arith.constant dense<0.000000e+00> : vector<8x128xf32>
    %265 = tpu.matmul %264, %79, %cst_91 {dimension_numbers = #tpu.dot_dimension_numbers<[1], [0], [0], [1], [0, 0, 1, 1], [], []>} : vector<8x32xbf16>, vector<32x128xbf16>, vector<8x128xf32> -> vector<8x128xf32>
    %266 = arith.addf %263, %265 : vector<8x128xf32>
    %267 = vector.extract_strided_slice %266 {offsets = [0, 0], sizes = [8, 32], strides = [1, 1]} : vector<8x128xf32> to vector<8x32xf32>
    %268 = arith.negf %267 : vector<8x32xf32>
    %269 = math.exp %268 : vector<8x32xf32>
    %cst_92 = arith.constant 1.000000e+00 : f32
    %270 = vector.broadcast %cst_92 : f32 to vector<8x32xf32>
    %271 = arith.addf %270, %269 : vector<8x32xf32>
    %272 = arith.divf %270, %271 : vector<8x32xf32>
    %273 = vector.extract_strided_slice %266 {offsets = [0, 32], sizes = [8, 32], strides = [1, 1]} : vector<8x128xf32> to vector<8x32xf32>
    %274 = arith.negf %273 : vector<8x32xf32>
    %275 = math.exp %274 : vector<8x32xf32>
    %cst_93 = arith.constant 1.000000e+00 : f32
    %276 = vector.broadcast %cst_93 : f32 to vector<8x32xf32>
    %277 = arith.addf %276, %275 : vector<8x32xf32>
    %278 = arith.divf %276, %277 : vector<8x32xf32>
    %279 = vector.extract_strided_slice %266 {offsets = [0, 64], sizes = [8, 32], strides = [1, 1]} : vector<8x128xf32> to vector<8x32xf32>
    %280 = math.tanh %279 : vector<8x32xf32>
    %281 = vector.extract_strided_slice %266 {offsets = [0, 96], sizes = [8, 32], strides = [1, 1]} : vector<8x128xf32> to vector<8x32xf32>
    %282 = arith.negf %281 : vector<8x32xf32>
    %283 = math.exp %282 : vector<8x32xf32>
    %cst_94 = arith.constant 1.000000e+00 : f32
    %284 = vector.broadcast %cst_94 : f32 to vector<8x32xf32>
    %285 = arith.addf %284, %283 : vector<8x32xf32>
    %286 = arith.divf %284, %285 : vector<8x32xf32>
    %287 = arith.mulf %278, %259 : vector<8x32xf32>
    %288 = arith.mulf %272, %280 : vector<8x32xf32>
    %289 = arith.addf %287, %288 : vector<8x32xf32>
    %290 = math.tanh %289 : vector<8x32xf32>
    %291 = arith.mulf %286, %290 : vector<8x32xf32>
    %c48_95 = arith.constant 48 : index
    %c0_96 = arith.constant 0 : index
    %292 = vector.load %arg5[%c48_95, %c0_96] : memref<64x32xf32, #tpu.memory_space<vmem>>, vector<8x32xf32>
    tpu.vector_store %arg5[%c48_95, %c0_96], %291 {strides = array<i32>} : memref<64x32xf32, #tpu.memory_space<vmem>>, vector<8x32xf32>,
    %293 = vector.extract_strided_slice %84 {offsets = [56, 0], sizes = [8, 128], strides = [1, 1]} : vector<64x128xf32> to vector<8x128xf32>
    %294 = arith.truncf %291 : vector<8x32xf32> to vector<8x32xbf16>
    %cst_97 = arith.constant dense<0.000000e+00> : vector<8x128xf32>
    %295 = tpu.matmul %294, %79, %cst_97 {dimension_numbers = #tpu.dot_dimension_numbers<[1], [0], [0], [1], [0, 0, 1, 1], [], []>} : vector<8x32xbf16>, vector<32x128xbf16>, vector<8x128xf32> -> vector<8x128xf32>
    %296 = arith.addf %293, %295 : vector<8x128xf32>
    %297 = vector.extract_strided_slice %296 {offsets = [0, 0], sizes = [8, 32], strides = [1, 1]} : vector<8x128xf32> to vector<8x32xf32>
    %298 = arith.negf %297 : vector<8x32xf32>
    %299 = math.exp %298 : vector<8x32xf32>
    %cst_98 = arith.constant 1.000000e+00 : f32
    %300 = vector.broadcast %cst_98 : f32 to vector<8x32xf32>
    %301 = arith.addf %300, %299 : vector<8x32xf32>
    %302 = arith.divf %300, %301 : vector<8x32xf32>
    %303 = vector.extract_strided_slice %296 {offsets = [0, 32], sizes = [8, 32], strides = [1, 1]} : vector<8x128xf32> to vector<8x32xf32>
    %304 = arith.negf %303 : vector<8x32xf32>
    %305 = math.exp %304 : vector<8x32xf32>
    %cst_99 = arith.constant 1.000000e+00 : f32
    %306 = vector.broadcast %cst_99 : f32 to vector<8x32xf32>
    %307 = arith.addf %306, %305 : vector<8x32xf32>
    %308 = arith.divf %306, %307 : vector<8x32xf32>
    %309 = vector.extract_strided_slice %296 {offsets = [0, 64], sizes = [8, 32], strides = [1, 1]} : vector<8x128xf32> to vector<8x32xf32>
    %310 = math.tanh %309 : vector<8x32xf32>
    %311 = vector.extract_strided_slice %296 {offsets = [0, 96], sizes = [8, 32], strides = [1, 1]} : vector<8x128xf32> to vector<8x32xf32>
    %312 = arith.negf %311 : vector<8x32xf32>
    %313 = math.exp %312 : vector<8x32xf32>
    %cst_100 = arith.constant 1.000000e+00 : f32
    %314 = vector.broadcast %cst_100 : f32 to vector<8x32xf32>
    %315 = arith.addf %314, %313 : vector<8x32xf32>
    %316 = arith.divf %314, %315 : vector<8x32xf32>
    %317 = arith.mulf %308, %289 : vector<8x32xf32>
    %318 = arith.mulf %302, %310 : vector<8x32xf32>
    %319 = arith.addf %317, %318 : vector<8x32xf32>
    %320 = math.tanh %319 : vector<8x32xf32>
    %321 = arith.mulf %316, %320 : vector<8x32xf32>
    %c56_101 = arith.constant 56 : index
    %c0_102 = arith.constant 0 : index
    %322 = vector.load %arg5[%c56_101, %c0_102] : memref<64x32xf32, #tpu.memory_space<vmem>>, vector<8x32xf32>
    tpu.vector_store %arg5[%c56_101, %c0_102], %321 {strides = array<i32>} : memref<64x32xf32, #tpu.memory_space<vmem>>, vector<8x32xf32>,
    %c0_103 = arith.constant 0 : index
    %c0_104 = arith.constant 0 : index
    %323 = vector.load %arg5[%c0_103, %c0_104] : memref<64x32xf32, #tpu.memory_space<vmem>>, vector<64x32xf32>
    %c48_105 = arith.constant 48 : index
    %c0_106 = arith.constant 0 : index
    %324 = vector.load %arg1[%c48_105, %c0_106] : memref<176x128xf32, #tpu.memory_space<vmem>>, vector<32x128xf32>
    %325 = arith.truncf %324 : vector<32x128xf32> to vector<32x128xbf16>
    %c80 = arith.constant 80 : index
    %c0_107 = arith.constant 0 : index
    %326 = vector.load %arg1[%c80, %c0_107] : memref<176x128xf32, #tpu.memory_space<vmem>>, vector<32x128xf32>
    %327 = arith.truncf %326 : vector<32x128xf32> to vector<32x128xbf16>
    %328 = vector.extract_strided_slice %0 {offsets = [1, 0], sizes = [1, 128], strides = [1, 1]} : vector<8x128xf32> to vector<1x128xf32>
    %329 = arith.truncf %323 : vector<64x32xf32> to vector<64x32xbf16>
    %cst_108 = arith.constant dense<0.000000e+00> : vector<64x128xf32>
    %330 = tpu.matmul %329, %325, %cst_108 {dimension_numbers = #tpu.dot_dimension_numbers<[1], [0], [0], [1], [0, 0, 1, 1], [], []>} : vector<64x32xbf16>, vector<32x128xbf16>, vector<64x128xf32> -> vector<64x128xf32>
    %331 = vector.broadcast %328 : vector<1x128xf32> to vector<64x128xf32>
    %332 = arith.addf %330, %331 : vector<64x128xf32>
    %cst_109 = arith.constant 0.000000e+00 : f32
    %333 = vector.broadcast %cst_109 : f32 to vector<8x32xf32>
    %334 = vector.extract_strided_slice %332 {offsets = [0, 0], sizes = [8, 128], strides = [1, 1]} : vector<64x128xf32> to vector<8x128xf32>
    %335 = vector.extract_strided_slice %334 {offsets = [0, 0], sizes = [8, 32], strides = [1, 1]} : vector<8x128xf32> to vector<8x32xf32>
    %336 = arith.negf %335 : vector<8x32xf32>
    %337 = math.exp %336 : vector<8x32xf32>
    %cst_110 = arith.constant 1.000000e+00 : f32
    %338 = vector.broadcast %cst_110 : f32 to vector<8x32xf32>
    %339 = arith.addf %338, %337 : vector<8x32xf32>
    %340 = arith.divf %338, %339 : vector<8x32xf32>
    %341 = vector.extract_strided_slice %334 {offsets = [0, 32], sizes = [8, 32], strides = [1, 1]} : vector<8x128xf32> to vector<8x32xf32>
    %342 = arith.negf %341 : vector<8x32xf32>
    %343 = math.exp %342 : vector<8x32xf32>
    %cst_111 = arith.constant 1.000000e+00 : f32
    %344 = vector.broadcast %cst_111 : f32 to vector<8x32xf32>
    %345 = arith.addf %344, %343 : vector<8x32xf32>
    %346 = arith.divf %344, %345 : vector<8x32xf32>
    %347 = vector.extract_strided_slice %334 {offsets = [0, 64], sizes = [8, 32], strides = [1, 1]} : vector<8x128xf32> to vector<8x32xf32>
    %348 = math.tanh %347 : vector<8x32xf32>
    %349 = vector.extract_strided_slice %334 {offsets = [0, 96], sizes = [8, 32], strides = [1, 1]} : vector<8x128xf32> to vector<8x32xf32>
    %350 = arith.negf %349 : vector<8x32xf32>
    %351 = math.exp %350 : vector<8x32xf32>
    %cst_112 = arith.constant 1.000000e+00 : f32
    %352 = vector.broadcast %cst_112 : f32 to vector<8x32xf32>
    %353 = arith.addf %352, %351 : vector<8x32xf32>
    %354 = arith.divf %352, %353 : vector<8x32xf32>
    %355 = arith.mulf %346, %333 : vector<8x32xf32>
    %356 = arith.mulf %340, %348 : vector<8x32xf32>
    %357 = arith.addf %355, %356 : vector<8x32xf32>
    %358 = math.tanh %357 : vector<8x32xf32>
    %359 = arith.mulf %354, %358 : vector<8x32xf32>
    %c0_113 = arith.constant 0 : index
    %c0_114 = arith.constant 0 : index
    %360 = vector.load %arg5[%c0_113, %c0_114] : memref<64x32xf32, #tpu.memory_space<vmem>>, vector<8x32xf32>
    tpu.vector_store %arg5[%c0_113, %c0_114], %359 {strides = array<i32>} : memref<64x32xf32, #tpu.memory_space<vmem>>, vector<8x32xf32>,
    %361 = vector.extract_strided_slice %332 {offsets = [8, 0], sizes = [8, 128], strides = [1, 1]} : vector<64x128xf32> to vector<8x128xf32>
    %362 = arith.truncf %359 : vector<8x32xf32> to vector<8x32xbf16>
    %cst_115 = arith.constant dense<0.000000e+00> : vector<8x128xf32>
    %363 = tpu.matmul %362, %327, %cst_115 {dimension_numbers = #tpu.dot_dimension_numbers<[1], [0], [0], [1], [0, 0, 1, 1], [], []>} : vector<8x32xbf16>, vector<32x128xbf16>, vector<8x128xf32> -> vector<8x128xf32>
    %364 = arith.addf %361, %363 : vector<8x128xf32>
    %365 = vector.extract_strided_slice %364 {offsets = [0, 0], sizes = [8, 32], strides = [1, 1]} : vector<8x128xf32> to vector<8x32xf32>
    %366 = arith.negf %365 : vector<8x32xf32>
    %367 = math.exp %366 : vector<8x32xf32>
    %cst_116 = arith.constant 1.000000e+00 : f32
    %368 = vector.broadcast %cst_116 : f32 to vector<8x32xf32>
    %369 = arith.addf %368, %367 : vector<8x32xf32>
    %370 = arith.divf %368, %369 : vector<8x32xf32>
    %371 = vector.extract_strided_slice %364 {offsets = [0, 32], sizes = [8, 32], strides = [1, 1]} : vector<8x128xf32> to vector<8x32xf32>
    %372 = arith.negf %371 : vector<8x32xf32>
    %373 = math.exp %372 : vector<8x32xf32>
    %cst_117 = arith.constant 1.000000e+00 : f32
    %374 = vector.broadcast %cst_117 : f32 to vector<8x32xf32>
    %375 = arith.addf %374, %373 : vector<8x32xf32>
    %376 = arith.divf %374, %375 : vector<8x32xf32>
    %377 = vector.extract_strided_slice %364 {offsets = [0, 64], sizes = [8, 32], strides = [1, 1]} : vector<8x128xf32> to vector<8x32xf32>
    %378 = math.tanh %377 : vector<8x32xf32>
    %379 = vector.extract_strided_slice %364 {offsets = [0, 96], sizes = [8, 32], strides = [1, 1]} : vector<8x128xf32> to vector<8x32xf32>
    %380 = arith.negf %379 : vector<8x32xf32>
    %381 = math.exp %380 : vector<8x32xf32>
    %cst_118 = arith.constant 1.000000e+00 : f32
    %382 = vector.broadcast %cst_118 : f32 to vector<8x32xf32>
    %383 = arith.addf %382, %381 : vector<8x32xf32>
    %384 = arith.divf %382, %383 : vector<8x32xf32>
    %385 = arith.mulf %376, %357 : vector<8x32xf32>
    %386 = arith.mulf %370, %378 : vector<8x32xf32>
    %387 = arith.addf %385, %386 : vector<8x32xf32>
    %388 = math.tanh %387 : vector<8x32xf32>
    %389 = arith.mulf %384, %388 : vector<8x32xf32>
    %c8_119 = arith.constant 8 : index
    %c0_120 = arith.constant 0 : index
    %390 = vector.load %arg5[%c8_119, %c0_120] : memref<64x32xf32, #tpu.memory_space<vmem>>, vector<8x32xf32>
    tpu.vector_store %arg5[%c8_119, %c0_120], %389 {strides = array<i32>} : memref<64x32xf32, #tpu.memory_space<vmem>>, vector<8x32xf32>,
    %391 = vector.extract_strided_slice %332 {offsets = [16, 0], sizes = [8, 128], strides = [1, 1]} : vector<64x128xf32> to vector<8x128xf32>
    %392 = arith.truncf %389 : vector<8x32xf32> to vector<8x32xbf16>
    %cst_121 = arith.constant dense<0.000000e+00> : vector<8x128xf32>
    %393 = tpu.matmul %392, %327, %cst_121 {dimension_numbers = #tpu.dot_dimension_numbers<[1], [0], [0], [1], [0, 0, 1, 1], [], []>} : vector<8x32xbf16>, vector<32x128xbf16>, vector<8x128xf32> -> vector<8x128xf32>
    %394 = arith.addf %391, %393 : vector<8x128xf32>
    %395 = vector.extract_strided_slice %394 {offsets = [0, 0], sizes = [8, 32], strides = [1, 1]} : vector<8x128xf32> to vector<8x32xf32>
    %396 = arith.negf %395 : vector<8x32xf32>
    %397 = math.exp %396 : vector<8x32xf32>
    %cst_122 = arith.constant 1.000000e+00 : f32
    %398 = vector.broadcast %cst_122 : f32 to vector<8x32xf32>
    %399 = arith.addf %398, %397 : vector<8x32xf32>
    %400 = arith.divf %398, %399 : vector<8x32xf32>
    %401 = vector.extract_strided_slice %394 {offsets = [0, 32], sizes = [8, 32], strides = [1, 1]} : vector<8x128xf32> to vector<8x32xf32>
    %402 = arith.negf %401 : vector<8x32xf32>
    %403 = math.exp %402 : vector<8x32xf32>
    %cst_123 = arith.constant 1.000000e+00 : f32
    %404 = vector.broadcast %cst_123 : f32 to vector<8x32xf32>
    %405 = arith.addf %404, %403 : vector<8x32xf32>
    %406 = arith.divf %404, %405 : vector<8x32xf32>
    %407 = vector.extract_strided_slice %394 {offsets = [0, 64], sizes = [8, 32], strides = [1, 1]} : vector<8x128xf32> to vector<8x32xf32>
    %408 = math.tanh %407 : vector<8x32xf32>
    %409 = vector.extract_strided_slice %394 {offsets = [0, 96], sizes = [8, 32], strides = [1, 1]} : vector<8x128xf32> to vector<8x32xf32>
    %410 = arith.negf %409 : vector<8x32xf32>
    %411 = math.exp %410 : vector<8x32xf32>
    %cst_124 = arith.constant 1.000000e+00 : f32
    %412 = vector.broadcast %cst_124 : f32 to vector<8x32xf32>
    %413 = arith.addf %412, %411 : vector<8x32xf32>
    %414 = arith.divf %412, %413 : vector<8x32xf32>
    %415 = arith.mulf %406, %387 : vector<8x32xf32>
    %416 = arith.mulf %400, %408 : vector<8x32xf32>
    %417 = arith.addf %415, %416 : vector<8x32xf32>
    %418 = math.tanh %417 : vector<8x32xf32>
    %419 = arith.mulf %414, %418 : vector<8x32xf32>
    %c16_125 = arith.constant 16 : index
    %c0_126 = arith.constant 0 : index
    %420 = vector.load %arg5[%c16_125, %c0_126] : memref<64x32xf32, #tpu.memory_space<vmem>>, vector<8x32xf32>
    tpu.vector_store %arg5[%c16_125, %c0_126], %419 {strides = array<i32>} : memref<64x32xf32, #tpu.memory_space<vmem>>, vector<8x32xf32>,
    %421 = vector.extract_strided_slice %332 {offsets = [24, 0], sizes = [8, 128], strides = [1, 1]} : vector<64x128xf32> to vector<8x128xf32>
    %422 = arith.truncf %419 : vector<8x32xf32> to vector<8x32xbf16>
    %cst_127 = arith.constant dense<0.000000e+00> : vector<8x128xf32>
    %423 = tpu.matmul %422, %327, %cst_127 {dimension_numbers = #tpu.dot_dimension_numbers<[1], [0], [0], [1], [0, 0, 1, 1], [], []>} : vector<8x32xbf16>, vector<32x128xbf16>, vector<8x128xf32> -> vector<8x128xf32>
    %424 = arith.addf %421, %423 : vector<8x128xf32>
    %425 = vector.extract_strided_slice %424 {offsets = [0, 0], sizes = [8, 32], strides = [1, 1]} : vector<8x128xf32> to vector<8x32xf32>
    %426 = arith.negf %425 : vector<8x32xf32>
    %427 = math.exp %426 : vector<8x32xf32>
    %cst_128 = arith.constant 1.000000e+00 : f32
    %428 = vector.broadcast %cst_128 : f32 to vector<8x32xf32>
    %429 = arith.addf %428, %427 : vector<8x32xf32>
    %430 = arith.divf %428, %429 : vector<8x32xf32>
    %431 = vector.extract_strided_slice %424 {offsets = [0, 32], sizes = [8, 32], strides = [1, 1]} : vector<8x128xf32> to vector<8x32xf32>
    %432 = arith.negf %431 : vector<8x32xf32>
    %433 = math.exp %432 : vector<8x32xf32>
    %cst_129 = arith.constant 1.000000e+00 : f32
    %434 = vector.broadcast %cst_129 : f32 to vector<8x32xf32>
    %435 = arith.addf %434, %433 : vector<8x32xf32>
    %436 = arith.divf %434, %435 : vector<8x32xf32>
    %437 = vector.extract_strided_slice %424 {offsets = [0, 64], sizes = [8, 32], strides = [1, 1]} : vector<8x128xf32> to vector<8x32xf32>
    %438 = math.tanh %437 : vector<8x32xf32>
    %439 = vector.extract_strided_slice %424 {offsets = [0, 96], sizes = [8, 32], strides = [1, 1]} : vector<8x128xf32> to vector<8x32xf32>
    %440 = arith.negf %439 : vector<8x32xf32>
    %441 = math.exp %440 : vector<8x32xf32>
    %cst_130 = arith.constant 1.000000e+00 : f32
    %442 = vector.broadcast %cst_130 : f32 to vector<8x32xf32>
    %443 = arith.addf %442, %441 : vector<8x32xf32>
    %444 = arith.divf %442, %443 : vector<8x32xf32>
    %445 = arith.mulf %436, %417 : vector<8x32xf32>
    %446 = arith.mulf %430, %438 : vector<8x32xf32>
    %447 = arith.addf %445, %446 : vector<8x32xf32>
    %448 = math.tanh %447 : vector<8x32xf32>
    %449 = arith.mulf %444, %448 : vector<8x32xf32>
    %c24_131 = arith.constant 24 : index
    %c0_132 = arith.constant 0 : index
    %450 = vector.load %arg5[%c24_131, %c0_132] : memref<64x32xf32, #tpu.memory_space<vmem>>, vector<8x32xf32>
    tpu.vector_store %arg5[%c24_131, %c0_132], %449 {strides = array<i32>} : memref<64x32xf32, #tpu.memory_space<vmem>>, vector<8x32xf32>,
    %451 = vector.extract_strided_slice %332 {offsets = [32, 0], sizes = [8, 128], strides = [1, 1]} : vector<64x128xf32> to vector<8x128xf32>
    %452 = arith.truncf %449 : vector<8x32xf32> to vector<8x32xbf16>
    %cst_133 = arith.constant dense<0.000000e+00> : vector<8x128xf32>
    %453 = tpu.matmul %452, %327, %cst_133 {dimension_numbers = #tpu.dot_dimension_numbers<[1], [0], [0], [1], [0, 0, 1, 1], [], []>} : vector<8x32xbf16>, vector<32x128xbf16>, vector<8x128xf32> -> vector<8x128xf32>
    %454 = arith.addf %451, %453 : vector<8x128xf32>
    %455 = vector.extract_strided_slice %454 {offsets = [0, 0], sizes = [8, 32], strides = [1, 1]} : vector<8x128xf32> to vector<8x32xf32>
    %456 = arith.negf %455 : vector<8x32xf32>
    %457 = math.exp %456 : vector<8x32xf32>
    %cst_134 = arith.constant 1.000000e+00 : f32
    %458 = vector.broadcast %cst_134 : f32 to vector<8x32xf32>
    %459 = arith.addf %458, %457 : vector<8x32xf32>
    %460 = arith.divf %458, %459 : vector<8x32xf32>
    %461 = vector.extract_strided_slice %454 {offsets = [0, 32], sizes = [8, 32], strides = [1, 1]} : vector<8x128xf32> to vector<8x32xf32>
    %462 = arith.negf %461 : vector<8x32xf32>
    %463 = math.exp %462 : vector<8x32xf32>
    %cst_135 = arith.constant 1.000000e+00 : f32
    %464 = vector.broadcast %cst_135 : f32 to vector<8x32xf32>
    %465 = arith.addf %464, %463 : vector<8x32xf32>
    %466 = arith.divf %464, %465 : vector<8x32xf32>
    %467 = vector.extract_strided_slice %454 {offsets = [0, 64], sizes = [8, 32], strides = [1, 1]} : vector<8x128xf32> to vector<8x32xf32>
    %468 = math.tanh %467 : vector<8x32xf32>
    %469 = vector.extract_strided_slice %454 {offsets = [0, 96], sizes = [8, 32], strides = [1, 1]} : vector<8x128xf32> to vector<8x32xf32>
    %470 = arith.negf %469 : vector<8x32xf32>
    %471 = math.exp %470 : vector<8x32xf32>
    %cst_136 = arith.constant 1.000000e+00 : f32
    %472 = vector.broadcast %cst_136 : f32 to vector<8x32xf32>
    %473 = arith.addf %472, %471 : vector<8x32xf32>
    %474 = arith.divf %472, %473 : vector<8x32xf32>
    %475 = arith.mulf %466, %447 : vector<8x32xf32>
    %476 = arith.mulf %460, %468 : vector<8x32xf32>
    %477 = arith.addf %475, %476 : vector<8x32xf32>
    %478 = math.tanh %477 : vector<8x32xf32>
    %479 = arith.mulf %474, %478 : vector<8x32xf32>
    %c32_137 = arith.constant 32 : index
    %c0_138 = arith.constant 0 : index
    %480 = vector.load %arg5[%c32_137, %c0_138] : memref<64x32xf32, #tpu.memory_space<vmem>>, vector<8x32xf32>
    tpu.vector_store %arg5[%c32_137, %c0_138], %479 {strides = array<i32>} : memref<64x32xf32, #tpu.memory_space<vmem>>, vector<8x32xf32>,
    %481 = vector.extract_strided_slice %332 {offsets = [40, 0], sizes = [8, 128], strides = [1, 1]} : vector<64x128xf32> to vector<8x128xf32>
    %482 = arith.truncf %479 : vector<8x32xf32> to vector<8x32xbf16>
    %cst_139 = arith.constant dense<0.000000e+00> : vector<8x128xf32>
    %483 = tpu.matmul %482, %327, %cst_139 {dimension_numbers = #tpu.dot_dimension_numbers<[1], [0], [0], [1], [0, 0, 1, 1], [], []>} : vector<8x32xbf16>, vector<32x128xbf16>, vector<8x128xf32> -> vector<8x128xf32>
    %484 = arith.addf %481, %483 : vector<8x128xf32>
    %485 = vector.extract_strided_slice %484 {offsets = [0, 0], sizes = [8, 32], strides = [1, 1]} : vector<8x128xf32> to vector<8x32xf32>
    %486 = arith.negf %485 : vector<8x32xf32>
    %487 = math.exp %486 : vector<8x32xf32>
    %cst_140 = arith.constant 1.000000e+00 : f32
    %488 = vector.broadcast %cst_140 : f32 to vector<8x32xf32>
    %489 = arith.addf %488, %487 : vector<8x32xf32>
    %490 = arith.divf %488, %489 : vector<8x32xf32>
    %491 = vector.extract_strided_slice %484 {offsets = [0, 32], sizes = [8, 32], strides = [1, 1]} : vector<8x128xf32> to vector<8x32xf32>
    %492 = arith.negf %491 : vector<8x32xf32>
    %493 = math.exp %492 : vector<8x32xf32>
    %cst_141 = arith.constant 1.000000e+00 : f32
    %494 = vector.broadcast %cst_141 : f32 to vector<8x32xf32>
    %495 = arith.addf %494, %493 : vector<8x32xf32>
    %496 = arith.divf %494, %495 : vector<8x32xf32>
    %497 = vector.extract_strided_slice %484 {offsets = [0, 64], sizes = [8, 32], strides = [1, 1]} : vector<8x128xf32> to vector<8x32xf32>
    %498 = math.tanh %497 : vector<8x32xf32>
    %499 = vector.extract_strided_slice %484 {offsets = [0, 96], sizes = [8, 32], strides = [1, 1]} : vector<8x128xf32> to vector<8x32xf32>
    %500 = arith.negf %499 : vector<8x32xf32>
    %501 = math.exp %500 : vector<8x32xf32>
    %cst_142 = arith.constant 1.000000e+00 : f32
    %502 = vector.broadcast %cst_142 : f32 to vector<8x32xf32>
    %503 = arith.addf %502, %501 : vector<8x32xf32>
    %504 = arith.divf %502, %503 : vector<8x32xf32>
    %505 = arith.mulf %496, %477 : vector<8x32xf32>
    %506 = arith.mulf %490, %498 : vector<8x32xf32>
    %507 = arith.addf %505, %506 : vector<8x32xf32>
    %508 = math.tanh %507 : vector<8x32xf32>
    %509 = arith.mulf %504, %508 : vector<8x32xf32>
    %c40_143 = arith.constant 40 : index
    %c0_144 = arith.constant 0 : index
    %510 = vector.load %arg5[%c40_143, %c0_144] : memref<64x32xf32, #tpu.memory_space<vmem>>, vector<8x32xf32>
    tpu.vector_store %arg5[%c40_143, %c0_144], %509 {strides = array<i32>} : memref<64x32xf32, #tpu.memory_space<vmem>>, vector<8x32xf32>,
    %511 = vector.extract_strided_slice %332 {offsets = [48, 0], sizes = [8, 128], strides = [1, 1]} : vector<64x128xf32> to vector<8x128xf32>
    %512 = arith.truncf %509 : vector<8x32xf32> to vector<8x32xbf16>
    %cst_145 = arith.constant dense<0.000000e+00> : vector<8x128xf32>
    %513 = tpu.matmul %512, %327, %cst_145 {dimension_numbers = #tpu.dot_dimension_numbers<[1], [0], [0], [1], [0, 0, 1, 1], [], []>} : vector<8x32xbf16>, vector<32x128xbf16>, vector<8x128xf32> -> vector<8x128xf32>
    %514 = arith.addf %511, %513 : vector<8x128xf32>
    %515 = vector.extract_strided_slice %514 {offsets = [0, 0], sizes = [8, 32], strides = [1, 1]} : vector<8x128xf32> to vector<8x32xf32>
    %516 = arith.negf %515 : vector<8x32xf32>
    %517 = math.exp %516 : vector<8x32xf32>
    %cst_146 = arith.constant 1.000000e+00 : f32
    %518 = vector.broadcast %cst_146 : f32 to vector<8x32xf32>
    %519 = arith.addf %518, %517 : vector<8x32xf32>
    %520 = arith.divf %518, %519 : vector<8x32xf32>
    %521 = vector.extract_strided_slice %514 {offsets = [0, 32], sizes = [8, 32], strides = [1, 1]} : vector<8x128xf32> to vector<8x32xf32>
    %522 = arith.negf %521 : vector<8x32xf32>
    %523 = math.exp %522 : vector<8x32xf32>
    %cst_147 = arith.constant 1.000000e+00 : f32
    %524 = vector.broadcast %cst_147 : f32 to vector<8x32xf32>
    %525 = arith.addf %524, %523 : vector<8x32xf32>
    %526 = arith.divf %524, %525 : vector<8x32xf32>
    %527 = vector.extract_strided_slice %514 {offsets = [0, 64], sizes = [8, 32], strides = [1, 1]} : vector<8x128xf32> to vector<8x32xf32>
    %528 = math.tanh %527 : vector<8x32xf32>
    %529 = vector.extract_strided_slice %514 {offsets = [0, 96], sizes = [8, 32], strides = [1, 1]} : vector<8x128xf32> to vector<8x32xf32>
    %530 = arith.negf %529 : vector<8x32xf32>
    %531 = math.exp %530 : vector<8x32xf32>
    %cst_148 = arith.constant 1.000000e+00 : f32
    %532 = vector.broadcast %cst_148 : f32 to vector<8x32xf32>
    %533 = arith.addf %532, %531 : vector<8x32xf32>
    %534 = arith.divf %532, %533 : vector<8x32xf32>
    %535 = arith.mulf %526, %507 : vector<8x32xf32>
    %536 = arith.mulf %520, %528 : vector<8x32xf32>
    %537 = arith.addf %535, %536 : vector<8x32xf32>
    %538 = math.tanh %537 : vector<8x32xf32>
    %539 = arith.mulf %534, %538 : vector<8x32xf32>
    %c48_149 = arith.constant 48 : index
    %c0_150 = arith.constant 0 : index
    %540 = vector.load %arg5[%c48_149, %c0_150] : memref<64x32xf32, #tpu.memory_space<vmem>>, vector<8x32xf32>
    tpu.vector_store %arg5[%c48_149, %c0_150], %539 {strides = array<i32>} : memref<64x32xf32, #tpu.memory_space<vmem>>, vector<8x32xf32>,
    %541 = vector.extract_strided_slice %332 {offsets = [56, 0], sizes = [8, 128], strides = [1, 1]} : vector<64x128xf32> to vector<8x128xf32>
    %542 = arith.truncf %539 : vector<8x32xf32> to vector<8x32xbf16>
    %cst_151 = arith.constant dense<0.000000e+00> : vector<8x128xf32>
    %543 = tpu.matmul %542, %327, %cst_151 {dimension_numbers = #tpu.dot_dimension_numbers<[1], [0], [0], [1], [0, 0, 1, 1], [], []>} : vector<8x32xbf16>, vector<32x128xbf16>, vector<8x128xf32> -> vector<8x128xf32>
    %544 = arith.addf %541, %543 : vector<8x128xf32>
    %545 = vector.extract_strided_slice %544 {offsets = [0, 0], sizes = [8, 32], strides = [1, 1]} : vector<8x128xf32> to vector<8x32xf32>
    %546 = arith.negf %545 : vector<8x32xf32>
    %547 = math.exp %546 : vector<8x32xf32>
    %cst_152 = arith.constant 1.000000e+00 : f32
    %548 = vector.broadcast %cst_152 : f32 to vector<8x32xf32>
    %549 = arith.addf %548, %547 : vector<8x32xf32>
    %550 = arith.divf %548, %549 : vector<8x32xf32>
    %551 = vector.extract_strided_slice %544 {offsets = [0, 32], sizes = [8, 32], strides = [1, 1]} : vector<8x128xf32> to vector<8x32xf32>
    %552 = arith.negf %551 : vector<8x32xf32>
    %553 = math.exp %552 : vector<8x32xf32>
    %cst_153 = arith.constant 1.000000e+00 : f32
    %554 = vector.broadcast %cst_153 : f32 to vector<8x32xf32>
    %555 = arith.addf %554, %553 : vector<8x32xf32>
    %556 = arith.divf %554, %555 : vector<8x32xf32>
    %557 = vector.extract_strided_slice %544 {offsets = [0, 64], sizes = [8, 32], strides = [1, 1]} : vector<8x128xf32> to vector<8x32xf32>
    %558 = math.tanh %557 : vector<8x32xf32>
    %559 = vector.extract_strided_slice %544 {offsets = [0, 96], sizes = [8, 32], strides = [1, 1]} : vector<8x128xf32> to vector<8x32xf32>
    %560 = arith.negf %559 : vector<8x32xf32>
    %561 = math.exp %560 : vector<8x32xf32>
    %cst_154 = arith.constant 1.000000e+00 : f32
    %562 = vector.broadcast %cst_154 : f32 to vector<8x32xf32>
    %563 = arith.addf %562, %561 : vector<8x32xf32>
    %564 = arith.divf %562, %563 : vector<8x32xf32>
    %565 = arith.mulf %556, %537 : vector<8x32xf32>
    %566 = arith.mulf %550, %558 : vector<8x32xf32>
    %567 = arith.addf %565, %566 : vector<8x32xf32>
    %568 = math.tanh %567 : vector<8x32xf32>
    %569 = arith.mulf %564, %568 : vector<8x32xf32>
    %c56_155 = arith.constant 56 : index
    %c0_156 = arith.constant 0 : index
    %570 = vector.load %arg5[%c56_155, %c0_156] : memref<64x32xf32, #tpu.memory_space<vmem>>, vector<8x32xf32>
    tpu.vector_store %arg5[%c56_155, %c0_156], %569 {strides = array<i32>} : memref<64x32xf32, #tpu.memory_space<vmem>>, vector<8x32xf32>,
    %c0_157 = arith.constant 0 : index
    %c0_158 = arith.constant 0 : index
    %571 = vector.load %arg5[%c0_157, %c0_158] : memref<64x32xf32, #tpu.memory_space<vmem>>, vector<64x32xf32>
    %c112 = arith.constant 112 : index
    %c0_159 = arith.constant 0 : index
    %572 = vector.load %arg1[%c112, %c0_159] : memref<176x128xf32, #tpu.memory_space<vmem>>, vector<32x128xf32>
    %cst_160 = arith.constant dense<0.000000e+00> : vector<64x128xf32>
    %573 = tpu.matmul %571, %572, %cst_160 {dimension_numbers = #tpu.dot_dimension_numbers<[1], [0], [0], [1], [0, 0, 1, 1], [], []>} : vector<64x32xf32>, vector<32x128xf32>, vector<64x128xf32> -> vector<64x128xf32>
    %574 = vector.extract_strided_slice %0 {offsets = [2, 0], sizes = [1, 128], strides = [1, 1]} : vector<8x128xf32> to vector<1x128xf32>
    %575 = vector.broadcast %574 : vector<1x128xf32> to vector<64x128xf32>
    %576 = arith.addf %573, %575 : vector<64x128xf32>
    %577 = math.tanh %576 : vector<64x128xf32>
    %578 = vector.extract_strided_slice %0 {offsets = [3, 0], sizes = [1, 128], strides = [1, 1]} : vector<8x128xf32> to vector<1x128xf32>
    %579 = vector.broadcast %578 : vector<1x128xf32> to vector<64x128xf32>
    %580 = arith.mulf %577, %579 : vector<64x128xf32>
    %cst_161 = arith.constant dense<0.000000e+00> : vector<64xf32>
    %581 = vector.multi_reduction <add>, %580, %cst_161 [1] : vector<64x128xf32> to vector<64xf32>
    %582 = vector.shape_cast %581 : vector<64xf32> to vector<64x1xf32>
    %583 = vector.extract_strided_slice %582 {offsets = [0, 0], sizes = [8, 1], strides = [1, 1]} : vector<64x1xf32> to vector<8x1xf32>
    %584 = vector.extract_strided_slice %582 {offsets = [8, 0], sizes = [8, 1], strides = [1, 1]} : vector<64x1xf32> to vector<8x1xf32>
    %585 = vector.extract_strided_slice %582 {offsets = [16, 0], sizes = [8, 1], strides = [1, 1]} : vector<64x1xf32> to vector<8x1xf32>
    %586 = vector.extract_strided_slice %582 {offsets = [24, 0], sizes = [8, 1], strides = [1, 1]} : vector<64x1xf32> to vector<8x1xf32>
    %587 = vector.extract_strided_slice %582 {offsets = [32, 0], sizes = [8, 1], strides = [1, 1]} : vector<64x1xf32> to vector<8x1xf32>
    %588 = vector.extract_strided_slice %582 {offsets = [40, 0], sizes = [8, 1], strides = [1, 1]} : vector<64x1xf32> to vector<8x1xf32>
    %589 = vector.extract_strided_slice %582 {offsets = [48, 0], sizes = [8, 1], strides = [1, 1]} : vector<64x1xf32> to vector<8x1xf32>
    %590 = vector.extract_strided_slice %582 {offsets = [56, 0], sizes = [8, 1], strides = [1, 1]} : vector<64x1xf32> to vector<8x1xf32>
    %591 = arith.maximumf %583, %584 : vector<8x1xf32>
    %592 = arith.maximumf %585, %586 : vector<8x1xf32>
    %593 = arith.maximumf %587, %588 : vector<8x1xf32>
    %594 = arith.maximumf %589, %590 : vector<8x1xf32>
    %595 = arith.maximumf %591, %592 : vector<8x1xf32>
    %596 = arith.maximumf %593, %594 : vector<8x1xf32>
    %597 = arith.maximumf %595, %596 : vector<8x1xf32>
    %598 = arith.subf %583, %597 : vector<8x1xf32>
    %599 = math.exp %598 : vector<8x1xf32>
    %600 = arith.subf %584, %597 : vector<8x1xf32>
    %601 = math.exp %600 : vector<8x1xf32>
    %602 = arith.subf %585, %597 : vector<8x1xf32>
    %603 = math.exp %602 : vector<8x1xf32>
    %604 = arith.subf %586, %597 : vector<8x1xf32>
    %605 = math.exp %604 : vector<8x1xf32>
    %606 = arith.subf %587, %597 : vector<8x1xf32>
    %607 = math.exp %606 : vector<8x1xf32>
    %608 = arith.subf %588, %597 : vector<8x1xf32>
    %609 = math.exp %608 : vector<8x1xf32>
    %610 = arith.subf %589, %597 : vector<8x1xf32>
    %611 = math.exp %610 : vector<8x1xf32>
    %612 = arith.subf %590, %597 : vector<8x1xf32>
    %613 = math.exp %612 : vector<8x1xf32>
    %614 = arith.addf %599, %601 : vector<8x1xf32>
    %615 = arith.addf %603, %605 : vector<8x1xf32>
    %616 = arith.addf %607, %609 : vector<8x1xf32>
    %617 = arith.addf %611, %613 : vector<8x1xf32>
    %618 = arith.addf %614, %615 : vector<8x1xf32>
    %619 = arith.addf %616, %617 : vector<8x1xf32>
    %620 = arith.addf %618, %619 : vector<8x1xf32>
    %cst_162 = arith.constant 1.000000e+00 : f32
    %621 = vector.broadcast %cst_162 : f32 to vector<8x1xf32>
    %622 = arith.divf %621, %620 : vector<8x1xf32>
    %623 = arith.mulf %599, %622 : vector<8x1xf32>
    %624 = vector.broadcast %623 : vector<8x1xf32> to vector<8x32xf32>
    %625 = arith.mulf %624, %359 : vector<8x32xf32>
    %626 = arith.mulf %601, %622 : vector<8x1xf32>
    %627 = vector.broadcast %626 : vector<8x1xf32> to vector<8x32xf32>
    %628 = arith.mulf %627, %389 : vector<8x32xf32>
    %629 = arith.mulf %603, %622 : vector<8x1xf32>
    %630 = vector.broadcast %629 : vector<8x1xf32> to vector<8x32xf32>
    %631 = arith.mulf %630, %419 : vector<8x32xf32>
    %632 = arith.mulf %605, %622 : vector<8x1xf32>
    %633 = vector.broadcast %632 : vector<8x1xf32> to vector<8x32xf32>
    %634 = arith.mulf %633, %449 : vector<8x32xf32>
    %635 = arith.mulf %607, %622 : vector<8x1xf32>
    %636 = vector.broadcast %635 : vector<8x1xf32> to vector<8x32xf32>
    %637 = arith.mulf %636, %479 : vector<8x32xf32>
    %638 = arith.mulf %609, %622 : vector<8x1xf32>
    %639 = vector.broadcast %638 : vector<8x1xf32> to vector<8x32xf32>
    %640 = arith.mulf %639, %509 : vector<8x32xf32>
    %641 = arith.mulf %611, %622 : vector<8x1xf32>
    %642 = vector.broadcast %641 : vector<8x1xf32> to vector<8x32xf32>
    %643 = arith.mulf %642, %539 : vector<8x32xf32>
    %644 = arith.mulf %613, %622 : vector<8x1xf32>
    %645 = vector.broadcast %644 : vector<8x1xf32> to vector<8x32xf32>
    %646 = arith.mulf %645, %569 : vector<8x32xf32>
    %647 = arith.addf %625, %628 : vector<8x32xf32>
    %648 = arith.addf %631, %634 : vector<8x32xf32>
    %649 = arith.addf %637, %640 : vector<8x32xf32>
    %650 = arith.addf %643, %646 : vector<8x32xf32>
    %651 = arith.addf %647, %648 : vector<8x32xf32>
    %652 = arith.addf %649, %650 : vector<8x32xf32>
    %653 = arith.addf %651, %652 : vector<8x32xf32>
    %c144 = arith.constant 144 : index
    %c0_163 = arith.constant 0 : index
    %654 = vector.load %arg1[%c144, %c0_163] : memref<176x128xf32, #tpu.memory_space<vmem>>, vector<32x128xf32>
    %cst_164 = arith.constant dense<0.000000e+00> : vector<8x128xf32>
    %655 = tpu.matmul %653, %654, %cst_164 {dimension_numbers = #tpu.dot_dimension_numbers<[1], [0], [0], [1], [0, 0, 1, 1], [], []>} : vector<8x32xf32>, vector<32x128xf32>, vector<8x128xf32> -> vector<8x128xf32>
    %656 = vector.extract_strided_slice %0 {offsets = [4, 0], sizes = [1, 128], strides = [1, 1]} : vector<8x128xf32> to vector<1x128xf32>
    %657 = vector.broadcast %656 : vector<1x128xf32> to vector<8x128xf32>
    %658 = arith.addf %655, %657 : vector<8x128xf32>
    %659 = vector.extract_strided_slice %0 {offsets = [5, 0], sizes = [1, 128], strides = [1, 1]} : vector<8x128xf32> to vector<1x128xf32>
    %660 = vector.broadcast %659 : vector<1x128xf32> to vector<8x128xf32>
    %661 = arith.mulf %658, %660 : vector<8x128xf32>
    %662 = vector.extract_strided_slice %0 {offsets = [6, 0], sizes = [1, 128], strides = [1, 1]} : vector<8x128xf32> to vector<1x128xf32>
    %663 = vector.broadcast %662 : vector<1x128xf32> to vector<8x128xf32>
    %664 = arith.addf %661, %663 : vector<8x128xf32>
    %cst_165 = arith.constant 0.000000e+00 : f32
    %665 = vector.broadcast %cst_165 : f32 to vector<8x128xf32>
    %666 = arith.maximumf %664, %665 : vector<8x128xf32>
    %667 = vector.extract_strided_slice %0 {offsets = [7, 0], sizes = [1, 128], strides = [1, 1]} : vector<8x128xf32> to vector<1x128xf32>
    %668 = vector.broadcast %667 : vector<1x128xf32> to vector<8x128xf32>
    %669 = arith.mulf %666, %668 : vector<8x128xf32>
    %cst_166 = arith.constant dense<0.000000e+00> : vector<8xf32>
    %670 = vector.multi_reduction <add>, %669, %cst_166 [1] : vector<8x128xf32> to vector<8xf32>
    %671 = vector.shape_cast %670 : vector<8xf32> to vector<8x1xf32>
    %672 = arith.negf %671 : vector<8x1xf32>
    %673 = math.exp %672 : vector<8x1xf32>
    %cst_167 = arith.constant 1.000000e+00 : f32
    %674 = vector.broadcast %cst_167 : f32 to vector<8x1xf32>
    %675 = arith.addf %674, %673 : vector<8x1xf32>
    %676 = arith.divf %674, %675 : vector<8x1xf32>
    %677 = vector.extract_strided_slice %676 {offsets = [0, 0], sizes = [4, 1], strides = [1, 1]} : vector<8x1xf32> to vector<4x1xf32>
    %c0_168 = arith.constant 0 : index
    %c0_169 = arith.constant 0 : index
    %678 = vector.load %arg3[%c0_168, %c0_169] : memref<4x1xf32, #tpu.memory_space<vmem>>, vector<4x1xf32>
    tpu.vector_store %arg3[%c0_168, %c0_169], %677 {strides = array<i32>} : memref<4x1xf32, #tpu.memory_space<vmem>>, vector<4x1xf32>,
    return
  }
}

</mosaic_0001>

<bundles_post_ra>
// kernel: tpu_custom_call.1
= control target key start
LH: loop header
LB: loop body
LE: loop exit
PB: predicated region body
PF: predicated region fallthrough
CT: control target
= control target key end

     0   :  { %8 = vsyncpa [#allocation5], 0  ;;  %s2162_s0 = inlined_call_operand.hbm [shape: f32[4,8,16], index: 0, kind: input, shape index: {}]   ;;  %s2163_s1 = inlined_call_operand.hbm [shape: f32[176,128], index: 1, kind: input, shape index: {}]   ;;  %s2164_s2 = inlined_call_operand.hbm [shape: f32[8,128], index: 2, kind: input, shape index: {}]   ;;  %s2165_s3 = inlined_call_operand.vmem [shape: f32[4,1], index: 3, kind: output, shape index: {}]  }
   0x1   :  { %9 = vsyncpa [#allocation7], 0  ;;  %s27_s14 = sshll.u32 %s2163_s1, 4  ;;  %s1769_s15 = smov [#allocation6]   ;;  %s28_s14 = int_to_ptr.hbm [resolvable:$true] %s27_s14 }
   0x2   :  { %s29_s16 = sshll.u32 %s1769_s15, 4  ;;  %s14_s19 = sshll.u32 %s2162_s0, 4  ;;  %s30_s16 = int_to_ptr.vmem [resolvable:$true] %s29_s16  ;;  %s15_s19 = int_to_ptr.hbm [resolvable:$true] %s14_s19 }
   0x3   :  { %s1770_s20 = smov 128   ;;  %s1771_s21 = smov 8  }
   0x4   :  { %35 = dma.hbm_to_vmem [thread:$0]  %s28_s14, 2816, %s30_s16, [#allocation7], %s1770_s20, %s1770_s20, %s1771_s21  }
   0x5   :  { %s1772_s22 = smov [#allocation4]   ;;  %s41_s26 = sshll.u32 %s2164_s2, 4  ;;  %s42_s26 = int_to_ptr.hbm [resolvable:$true] %s41_s26 }
   0x6   :  { %s16_s23 = sshll.u32 %s1772_s22, 4  ;;  %s1773_s1 = smov [#allocation8]   ;;  %s17_s23 = int_to_ptr.vmem [resolvable:$true] %s16_s23 }
   0x7   :  { %22 = dma.hbm_to_vmem [thread:$0]  %s15_s19, 512, %s17_s23, [#allocation5], %s1770_s20, %s1770_s20, %s1771_s21  }
   0x8   :  { %s43_s27 = sshll.u32 %s1773_s1, 4  ;;  %s44_s27 = int_to_ptr.vmem [resolvable:$true] %s43_s27 }
   0x9   :  { %46 = dma.hbm_to_vmem [thread:$0]  %s42_s26, 128, %s44_s27, [#allocation7]  }
   0xa   :  { %1765 = dma.done.wait [#allocation5], 512  }
   0xb   :  { %1766 = vsyncadd [#allocation5], 4294966784 }
   0xc   :  { %1767 = dma.done.wait [#allocation7], 2944  }
   0xd   :  { %1768 = vsyncadd [#allocation7], 4294964352  ;;  %vm61_vm0 = vcmask 130048   ;;  %v1774_v0 = vmov 0.0   ;;  %vm71_vm1 = vcmask 122880   ;;  %vm73_vm2 = vcmask 123905  }
   0xe   :  { %62 = vst.msk [vmem:[#allocation2] sm:$0xff] %vm61_vm0, %v1774_v0  ;;  %v125_v1 = vld [vmem:[#allocation6] sm:$0xff]  ;;  %v126_v2 = vld [vmem:[#allocation6 + $0x8] sm:$0xff]  ;;  %v1821_v6 = vld [vmem:[#allocation4 + $0x10] sm:$0xff]  ;;  %s1775_s0 = smov 64   ;;  %s1776_s2 = smov 32  }
   0xf   :  { %63 = vst.msk [vmem:[#allocation2 + $0x8] sm:$0xff] %vm61_vm0, %v1774_v0  ;;  %v1812_v3 = vld [vmem:[#allocation4] sm:$0xff]  ;;  %v127_v4 = vpack.c.bf16 %v126_v2, %v125_v1  ;;  %v1817_v5 = vld [vmem:[#allocation4 + $0x8] sm:$0xff]  ;;  %v1827_v7 = vld [vmem:[#allocation4 + $0x18] sm:$0xff]  ;;  %vm221_vm7 = vcmask 261120   ;;  %vm75_vm12 = vcmask 124930  }
  0x10   :  { %64 = vst.msk [vmem:[#allocation2 + $0x10] sm:$0xff] %vm61_vm0, %v1774_v0  ;;  %v1839_v11 = vld [vmem:[#allocation8] sm:$0xff]  ;;  %v130_v35 = vld [vmem:[#allocation6 + $0x20] sm:$0xff]  ;;  %v131_v36 = vld [vmem:[#allocation6 + $0x28] sm:$0xff]  ;;  %vm77_vm13 = vcmask 125955  }
  0x11   :  { %65 = vst.msk [vmem:[#allocation2 + $0x18] sm:$0xff] %vm61_vm0, %v1774_v0  ;;  %158 = vmatpush.bf16.msra.mxu0 %v127_v4  ;;  %v1842_v12 = vperm.slane %v1839_v11, 0  ;;  %v128_v37 = vld [vmem:[#allocation6 + $0x10] sm:$0xff]  ;;  %v133_v38 = vpack.c.bf16 %v131_v36, %v130_v35  ;;  %v129_v39 = vld [vmem:[#allocation6 + $0x18] sm:$0xff] }
  0x12   :  { %66 = vst.msk [vmem:[#allocation2 + $0x20] sm:$0xff] %vm61_vm0, %v1774_v0  ;;  %v132_v40 = vpack.c.bf16 %v129_v39, %v128_v37 }
  0x13   :  { %67 = vst.msk [vmem:[#allocation2 + $0x28] sm:$0xff] %vm61_vm0, %v1774_v0  ;;  %236 = vmatpush.bf16.msra.mxu1 %v133_v38  ;;  %299 = vmatpush.bf16.msra.mxu2 %v133_v38 }
  0x14   :  { %68 = vst.msk [vmem:[#allocation2 + $0x30] sm:$0xff] %vm61_vm0, %v1774_v0  ;;  %551 = vmatpush.bf16.msra.mxu3 %v133_v38 }
  0x15   :  { %72 = vst.msk [vmem:[#allocation2] sm:$0x1] %vm71_vm1, %v1812_v3  ;;  %362 = vmatpush.bf16.msrb.mxu0 %v133_v38 }
  0x16   :  { %74 = vst.msk [vmem:[#allocation2 + $0x7] sm:$0x2] %vm73_vm2, %v1812_v3 }
  0x17   :  { %89 = vst.msk [vmem:[#allocation2 + $0x1] sm:$0x1] %vm71_vm1, %v1817_v5  ;;  %237 = vmatpush.bf16.msra.mxu1 %v132_v40  ;;  %300 = vmatpush.bf16.msra.mxu2 %v132_v40 }
  0x18   :  { %90 = vst.msk [vmem:[#allocation2 + $0x8] sm:$0x2] %vm73_vm2, %v1817_v5  ;;  %552 = vmatpush.bf16.msra.mxu3 %v132_v40 }
  0x19   :  { %99 = vst.msk [vmem:[#allocation2 + $0x2] sm:$0x1] %vm71_vm1, %v1821_v6  ;;  %363 = vmatpush.bf16.msrb.mxu0 %v132_v40 }
  0x1a   :  { %100 = vst.msk [vmem:[#allocation2 + $0x9] sm:$0x2] %vm73_vm2, %v1821_v6 }
  0x1b   :  { %109 = vst.msk [vmem:[#allocation2 + $0x3] sm:$0x1] %vm71_vm1, %v1827_v7  ;;  %425 = vmatpush.bf16.msrb.mxu1 %v133_v38  ;;  %488 = vmatpush.bf16.msrb.mxu2 %v133_v38 }
  0x1c   :  { %110 = vst.msk [vmem:[#allocation2 + $0xa] sm:$0x2] %vm73_vm2, %v1827_v7 }
  0x1d   :  { %69 = vst.msk [vmem:[#allocation2 + $0x38] sm:$0xff] %vm61_vm0, %v1774_v0 }
  0x1e   :  { %76 = vst.msk [vmem:[#allocation2 + $0xe] sm:$0x4] %vm75_vm12, %v1812_v3 }
  0x1f   :  { %426 = vmatpush.bf16.msrb.mxu1 %v132_v40  ;;  %489 = vmatpush.bf16.msrb.mxu2 %v132_v40  ;;  %78 = vst.msk [vmem:[#allocation2 + $0x15] sm:$0x8] %vm77_vm13, %v1812_v3 }
  0x20   :  { %91 = vst.msk [vmem:[#allocation2 + $0xf] sm:$0x4] %vm75_vm12, %v1817_v5 }
  0x21   :  { %92 = vst.msk [vmem:[#allocation2 + $0x16] sm:$0x8] %vm77_vm13, %v1817_v5 }
  0x22   :  { %v117_v8 = vld [vmem:[#allocation2] sm:$0xff]  ;;  %101 = vst.msk [vmem:[#allocation2 + $0x10] sm:$0x4] %vm75_vm12, %v1821_v6 }
  0x23   :  { %v118_v9 = vld [vmem:[#allocation2 + $0x8] sm:$0xff]  ;;  %102 = vst.msk [vmem:[#allocation2 + $0x17] sm:$0x8] %vm77_vm13, %v1821_v6 }
  0x24   :  { %v134_v10 = vpack.c.bf16 %v118_v9, %v117_v8  ;;  %111 = vst.msk [vmem:[#allocation2 + $0x11] sm:$0x4] %vm75_vm12, %v1827_v7 }
  0x25   :  { %112 = vst.msk [vmem:[#allocation2 + $0x18] sm:$0x8] %vm77_vm13, %v1827_v7 }
  0x26   :  { %1466 = vmatmul.msk.bf16.vlgmr.msra.gmra.mxu0 %vm61_vm0, %v134_v10 }
  0x2b   :  { %v119_v10 = vld [vmem:[#allocation2 + $0x10] sm:$0xff] }
  0xa3   :  { %v160_v13 = vpop.f32.mrf.mxu0 }
  0xa4   :  { %v161_v14 = vadd.f32 %v160_v13, %v1842_v12  ;;  %v120_v13 = vld [vmem:[#allocation2 + $0x18] sm:$0xff] }
  0xa6   :  { %1526 = vtanh.f32 %v161_v14  ;;  %v1470_v16 = vmul.f32 -1.442695, %v161_v14  ;;  %v135_v14 = vpack.c.bf16 %v120_v13, %v119_v10 }
  0xa8   :  { %1528 = vpow2.f32 %v1470_v16  ;;  %1467 = vmatmul.msk.bf16.gmra.mxu0 %vm61_vm0, %v135_v14 }
  0xab   :  { %v162_v45 = vpop.f32.mrf.mxu0 }
  0xac   :  { %v1527_v15 = vpop.eup %1526  ;;  %v163_v46 = vadd.f32 %v162_v45, %v1842_v12 }
  0xad   :  { %202 = vrot.lane.b32.xlu0 %v1527_v15, %s1775_s0 }
  0xae   :  { %v1529_v17 = vpop.eup %1528 }
  0xaf   :  { %v183_v18 = vadd.f32 1.0, %v1529_v17 }
  0xb1   :  { %1530 = vrcp.f32 %v183_v18  ;;  %v195_v24 = vand.u32 2147483648, %v183_v18  ;;  %vm189_vm4 = vweird.f32 %v183_v18  ;;  %v193_v25 = vand.u32 2147483647, %v183_v18 }
  0xb3   :  { %v196_v27 = vor.u32 1.1754944e-38, %v195_v24  ;;  %vm194_vm6 = vcmp.eq.f32.partialorder %v193_v25, 8.507059e+37 }
  0xb7   :  { %v1531_v19 = vpop.eup %1530 }
  0xb8   :  { %v185_v20 = vmul.f32 %v1531_v19, %v183_v18  ;;  %vm190_vm3 = vweird.f32 %v1531_v19 }
  0xb9   :  { %vm191_vm5 = vmor %vm189_vm4, %vm190_vm3  ;;  %vm79_vm3 = vcmask 126980   ;;  %vm81_vm4 = vcmask 128005  }
  0xba   :  { %v186_v21 = vsub.f32 1.0, %v185_v20  ;;  %80 = vst.msk [vmem:[#allocation2 + $0x1c] sm:$0x10] %vm79_vm3, %v1812_v3 }
  0xbb   :  { %82 = vst.msk [vmem:[#allocation2 + $0x23] sm:$0x20] %vm81_vm4, %v1812_v3 }
  0xbc   :  { %v187_v22 = vmul.f32 %v1531_v19, %v186_v21  ;;  %93 = vst.msk [vmem:[#allocation2 + $0x1d] sm:$0x10] %vm79_vm3, %v1817_v5 }
  0xbd   :  { %94 = vst.msk [vmem:[#allocation2 + $0x24] sm:$0x20] %vm81_vm4, %v1817_v5 }
  0xbe   :  { %v188_v23 = vadd.f32 %v1531_v19, %v187_v22  ;;  %103 = vst.msk [vmem:[#allocation2 + $0x1e] sm:$0x10] %vm79_vm3, %v1821_v6 }
  0xbf   :  { %104 = vst.msk [vmem:[#allocation2 + $0x25] sm:$0x20] %vm81_vm4, %v1821_v6 }
  0xc0   :  { %v192_v26 = vsel %vm191_vm5, %v1531_v19, %v188_v23  ;;  %vm83_vm5 = vcmask 129030   ;;  %113 = vst.msk [vmem:[#allocation2 + $0x1f] sm:$0x10] %vm79_vm3, %v1827_v7 }
  0xc1   :  { %v197_v29 = vsel %vm194_vm6, %v196_v27, %v192_v26  ;;  %vm85_vm6 = vcmask 130055   ;;  %114 = vst.msk [vmem:[#allocation2 + $0x26] sm:$0x20] %vm81_vm4, %v1827_v7 }
  0xc2   :  { %v200_v31 = vmul.f32 0.0, %v197_v29  ;;  %84 = vst.msk [vmem:[#allocation2 + $0x2a] sm:$0x40] %vm83_vm5, %v1812_v3 }
  0xc3   :  { %86 = vst.msk [vmem:[#allocation2 + $0x31] sm:$0x80] %vm85_vm6, %v1812_v3 }
  0xc4   :  { %95 = vst.msk [vmem:[#allocation2 + $0x2b] sm:$0x40] %vm83_vm5, %v1817_v5 }
  0xc5   :  { %96 = vst.msk [vmem:[#allocation2 + $0x32] sm:$0x80] %vm85_vm6, %v1817_v5 }
  0xc6   :  { %105 = vst.msk [vmem:[#allocation2 + $0x2c] sm:$0x40] %vm83_vm5, %v1821_v6 }
  0xc7   :  { %v121_v45 = vld [vmem:[#allocation2 + $0x20] sm:$0xff]  ;;  %106 = vst.msk [vmem:[#allocation2 + $0x33] sm:$0x80] %vm85_vm6, %v1821_v6 }
  0xc8   :  { %115 = vst.msk [vmem:[#allocation2 + $0x2d] sm:$0x40] %vm83_vm5, %v1827_v7 }
  0xc9   :  { %116 = vst.msk [vmem:[#allocation2 + $0x34] sm:$0x80] %vm85_vm6, %v1827_v7 }
  0xd0   :  { %v124_v3 = vld [vmem:[#allocation2 + $0x38] sm:$0xff] }
 0x11f   :  { %v203_v28 = vpop.permute.xlu0 %202 }
 0x120   :  { %v205_v30 = vmul.f32 %v203_v28, %v197_v29 }
 0x122   :  { %207 = vrot.lane.b32.xlu0 %v205_v30, %s1776_s2 }
 0x125   :  { %v165_v19 = vpop.f32.mrf.mxu0 }
 0x126   :  { %v166_v20 = vadd.f32 %v165_v19, %v1842_v12 }
 0x194   :  { %v208_v32 = vpop.permute.xlu0 %207 }
 0x195   :  { %v210_v33 = vadd.f32 %v208_v32, %v200_v31 }
 0x197   :  { %1532 = vtanh.f32 %v210_v33 }
 0x19d   :  { %v1533_v34 = vpop.eup %1532 }
 0x19e   :  { %213 = vrot.lane.b32.xlu1 %v1533_v34, %s1775_s0 }
 0x210   :  { %v214_v41 = vpop.permute.xlu1 %213 }
 0x211   :  { %v1848_v42 = vmul.f32 %v214_v41, %v197_v29 }
 0x213   :  { %v223_v43 = vpack.c.bf16 %v1848_v42, %v1848_v42 }
 0x215   :  { %225 = vrot.lane.b32.xlu1 %v223_v43, %s1776_s2 }
 0x287   :  { %v226_v44 = vpop.permute.xlu1 %225 }
 0x288   :  { %1471 = vmatmul.msk.bf16.vlgmr.msra.gmra.mxu1 %vm221_vm7, %v226_v44 }
 0x289   :  { %614 = vmatpush.bf16.msra.mxu1 %v133_v38 }
 0x28d   :  { %615 = vmatpush.bf16.msra.mxu1 %v132_v40 }
 0x305   :  { %v239_v47 = vpop.f32.mrf.mxu1 }
 0x306   :  { %v243_v48 = vadd.f32 %v239_v47, %v163_v46  ;;  %v122_v46 = vld [vmem:[#allocation2 + $0x28] sm:$0xff] }
 0x307   :  { %v136_v47 = vpack.c.bf16 %v122_v46, %v121_v45 }
 0x308   :  { %1534 = vtanh.f32 %v243_v48  ;;  %v1472_v51 = vmul.f32 -1.442695, %v243_v48 }
 0x309   :  { %1468 = vmatmul.msk.bf16.gmra.mxu0 %vm61_vm0, %v136_v47 }
 0x30a   :  { %1536 = vpow2.f32 %v1472_v51 }
 0x30d   :  { %v241_v49 = vpop.f32.mrf.mxu1 }
 0x30e   :  { %v1535_v50 = vpop.eup %1534  ;;  %v123_v49 = vld [vmem:[#allocation2 + $0x30] sm:$0xff] }
 0x30f   :  { %266 = vrot.lane.b32.xlu2 %v1535_v50, %s1775_s0  ;;  %v137_v51 = vpack.c.bf16 %v124_v3, %v123_v49 }
 0x310   :  { %v1537_v52 = vpop.eup %1536 }
 0x311   :  { %v247_v53 = vadd.f32 1.0, %v1537_v52  ;;  %v167_v52 = vpop.f32.mrf.mxu0 }
 0x313   :  { %1538 = vrcp.f32 %v247_v53  ;;  %v259_v59 = vand.u32 2147483648, %v247_v53  ;;  %vm253_vm9 = vweird.f32 %v247_v53  ;;  %v257_v60 = vand.u32 2147483647, %v247_v53 }
 0x315   :  { %v260_v62 = vor.u32 1.1754944e-38, %v259_v59  ;;  %vm258_vm11 = vcmp.eq.f32.partialorder %v257_v60, 8.507059e+37 }
 0x319   :  { %v1539_v54 = vpop.eup %1538  ;;  %1469 = vmatmul.msk.bf16.gmra.mxu0 %vm61_vm0, %v137_v51 }
 0x31a   :  { %v249_v55 = vmul.f32 %v1539_v54, %v247_v53  ;;  %vm254_vm8 = vweird.f32 %v1539_v54 }
 0x31b   :  { %vm255_vm10 = vmor %vm253_vm9, %vm254_vm8 }
 0x31c   :  { %v250_v56 = vsub.f32 1.0, %v249_v55 }
 0x31e   :  { %v251_v57 = vmul.f32 %v1539_v54, %v250_v56  ;;  %v168_v56 = vadd.f32 %v167_v52, %v1842_v12 }
 0x320   :  { %v252_v58 = vadd.f32 %v1539_v54, %v251_v57 }
 0x322   :  { %v256_v61 = vsel %vm255_vm10, %v1539_v54, %v252_v58 }
 0x323   :  { %v261_v0 = vsel %vm258_vm11, %v260_v62, %v256_v61 }
 0x324   :  { %v264_v2 = vmul.f32 %v261_v0, %v210_v33 }
 0x369   :  { %v267_v63 = vpop.permute.xlu2 %266 }
 0x36a   :  { %v269_v1 = vmul.f32 %v267_v63, %v261_v0 }
 0x36c   :  { %271 = vrot.lane.b32.xlu2 %v269_v1, %s1776_s2 }
 0x386   :  { %v170_v7 = vpop.f32.mrf.mxu0 }
 0x38e   :  { %v1904_v53 = vpop.f32.mrf.mxu0 }
 0x396   :  { %v1906_v54 = vpop.f32.mrf.mxu0 }
 0x39e   :  { %v1908_v55 = vpop.f32.mrf.mxu0 }
 0x3c6   :  { %v272_v4 = vpop.permute.xlu2 %271 }
 0x3c7   :  { %v274_v8 = vadd.f32 %v272_v4, %v264_v2 }
 0x3c9   :  { %1540 = vtanh.f32 %v274_v8 }
 0x3cf   :  { %v1541_v9 = vpop.eup %1540 }
 0x3d0   :  { %277 = vrot.lane.b32.xlu0 %v1541_v9, %s1775_s0 }
 0x442   :  { %v278_v15 = vpop.permute.xlu0 %277 }
 0x443   :  { %v1867_v16 = vmul.f32 %v278_v15, %v261_v0 }
 0x445   :  { %v286_v17 = vpack.c.bf16 %v1867_v16, %v1867_v16 }
 0x447   :  { %288 = vrot.lane.b32.xlu1 %v286_v17, %s1776_s2 }
 0x4b9   :  { %v289_v18 = vpop.permute.xlu1 %288 }
 0x4ba   :  { %1473 = vmatmul.msk.bf16.vlgmr.msra.gmra.mxu2 %vm221_vm7, %v289_v18 }
 0x53d   :  { %v302_v21 = vpop.f32.mrf.mxu2 }
 0x53e   :  { %v306_v22 = vadd.f32 %v302_v21, %v166_v20 }
 0x540   :  { %1542 = vtanh.f32 %v306_v22  ;;  %v1474_v25 = vmul.f32 -1.442695, %v306_v22 }
 0x542   :  { %1544 = vpow2.f32 %v1474_v25 }
 0x545   :  { %v304_v23 = vpop.f32.mrf.mxu2 }
 0x546   :  { %v1543_v24 = vpop.eup %1542 }
 0x547   :  { %329 = vrot.lane.b32.xlu2 %v1543_v24, %s1775_s0 }
 0x548   :  { %v1545_v26 = vpop.eup %1544 }
 0x549   :  { %v310_v27 = vadd.f32 1.0, %v1545_v26 }
 0x54b   :  { %1546 = vrcp.f32 %v310_v27  ;;  %v322_v33 = vand.u32 2147483648, %v310_v27  ;;  %vm316_vm15 = vweird.f32 %v310_v27  ;;  %v320_v34 = vand.u32 2147483647, %v310_v27 }
 0x54d   :  { %v323_v36 = vor.u32 1.1754944e-38, %v322_v33  ;;  %vm321_vm2 = vcmp.eq.f32.partialorder %v320_v34, 8.507059e+37 }
 0x551   :  { %v1547_v28 = vpop.eup %1546 }
 0x552   :  { %v312_v29 = vmul.f32 %v1547_v28, %v310_v27  ;;  %vm317_vm14 = vweird.f32 %v1547_v28  ;;  %v171_v27 = vadd.f32 %v170_v7, %v1842_v12 }
 0x553   :  { %vm318_vm1 = vmor %vm316_vm15, %vm317_vm14 }
 0x554   :  { %v313_v30 = vsub.f32 1.0, %v312_v29 }
 0x556   :  { %v314_v31 = vmul.f32 %v1547_v28, %v313_v30 }
 0x558   :  { %v315_v32 = vadd.f32 %v1547_v28, %v314_v31 }
 0x55a   :  { %v319_v35 = vsel %vm318_vm1, %v1547_v28, %v315_v32 }
 0x55b   :  { %v324_v38 = vsel %vm321_vm2, %v323_v36, %v319_v35 }
 0x55c   :  { %v327_v40 = vmul.f32 %v324_v38, %v274_v8 }
 0x5a1   :  { %v330_v37 = vpop.permute.xlu2 %329 }
 0x5a2   :  { %v332_v39 = vmul.f32 %v330_v37, %v324_v38 }
 0x5a4   :  { %334 = vrot.lane.b32.xlu0 %v332_v39, %s1776_s2 }
 0x616   :  { %v335_v41 = vpop.permute.xlu0 %334 }
 0x617   :  { %v1876_v43 = vadd.f32 %v335_v41, %v327_v40 }
 0x619   :  { %1548 = vtanh.f32 %v1876_v43 }
 0x61f   :  { %v1549_v44 = vpop.eup %1548 }
 0x620   :  { %340 = vrot.lane.b32.xlu1 %v1549_v44, %s1775_s0 }
 0x692   :  { %v341_v48 = vpop.permute.xlu1 %340 }
 0x693   :  { %v1897_v50 = vmul.f32 %v341_v48, %v324_v38 }
 0x695   :  { %v349_v5 = vpack.c.bf16 %v1897_v50, %v1897_v50 }
 0x697   :  { %351 = vrot.lane.b32.xlu2 %v349_v5, %s1776_s2 }
 0x6f1   :  { %v352_v6 = vpop.permute.xlu2 %351 }
 0x6f2   :  { %1475 = vmatmul.msk.bf16.vlgmr.msrb.gmra.mxu0 %vm221_vm7, %v352_v6 }
 0x76f   :  { %v365_v57 = vpop.f32.mrf.mxu0 }
 0x770   :  { %v369_v58 = vadd.f32 %v365_v57, %v168_v56  ;;  %v674_v56 = vld [vmem:[#allocation6 + $0x40] sm:$0xff]  ;;  %v675_v57 = vld [vmem:[#allocation6 + $0x48] sm:$0xff] }
 0x772   :  { %1550 = vtanh.f32 %v369_v58  ;;  %v1476_v61 = vmul.f32 -1.442695, %v369_v58  ;;  %v672_v58 = vld [vmem:[#allocation6 + $0x30] sm:$0xff] }
 0x774   :  { %1552 = vpow2.f32 %v1476_v61 }
 0x777   :  { %v367_v59 = vpop.f32.mrf.mxu0 }
 0x778   :  { %v1551_v60 = vpop.eup %1550  ;;  %v677_v59 = vpack.c.bf16 %v675_v57, %v674_v56 }
 0x779   :  { %392 = vrot.lane.b32.xlu0 %v1551_v60, %s1775_s0  ;;  %v673_v60 = vld [vmem:[#allocation6 + $0x38] sm:$0xff] }
 0x77a   :  { %v1553_v62 = vpop.eup %1552  ;;  %707 = vmatpush.bf16.msra.mxu2 %v677_v59  ;;  %v676_v61 = vpack.c.bf16 %v673_v60, %v672_v58 }
 0x77b   :  { %v373_v63 = vadd.f32 1.0, %v1553_v62 }
 0x77d   :  { %1554 = vrcp.f32 %v373_v63  ;;  %v385_v9 = vand.u32 2147483648, %v373_v63  ;;  %vm379_vm8 = vweird.f32 %v373_v63  ;;  %v383_v10 = vand.u32 2147483647, %v373_v63 }
 0x77e   :  { %708 = vmatpush.bf16.msra.mxu2 %v676_v61  ;;  %v680_v61 = vld [vmem:[#allocation6 + $0x60] sm:$0xff] }
 0x77f   :  { %v386_v14 = vor.u32 1.1754944e-38, %v385_v9  ;;  %vm384_vm10 = vcmp.eq.f32.partialorder %v383_v10, 8.507059e+37  ;;  %v1945_v10 = vperm.slane %v1839_v11, 1 }
 0x783   :  { %v1555_v0 = vpop.eup %1554 }
 0x784   :  { %v375_v1 = vmul.f32 %v1555_v0, %v373_v63  ;;  %vm380_vm0 = vweird.f32 %v1555_v0 }
 0x785   :  { %vm381_vm9 = vmor %vm379_vm8, %vm380_vm0 }
 0x786   :  { %v376_v2 = vsub.f32 1.0, %v375_v1  ;;  %v173_v1 = vadd.f32 %v1904_v53, %v1842_v12 }
 0x788   :  { %v377_v4 = vmul.f32 %v1555_v0, %v376_v2 }
 0x78a   :  { %v378_v8 = vadd.f32 %v1555_v0, %v377_v4 }
 0x78c   :  { %v382_v13 = vsel %vm381_vm9, %v1555_v0, %v378_v8 }
 0x78d   :  { %v387_v17 = vsel %vm384_vm10, %v386_v14, %v382_v13 }
 0x78e   :  { %v390_v19 = vmul.f32 %v387_v17, %v1876_v43 }
 0x7eb   :  { %v393_v15 = vpop.permute.xlu0 %392 }
 0x7ec   :  { %v395_v18 = vmul.f32 %v393_v15, %v387_v17 }
 0x7ee   :  { %397 = vrot.lane.b32.xlu1 %v395_v18, %s1776_s2 }
 0x860   :  { %v398_v20 = vpop.permute.xlu1 %397 }
 0x861   :  { %v400_v21 = vadd.f32 %v398_v20, %v390_v19 }
 0x863   :  { %1556 = vtanh.f32 %v400_v21 }
 0x869   :  { %v1557_v22 = vpop.eup %1556 }
 0x86a   :  { %403 = vrot.lane.b32.xlu2 %v1557_v22, %s1775_s0 }
 0x8c4   :  { %v404_v23 = vpop.permute.xlu2 %403 }
 0x8c5   :  { %v1915_v24 = vmul.f32 %v404_v23, %v387_v17 }
 0x8c7   :  { %v412_v25 = vpack.c.bf16 %v1915_v24, %v1915_v24 }
 0x8c9   :  { %414 = vrot.lane.b32.xlu0 %v412_v25, %s1776_s2 }
 0x93b   :  { %v415_v26 = vpop.permute.xlu0 %414 }
 0x93c   :  { %1477 = vmatmul.msk.bf16.vlgmr.msrb.gmra.mxu1 %vm221_vm7, %v415_v26 }
 0x9b9   :  { %v428_v28 = vpop.f32.mrf.mxu1 }
 0x9ba   :  { %v432_v29 = vadd.f32 %v428_v28, %v171_v27 }
 0x9bc   :  { %1558 = vtanh.f32 %v432_v29  ;;  %v1478_v32 = vmul.f32 -1.442695, %v432_v29 }
 0x9be   :  { %1560 = vpow2.f32 %v1478_v32 }
 0x9c1   :  { %v430_v30 = vpop.f32.mrf.mxu1 }
 0x9c2   :  { %v1559_v31 = vpop.eup %1558 }
 0x9c3   :  { %455 = vrot.lane.b32.xlu1 %v1559_v31, %s1775_s0 }
 0x9c4   :  { %v1561_v33 = vpop.eup %1560 }
 0x9c5   :  { %v436_v34 = vadd.f32 1.0, %v1561_v33 }
 0x9c7   :  { %1562 = vrcp.f32 %v436_v34  ;;  %v448_v40 = vand.u32 2147483648, %v436_v34  ;;  %vm442_vm12 = vweird.f32 %v436_v34  ;;  %v446_v41 = vand.u32 2147483647, %v436_v34 }
 0x9c9   :  { %v449_v44 = vor.u32 1.1754944e-38, %v448_v40  ;;  %vm447_vm14 = vcmp.eq.f32.partialorder %v446_v41, 8.507059e+37 }
 0x9cd   :  { %v1563_v35 = vpop.eup %1562 }
 0x9ce   :  { %v438_v36 = vmul.f32 %v1563_v35, %v436_v34  ;;  %vm443_vm11 = vweird.f32 %v1563_v35 }
 0x9cf   :  { %vm444_vm13 = vmor %vm442_vm12, %vm443_vm11 }
 0x9d0   :  { %v439_v37 = vsub.f32 1.0, %v438_v36 }
 0x9d2   :  { %v440_v38 = vmul.f32 %v1563_v35, %v439_v37 }
 0x9d4   :  { %v441_v39 = vadd.f32 %v1563_v35, %v440_v38 }
 0x9d6   :  { %v445_v43 = vsel %vm444_vm13, %v1563_v35, %v441_v39 }
 0x9d7   :  { %v450_v46 = vsel %vm447_vm14, %v449_v44, %v445_v43 }
 0x9d8   :  { %v453_v48 = vmul.f32 %v450_v46, %v400_v21 }
 0xa35   :  { %v456_v45 = vpop.permute.xlu1 %455 }
 0xa36   :  { %v458_v47 = vmul.f32 %v456_v45, %v450_v46 }
 0xa38   :  { %460 = vrot.lane.b32.xlu2 %v458_v47, %s1776_s2 }
 0xa40   :  { %218 = vrot.lane.b32.xlu2 %v1848_v42, %s1776_s2 }
 0xa92   :  { %v461_v49 = vpop.permute.xlu2 %460 }
 0xa93   :  { %v1926_v3 = vadd.f32 %v461_v49, %v453_v48 }
 0xa95   :  { %1564 = vtanh.f32 %v1926_v3 }
 0xa9a   :  { %v219_v5 = vpop.permute.xlu2 %218 }
 0xa9b   :  { %v1565_v51 = vpop.eup %1564  ;;  %222 = vst.msk [vmem:[#allocation3] sm:$0xff] %vm221_vm7, %v219_v5 }
 0xa9c   :  { %466 = vrot.lane.b32.xlu0 %v1565_v51, %s1775_s0 }
 0xaa2   :  { %v664_v63 = vld [vmem:[#allocation3] sm:$0xff] }
 0xaa4   :  { %282 = vrot.lane.b32.xlu0 %v1867_v16, %s1776_s2 }
 0xb0e   :  { %v467_v6 = vpop.permute.xlu0 %466 }
 0xb0f   :  { %v1933_v52 = vmul.f32 %v467_v6, %v450_v46 }
 0xb11   :  { %v475_v42 = vpack.c.bf16 %v1933_v52, %v1933_v52 }
 0xb13   :  { %477 = vrot.lane.b32.xlu1 %v475_v42, %s1776_s2 }
 0xb16   :  { %v283_v7 = vpop.permute.xlu0 %282 }
 0xb17   :  { %285 = vst.msk [vmem:[#allocation3 + $0x8] sm:$0xff] %vm221_vm7, %v283_v7 }
 0xb1e   :  { %v665_v62 = vld [vmem:[#allocation3 + $0x8] sm:$0xff] }
 0xb1f   :  { %v684_v0 = vpack.c.bf16 %v665_v62, %v664_v63  ;;  %v678_v62 = vld [vmem:[#allocation6 + $0x50] sm:$0xff] }
 0xb85   :  { %v478_v16 = vpop.permute.xlu1 %477 }
 0xb86   :  { %1479 = vmatmul.msk.bf16.vlgmr.msrb.gmra.mxu2 %vm221_vm7, %v478_v16  ;;  %v681_v16 = vld [vmem:[#allocation6 + $0x68] sm:$0xff] }
 0xb87   :  { %v1970_v63 = vpack.c.bf16 %v681_v16, %v680_v61 }
 0xb89   :  { %785 = vmatpush.bf16.msrb.mxu3 %v1970_v63  ;;  %848 = vmatpush.bf16.msrb.mxu1 %v1970_v63 }
 0xb8a   :  { %974 = vmatpush.bf16.msra.mxu0 %v1970_v63 }
 0xb96   :  { %1485 = vmatmul.msk.bf16.vlgmr.msra.gmra.mxu2 %vm221_vm7, %v684_v0  ;;  %v679_v0 = vld [vmem:[#allocation6 + $0x58] sm:$0xff] }
 0xc09   :  { %v491_v2 = vpop.f32.mrf.mxu2 }
 0xc0a   :  { %v495_v4 = vadd.f32 %v491_v2, %v173_v1  ;;  %v1973_v1 = vpack.c.bf16 %v679_v0, %v678_v62 }
 0xc0c   :  { %1566 = vtanh.f32 %v495_v4  ;;  %v1480_v53 = vmul.f32 -1.442695, %v495_v4  ;;  %786 = vmatpush.bf16.msrb.mxu3 %v1973_v1  ;;  %849 = vmatpush.bf16.msrb.mxu1 %v1973_v1 }
 0xc0d   :  { %975 = vmatpush.bf16.msra.mxu0 %v1973_v1 }
 0xc11   :  { %v493_v8 = vpop.f32.mrf.mxu2  ;;  %1163 = vmatpush.bf16.msrb.mxu0 %v1970_v63 }
 0xc12   :  { %v1567_v9 = vpop.eup %1566  ;;  %v176_v8 = vadd.f32 %v1906_v54, %v1842_v12 }
 0xc13   :  { %518 = vrot.lane.b32.xlu1 %v1567_v9, %s1775_s0 }
 0xc15   :  { %1164 = vmatpush.bf16.msrb.mxu0 %v1973_v1 }
 0xc19   :  { %v710_v13 = vpop.f32.mrf.mxu2 }
 0xc1a   :  { %v711_v14 = vadd.f32 %v710_v13, %v1945_v10 }
 0xc1c   :  { %1568 = vtanh.f32 %v711_v14  ;;  %v1489_v17 = vmul.f32 -1.442695, %v711_v14 }
 0xc1e   :  { %1570 = vpow2.f32 %v1489_v17 }
 0xc1f   :  { %1572 = vpow2.f32 %v1480_v53 }
 0xc21   :  { %v712_v17 = vpop.f32.mrf.mxu2 }
 0xc22   :  { %v1569_v15 = vpop.eup %1568  ;;  %v713_v53 = vadd.f32 %v712_v17, %v1945_v10 }
 0xc23   :  { %752 = vrot.lane.b32.xlu2 %v1569_v15, %s1775_s0 }
 0xc24   :  { %v1571_v18 = vpop.eup %1570 }
 0xc25   :  { %v733_v19 = vadd.f32 1.0, %v1571_v18  ;;  %v1573_v20 = vpop.eup %1572 }
 0xc26   :  { %v499_v21 = vadd.f32 1.0, %v1573_v20 }
 0xc27   :  { %1574 = vrcp.f32 %v733_v19  ;;  %v745_v30 = vand.u32 2147483648, %v733_v19  ;;  %vm739_vm1 = vweird.f32 %v733_v19  ;;  %v743_v31 = vand.u32 2147483647, %v733_v19 }
 0xc28   :  { %1576 = vrcp.f32 %v499_v21  ;;  %v511_v39 = vand.u32 2147483648, %v499_v21  ;;  %vm505_vm5 = vweird.f32 %v499_v21  ;;  %v509_v40 = vand.u32 2147483647, %v499_v21 }
 0xc29   :  { %v746_v34 = vor.u32 1.1754944e-38, %v745_v30  ;;  %vm744_vm3 = vcmp.eq.f32.partialorder %v743_v31, 8.507059e+37 }
 0xc2a   :  { %v512_v43 = vor.u32 1.1754944e-38, %v511_v39  ;;  %vm510_vm0 = vcmp.eq.f32.partialorder %v509_v40, 8.507059e+37 }
 0xc2d   :  { %v1575_v22 = vpop.eup %1574 }
 0xc2e   :  { %v735_v11 = vmul.f32 %v1575_v22, %v733_v19  ;;  %v1577_v25 = vpop.eup %1576  ;;  %vm740_vm15 = vweird.f32 %v1575_v22 }
 0xc2f   :  { %v501_v27 = vmul.f32 %v1577_v25, %v499_v21  ;;  %vm741_vm2 = vmor %vm739_vm1, %vm740_vm15  ;;  %vm506_vm4 = vweird.f32 %v1577_v25 }
 0xc30   :  { %v736_v23 = vsub.f32 1.0, %v735_v11  ;;  %vm507_vm6 = vmor %vm505_vm5, %vm506_vm4 }
 0xc31   :  { %v502_v29 = vsub.f32 1.0, %v501_v27 }
 0xc32   :  { %v737_v26 = vmul.f32 %v1575_v22, %v736_v23 }
 0xc33   :  { %v503_v33 = vmul.f32 %v1577_v25, %v502_v29 }
 0xc34   :  { %v738_v28 = vadd.f32 %v1575_v22, %v737_v26 }
 0xc35   :  { %v504_v38 = vadd.f32 %v1577_v25, %v503_v33 }
 0xc36   :  { %v742_v32 = vsel %vm741_vm2, %v1575_v22, %v738_v28 }
 0xc37   :  { %v747_v36 = vsel %vm744_vm3, %v746_v34, %v742_v32  ;;  %v508_v41 = vsel %vm507_vm6, %v1577_v25, %v504_v38 }
 0xc38   :  { %v513_v45 = vsel %vm510_vm0, %v512_v43, %v508_v41  ;;  %v750_v47 = vmul.f32 0.0, %v747_v36 }
 0xc39   :  { %v516_v5 = vmul.f32 %v513_v45, %v1926_v3 }
 0xc7d   :  { %v753_v35 = vpop.permute.xlu2 %752 }
 0xc7e   :  { %v755_v37 = vmul.f32 %v753_v35, %v747_v36 }
 0xc80   :  { %757 = vrot.lane.b32.xlu1 %v755_v37, %s1776_s2 }
 0xc85   :  { %v519_v44 = vpop.permute.xlu1 %518 }
 0xc86   :  { %v521_v46 = vmul.f32 %v519_v44, %v513_v45 }
 0xc88   :  { %523 = vrot.lane.b32.xlu0 %v521_v46, %s1776_s2 }
 0xcf2   :  { %v758_v48 = vpop.permute.xlu1 %757 }
 0xcf3   :  { %v1951_v49 = vadd.f32 %v758_v48, %v750_v47 }
 0xcf5   :  { %1578 = vtanh.f32 %v1951_v49 }
 0xcfa   :  { %v524_v51 = vpop.permute.xlu0 %523 }
 0xcfb   :  { %v1579_v6 = vpop.eup %1578  ;;  %v1955_v42 = vadd.f32 %v524_v51, %v516_v5 }
 0xcfc   :  { %763 = vrot.lane.b32.xlu0 %v1579_v6, %s1775_s0 }
 0xcfd   :  { %1580 = vtanh.f32 %v1955_v42 }
 0xd03   :  { %v1581_v7 = vpop.eup %1580 }
 0xd04   :  { %529 = vrot.lane.b32.xlu2 %v1581_v7, %s1775_s0 }
 0xd5e   :  { %v530_v56 = vpop.permute.xlu2 %529 }
 0xd5f   :  { %v1960_v57 = vmul.f32 %v530_v56, %v513_v45 }
 0xd61   :  { %v538_v58 = vpack.c.bf16 %v1960_v57, %v1960_v57 }
 0xd63   :  { %540 = vrot.lane.b32.xlu1 %v538_v58, %s1776_s2 }
 0xd6e   :  { %v764_v3 = vpop.permute.xlu0 %763 }
 0xd6f   :  { %v1965_v59 = vmul.f32 %v764_v3, %v747_v36 }
 0xd71   :  { %v772_v60 = vpack.c.bf16 %v1965_v59, %v1965_v59 }
 0xd73   :  { %774 = vrot.lane.b32.xlu2 %v772_v60, %s1776_s2 }
 0xdcd   :  { %v775_v4 = vpop.permute.xlu2 %774 }
 0xdd5   :  { %v541_v2 = vpop.permute.xlu1 %540 }
 0xdd6   :  { %1481 = vmatmul.msk.bf16.vlgmr.msra.gmra.mxu3 %vm221_vm7, %v541_v2 }
 0xdd7   :  { %911 = vmatpush.bf16.msra.mxu3 %v1970_v63 }
 0xddb   :  { %912 = vmatpush.bf16.msra.mxu3 %v1973_v1 }
 0xde6   :  { %1490 = vmatmul.msk.bf16.vlgmr.msrb.gmra.mxu3 %vm221_vm7, %v775_v4 }
 0xde7   :  { %1100 = vmatpush.bf16.msrb.mxu3 %v1970_v63 }
 0xdeb   :  { %1101 = vmatpush.bf16.msrb.mxu3 %v1973_v1 }
 0xe59   :  { %v554_v9 = vpop.f32.mrf.mxu3 }
 0xe5a   :  { %v558_v13 = vadd.f32 %v554_v9, %v176_v8 }
 0xe5c   :  { %1582 = vtanh.f32 %v558_v13  ;;  %v1482_v22 = vmul.f32 -1.442695, %v558_v13 }
 0xe61   :  { %v556_v14 = vpop.f32.mrf.mxu3 }
 0xe62   :  { %v1583_v15 = vpop.eup %1582 }
 0xe63   :  { %581 = vrot.lane.b32.xlu0 %v1583_v15, %s1775_s0 }
 0xe69   :  { %v788_v18 = vpop.f32.mrf.mxu3 }
 0xe6a   :  { %v792_v19 = vadd.f32 %v788_v18, %v713_v53 }
 0xe6c   :  { %1584 = vtanh.f32 %v792_v19  ;;  %v1491_v23 = vmul.f32 -1.442695, %v792_v19 }
 0xe6d   :  { %1586 = vpow2.f32 %v1482_v22 }
 0xe71   :  { %v790_v20 = vpop.f32.mrf.mxu3 }
 0xe72   :  { %v1585_v21 = vpop.eup %1584 }
 0xe73   :  { %815 = vrot.lane.b32.xlu1 %v1585_v21, %s1775_s0  ;;  %v1587_v54 = vpop.eup %1586 }
 0xe74   :  { %v562_v11 = vadd.f32 1.0, %v1587_v54 }
 0xe76   :  { %1588 = vrcp.f32 %v562_v11  ;;  %v574_v33 = vand.u32 2147483648, %v562_v11  ;;  %vm568_vm9 = vweird.f32 %v562_v11  ;;  %v572_v34 = vand.u32 2147483647, %v562_v11 }
 0xe77   :  { %1590 = vpow2.f32 %v1491_v23 }
 0xe78   :  { %v575_v37 = vor.u32 1.1754944e-38, %v574_v33  ;;  %vm573_vm11 = vcmp.eq.f32.partialorder %v572_v34, 8.507059e+37 }
 0xe7c   :  { %v1589_v25 = vpop.eup %1588 }
 0xe7d   :  { %v1591_v26 = vpop.eup %1590  ;;  %v564_v27 = vmul.f32 %v1589_v25, %v562_v11  ;;  %vm569_vm8 = vweird.f32 %v1589_v25 }
 0xe7e   :  { %v796_v28 = vadd.f32 1.0, %v1591_v26  ;;  %vm570_vm10 = vmor %vm568_vm9, %vm569_vm8 }
 0xe7f   :  { %v565_v29 = vsub.f32 1.0, %v564_v27 }
 0xe80   :  { %1592 = vrcp.f32 %v796_v28  ;;  %v808_v45 = vand.u32 2147483648, %v796_v28  ;;  %vm802_vm13 = vweird.f32 %v796_v28  ;;  %v806_v46 = vand.u32 2147483647, %v796_v28 }
 0xe81   :  { %v566_v30 = vmul.f32 %v1589_v25, %v565_v29 }
 0xe82   :  { %v809_v48 = vor.u32 1.1754944e-38, %v808_v45  ;;  %vm807_vm15 = vcmp.eq.f32.partialorder %v806_v46, 8.507059e+37 }
 0xe83   :  { %v567_v31 = vadd.f32 %v1589_v25, %v566_v30 }
 0xe85   :  { %v571_v35 = vsel %vm570_vm10, %v1589_v25, %v567_v31 }
 0xe86   :  { %v1593_v32 = vpop.eup %1592  ;;  %v576_v38 = vsel %vm573_vm11, %v575_v37, %v571_v35 }
 0xe87   :  { %v798_v36 = vmul.f32 %v1593_v32, %v796_v28  ;;  %vm803_vm12 = vweird.f32 %v1593_v32  ;;  %v579_v7 = vmul.f32 %v576_v38, %v1955_v42 }
 0xe88   :  { %vm804_vm14 = vmor %vm802_vm13, %vm803_vm12 }
 0xe89   :  { %v799_v41 = vsub.f32 1.0, %v798_v36 }
 0xe8b   :  { %v800_v43 = vmul.f32 %v1593_v32, %v799_v41 }
 0xe8d   :  { %v801_v44 = vadd.f32 %v1593_v32, %v800_v43 }
 0xe8f   :  { %v805_v47 = vsel %vm804_vm14, %v1593_v32, %v801_v44 }
 0xe90   :  { %v810_v51 = vsel %vm807_vm15, %v809_v48, %v805_v47 }
 0xe91   :  { %v813_v60 = vmul.f32 %v810_v51, %v1951_v49 }
 0xed5   :  { %v582_v39 = vpop.permute.xlu0 %581 }
 0xed6   :  { %v584_v40 = vmul.f32 %v582_v39, %v576_v38 }
 0xed8   :  { %586 = vrot.lane.b32.xlu2 %v584_v40, %s1776_s2 }
 0xee5   :  { %v816_v5 = vpop.permute.xlu1 %815 }
 0xee6   :  { %v818_v6 = vmul.f32 %v816_v5, %v810_v51 }
 0xee8   :  { %820 = vrot.lane.b32.xlu0 %v818_v6, %s1776_s2 }
 0xef0   :  { %345 = vrot.lane.b32.xlu0 %v1897_v50, %s1776_s2 }
 0xf32   :  { %v587_v56 = vpop.permute.xlu2 %586 }
 0xf33   :  { %v1998_v58 = vadd.f32 %v587_v56, %v579_v7 }
 0xf35   :  { %1594 = vtanh.f32 %v1998_v58 }
 0xf3b   :  { %v1595_v3 = vpop.eup %1594 }
 0xf3c   :  { %592 = vrot.lane.b32.xlu1 %v1595_v3, %s1775_s0 }
 0xf44   :  { %408 = vrot.lane.b32.xlu1 %v1915_v24, %s1776_s2 }
 0xf5a   :  { %v821_v61 = vpop.permute.xlu0 %820 }
 0xf5b   :  { %v823_v16 = vadd.f32 %v821_v61, %v813_v60 }
 0xf5d   :  { %1596 = vtanh.f32 %v823_v16 }
 0xf62   :  { %v346_v62 = vpop.permute.xlu0 %345 }
 0xf63   :  { %v1597_v50 = vpop.eup %1596  ;;  %348 = vst.msk [vmem:[#allocation3 + $0x10] sm:$0xff] %vm221_vm7, %v346_v62 }
 0xf64   :  { %826 = vrot.lane.b32.xlu2 %v1597_v50, %s1775_s0 }
 0xf6a   :  { %v666_v4 = vld [vmem:[#allocation3 + $0x10] sm:$0xff] }
 0xfae   :  { %v593_v42 = vpop.permute.xlu1 %592 }
 0xfaf   :  { %v2007_v0 = vmul.f32 %v593_v42, %v576_v38 }
 0xfb1   :  { %v601_v2 = vpack.c.bf16 %v2007_v0, %v2007_v0 }
 0xfb3   :  { %603 = vrot.lane.b32.xlu2 %v601_v2, %s1776_s2 }
 0xfb6   :  { %v409_v24 = vpop.permute.xlu1 %408 }
 0xfb7   :  { %411 = vst.msk [vmem:[#allocation3 + $0x18] sm:$0xff] %vm221_vm7, %v409_v24 }
 0xfbe   :  { %v827_v49 = vpop.permute.xlu2 %826  ;;  %v667_v8 = vld [vmem:[#allocation3 + $0x18] sm:$0xff] }
 0xfbf   :  { %v2013_v9 = vmul.f32 %v827_v49, %v810_v51  ;;  %v685_v13 = vpack.c.bf16 %v667_v8, %v666_v4 }
 0xfc1   :  { %1486 = vmatmul.msk.bf16.gmra.mxu2 %vm221_vm7, %v685_v13  ;;  %v835_v14 = vpack.c.bf16 %v2013_v9, %v2013_v9 }
 0xfc3   :  { %837 = vrot.lane.b32.xlu0 %v835_v14, %s1776_s2 }
0x100d   :  { %v604_v15 = vpop.permute.xlu2 %603 }
0x100e   :  { %1483 = vmatmul.msk.bf16.vlgmr.msra.gmra.mxu1 %vm221_vm7, %v604_v15 }
0x100f   :  { %1037 = vmatpush.bf16.msra.mxu1 %v1970_v63 }
0x1013   :  { %1038 = vmatpush.bf16.msra.mxu1 %v1973_v1 }
0x1035   :  { %v838_v17 = vpop.permute.xlu0 %837 }
0x1036   :  { %1492 = vmatmul.msk.bf16.vlgmr.msrb.gmra.mxu1 %vm221_vm7, %v838_v17 }
0x1044   :  { %v715_v19 = vpop.f32.mrf.mxu2 }
0x1045   :  { %v716_v20 = vadd.f32 %v715_v19, %v1945_v10 }
0x104c   :  { %v717_v46 = vpop.f32.mrf.mxu2 }
0x104d   :  { %v718_v47 = vadd.f32 %v717_v46, %v1945_v10 }
0x108b   :  { %v2023_v53 = vpop.f32.mrf.mxu1 }
0x1093   :  { %v619_v18 = vpop.f32.mrf.mxu1 }
0x10b3   :  { %v851_v21 = vpop.f32.mrf.mxu1 }
0x10b4   :  { %v855_v22 = vadd.f32 %v851_v21, %v716_v20 }
0x10b6   :  { %1598 = vtanh.f32 %v855_v22  ;;  %v1493_v23 = vmul.f32 -1.442695, %v855_v22 }
0x10b8   :  { %1600 = vpow2.f32 %v1493_v23 }
0x10bb   :  { %v853_v54 = vpop.f32.mrf.mxu1 }
0x10bc   :  { %v1599_v11 = vpop.eup %1598 }
0x10bd   :  { %878 = vrot.lane.b32.xlu1 %v1599_v11, %s1775_s0 }
0x10be   :  { %v1601_v63 = vpop.eup %1600 }
0x10bf   :  { %v859_v1 = vadd.f32 1.0, %v1601_v63 }
0x10c1   :  { %1602 = vrcp.f32 %v859_v1  ;;  %v871_v30 = vand.u32 2147483648, %v859_v1  ;;  %vm865_vm2 = vweird.f32 %v859_v1  ;;  %v869_v31 = vand.u32 2147483647, %v859_v1 }
0x10c3   :  { %v872_v33 = vor.u32 1.1754944e-38, %v871_v30  ;;  %vm870_vm4 = vcmp.eq.f32.partialorder %v869_v31, 8.507059e+37 }
0x10c7   :  { %v1603_v25 = vpop.eup %1602 }
0x10c8   :  { %v861_v26 = vmul.f32 %v1603_v25, %v859_v1  ;;  %vm866_vm1 = vweird.f32 %v1603_v25 }
0x10c9   :  { %vm867_vm3 = vmor %vm865_vm2, %vm866_vm1 }
0x10ca   :  { %v862_v27 = vsub.f32 1.0, %v861_v26 }
0x10cc   :  { %v863_v28 = vmul.f32 %v1603_v25, %v862_v27 }
0x10ce   :  { %v864_v29 = vadd.f32 %v1603_v25, %v863_v28 }
0x10d0   :  { %v868_v32 = vsel %vm867_vm3, %v1603_v25, %v864_v29 }
0x10d1   :  { %v873_v35 = vsel %vm870_vm4, %v872_v33, %v868_v32 }
0x10d2   :  { %v876_v37 = vmul.f32 %v873_v35, %v823_v16 }
0x112f   :  { %v879_v34 = vpop.permute.xlu1 %878 }
0x1130   :  { %v881_v36 = vmul.f32 %v879_v34, %v873_v35 }
0x1132   :  { %883 = vrot.lane.b32.xlu2 %v881_v36, %s1776_s2 }
0x118c   :  { %v884_v38 = vpop.permute.xlu2 %883 }
0x118d   :  { %v886_v39 = vadd.f32 %v884_v38, %v876_v37 }
0x118f   :  { %1604 = vtanh.f32 %v886_v39 }
0x1195   :  { %v1605_v40 = vpop.eup %1604 }
0x1196   :  { %889 = vrot.lane.b32.xlu0 %v1605_v40, %s1775_s0  ;;  %v178_v40 = vadd.f32 %v1908_v55, %v1842_v12 }
0x1208   :  { %v890_v41 = vpop.permute.xlu0 %889 }
0x1209   :  { %v2029_v43 = vmul.f32 %v890_v41, %v873_v35 }
0x120b   :  { %v898_v44 = vpack.c.bf16 %v2029_v43, %v2029_v43 }
0x120d   :  { %900 = vrot.lane.b32.xlu1 %v898_v44, %s1776_s2  ;;  %v621_v44 = vadd.f32 %v2023_v53, %v178_v40 }
0x120f   :  { %v1484_v55 = vmul.f32 -1.442695, %v621_v44 }
0x127f   :  { %v901_v45 = vpop.permute.xlu1 %900 }
0x1280   :  { %1494 = vmatmul.msk.bf16.vlgmr.msra.gmra.mxu3 %vm221_vm7, %v901_v45 }
0x1303   :  { %v914_v48 = vpop.f32.mrf.mxu3 }
0x1304   :  { %v918_v5 = vadd.f32 %v914_v48, %v718_v47 }
0x1306   :  { %1606 = vtanh.f32 %v918_v5  ;;  %v1495_v7 = vmul.f32 -1.442695, %v918_v5 }
0x1308   :  { %1608 = vpow2.f32 %v1495_v7 }
0x130b   :  { %v916_v51 = vpop.f32.mrf.mxu3 }
0x130c   :  { %v1607_v6 = vpop.eup %1606 }
0x130d   :  { %941 = vrot.lane.b32.xlu2 %v1607_v6, %s1775_s0 }
0x130e   :  { %v1609_v56 = vpop.eup %1608 }
0x130f   :  { %v922_v3 = vadd.f32 1.0, %v1609_v56 }
0x1311   :  { %1610 = vrcp.f32 %v922_v3  ;;  %v934_v42 = vand.u32 2147483648, %v922_v3  ;;  %vm928_vm6 = vweird.f32 %v922_v3  ;;  %v932_v2 = vand.u32 2147483647, %v922_v3 }
0x1313   :  { %v935_v49 = vor.u32 1.1754944e-38, %v934_v42  ;;  %vm933_vm8 = vcmp.eq.f32.partialorder %v932_v2, 8.507059e+37 }
0x1315   :  { %471 = vrot.lane.b32.xlu2 %v1933_v52, %s1776_s2 }
0x1317   :  { %v1611_v60 = vpop.eup %1610 }
0x1318   :  { %v924_v61 = vmul.f32 %v1611_v60, %v922_v3  ;;  %vm929_vm5 = vweird.f32 %v1611_v60 }
0x1319   :  { %vm930_vm0 = vmor %vm928_vm6, %vm929_vm5 }
0x131a   :  { %v925_v16 = vsub.f32 1.0, %v924_v61 }
0x131c   :  { %v926_v62 = vmul.f32 %v1611_v60, %v925_v16 }
0x131e   :  { %v927_v50 = vadd.f32 %v1611_v60, %v926_v62 }
0x1320   :  { %v931_v24 = vsel %vm930_vm0, %v1611_v60, %v927_v50 }
0x1321   :  { %v936_v52 = vsel %vm933_vm8, %v935_v49, %v931_v24 }
0x1322   :  { %v939_v14 = vmul.f32 %v936_v52, %v886_v39 }
0x1367   :  { %v942_v4 = vpop.permute.xlu2 %941 }
0x1368   :  { %v944_v8 = vmul.f32 %v942_v4, %v936_v52 }
0x136a   :  { %946 = vrot.lane.b32.xlu0 %v944_v8, %s1776_s2 }
0x136f   :  { %v472_v13 = vpop.permute.xlu2 %471 }
0x1370   :  { %474 = vst.msk [vmem:[#allocation3 + $0x20] sm:$0xff] %vm221_vm7, %v472_v13 }
0x1372   :  { %534 = vrot.lane.b32.xlu0 %v1960_v57, %s1776_s2 }
0x1377   :  { %v668_v20 = vld [vmem:[#allocation3 + $0x20] sm:$0xff] }
0x13dc   :  { %v947_v15 = vpop.permute.xlu0 %946 }
0x13dd   :  { %v949_v17 = vadd.f32 %v947_v15, %v939_v14 }
0x13df   :  { %1612 = vtanh.f32 %v949_v17 }
0x13e4   :  { %v535_v18 = vpop.permute.xlu0 %534 }
0x13e5   :  { %v1613_v19 = vpop.eup %1612  ;;  %537 = vst.msk [vmem:[#allocation3 + $0x28] sm:$0xff] %vm221_vm7, %v535_v18 }
0x13e6   :  { %952 = vrot.lane.b32.xlu1 %v1613_v19, %s1775_s0 }
0x13ec   :  { %v669_v21 = vld [vmem:[#allocation3 + $0x28] sm:$0xff] }
0x13ed   :  { %v686_v22 = vpack.c.bf16 %v669_v21, %v668_v20 }
0x13ef   :  { %1487 = vmatmul.msk.bf16.gmra.mxu2 %vm221_vm7, %v686_v22 }
0x1458   :  { %v953_v54 = vpop.permute.xlu1 %952 }
0x1459   :  { %v2046_v11 = vmul.f32 %v953_v54, %v936_v52 }
0x145b   :  { %v961_v57 = vpack.c.bf16 %v2046_v11, %v2046_v11 }
0x145d   :  { %963 = vrot.lane.b32.xlu1 %v961_v57, %s1776_s2 }
0x1472   :  { %v720_v63 = vpop.f32.mrf.mxu2 }
0x1473   :  { %v721_v1 = vadd.f32 %v720_v63, %v1945_v10 }
0x147a   :  { %v722_v15 = vpop.f32.mrf.mxu2 }
0x14cf   :  { %v964_v23 = vpop.permute.xlu1 %963 }
0x14d0   :  { %1496 = vmatmul.msk.bf16.vlgmr.msra.gmra.mxu0 %vm221_vm7, %v964_v23 }
0x154d   :  { %v977_v25 = vpop.f32.mrf.mxu0 }
0x154e   :  { %v981_v26 = vadd.f32 %v977_v25, %v721_v1 }
0x1550   :  { %1614 = vtanh.f32 %v981_v26  ;;  %v1497_v29 = vmul.f32 -1.442695, %v981_v26 }
0x1552   :  { %1616 = vpow2.f32 %v1497_v29 }
0x1555   :  { %v979_v27 = vpop.f32.mrf.mxu0 }
0x1556   :  { %v1615_v28 = vpop.eup %1614 }
0x1557   :  { %1004 = vrot.lane.b32.xlu2 %v1615_v28, %s1775_s0 }
0x1558   :  { %v1617_v30 = vpop.eup %1616 }
0x1559   :  { %v985_v31 = vadd.f32 1.0, %v1617_v30 }
0x155b   :  { %1618 = vrcp.f32 %v985_v31  ;;  %v997_v37 = vand.u32 2147483648, %v985_v31  ;;  %vm991_vm10 = vweird.f32 %v985_v31  ;;  %v995_v38 = vand.u32 2147483647, %v985_v31 }
0x155c   :  { %1620 = vtanh.f32 %v621_v44 }
0x155d   :  { %v998_v41 = vor.u32 1.1754944e-38, %v997_v37  ;;  %vm996_vm12 = vcmp.eq.f32.partialorder %v995_v38, 8.507059e+37 }
0x1561   :  { %v1619_v32 = vpop.eup %1618 }
0x1562   :  { %v987_v33 = vmul.f32 %v1619_v32, %v985_v31  ;;  %vm992_vm9 = vweird.f32 %v1619_v32  ;;  %v1621_v48 = vpop.eup %1620 }
0x1563   :  { %vm993_vm11 = vmor %vm991_vm10, %vm992_vm9 }
0x1564   :  { %v988_v34 = vsub.f32 1.0, %v987_v33 }
0x1566   :  { %v989_v35 = vmul.f32 %v1619_v32, %v988_v34 }
0x1568   :  { %v990_v36 = vadd.f32 %v1619_v32, %v989_v35 }
0x156a   :  { %v994_v39 = vsel %vm993_vm11, %v1619_v32, %v990_v36 }
0x156b   :  { %v999_v46 = vsel %vm996_vm12, %v998_v41, %v994_v39 }
0x156c   :  { %v1002_v5 = vmul.f32 %v999_v46, %v949_v17  ;;  %v723_v17 = vadd.f32 %v722_v15, %v1945_v10 }
0x15b1   :  { %v1005_v45 = vpop.permute.xlu2 %1004 }
0x15b2   :  { %v1007_v47 = vmul.f32 %v1005_v45, %v999_v46 }
0x15b4   :  { %1009 = vrot.lane.b32.xlu0 %v1007_v47, %s1776_s2 }
0x15bc   :  { %644 = vrot.lane.b32.xlu0 %v1621_v48, %s1775_s0 }
0x1626   :  { %v1010_v51 = vpop.permute.xlu0 %1009 }
0x1627   :  { %v2059_v6 = vadd.f32 %v1010_v51, %v1002_v5 }
0x1629   :  { %1622 = vtanh.f32 %v2059_v6 }
0x162a   :  { %1624 = vpow2.f32 %v1484_v55 }
0x162e   :  { %v645_v52 = vpop.permute.xlu0 %644 }
0x162f   :  { %v1623_v12 = vpop.eup %1622 }
0x1630   :  { %1015 = vrot.lane.b32.xlu1 %v1623_v12, %s1775_s0  ;;  %v1625_v53 = vpop.eup %1624 }
0x1631   :  { %v625_v7 = vadd.f32 1.0, %v1625_v53 }
0x1633   :  { %1626 = vrcp.f32 %v625_v7  ;;  %v637_v2 = vand.u32 2147483648, %v625_v7  ;;  %vm631_vm14 = vweird.f32 %v625_v7  ;;  %v635_v24 = vand.u32 2147483647, %v625_v7 }
0x1635   :  { %v638_v4 = vor.u32 1.1754944e-38, %v637_v2  ;;  %vm636_vm1 = vcmp.eq.f32.partialorder %v635_v24, 8.507059e+37 }
0x1639   :  { %v1627_v56 = vpop.eup %1626 }
0x163a   :  { %v627_v3 = vmul.f32 %v1627_v56, %v625_v7  ;;  %vm632_vm13 = vweird.f32 %v1627_v56 }
0x163b   :  { %vm633_vm15 = vmor %vm631_vm14, %vm632_vm13 }
0x163c   :  { %v628_v60 = vsub.f32 1.0, %v627_v3 }
0x163e   :  { %v629_v61 = vmul.f32 %v1627_v56, %v628_v60 }
0x1640   :  { %v630_v50 = vadd.f32 %v1627_v56, %v629_v61 }
0x1642   :  { %v634_v49 = vsel %vm633_vm15, %v1627_v56, %v630_v50 }
0x1643   :  { %v639_v8 = vsel %vm636_vm1, %v638_v4, %v634_v49 }
0x1644   :  { %v647_v13 = vmul.f32 %v645_v52, %v639_v8  ;;  %v642_v21 = vmul.f32 %v639_v8, %v1998_v58 }
0x16a2   :  { %v1016_v16 = vpop.permute.xlu1 %1015 }
0x16a3   :  { %v2063_v62 = vmul.f32 %v1016_v16, %v999_v46 }
0x16a5   :  { %v1024_v42 = vpack.c.bf16 %v2063_v62, %v2063_v62 }
0x16a7   :  { %1026 = vrot.lane.b32.xlu2 %v1024_v42, %s1776_s2 }
0x16af   :  { %649 = vrot.lane.b32.xlu2 %v647_v13, %s1776_s2 }
0x1701   :  { %v1027_v14 = vpop.permute.xlu2 %1026 }
0x1702   :  { %1498 = vmatmul.msk.bf16.vlgmr.msra.gmra.mxu1 %vm221_vm7, %v1027_v14 }
0x1709   :  { %v650_v20 = vpop.permute.xlu2 %649 }
0x170a   :  { %v652_v22 = vadd.f32 %v650_v20, %v642_v21 }
0x177f   :  { %v1040_v18 = vpop.f32.mrf.mxu1 }
0x1780   :  { %v1044_v19 = vadd.f32 %v1040_v18, %v723_v17 }
0x1782   :  { %1628 = vtanh.f32 %v1044_v19  ;;  %v1499_v63 = vmul.f32 -1.442695, %v1044_v19 }
0x1783   :  { %1630 = vtanh.f32 %v652_v22 }
0x1784   :  { %1632 = vpow2.f32 %v1499_v63 }
0x1787   :  { %v1042_v54 = vpop.f32.mrf.mxu1 }
0x1788   :  { %v1629_v57 = vpop.eup %1628 }
0x1789   :  { %1067 = vrot.lane.b32.xlu1 %v1629_v57, %s1775_s0  ;;  %v1631_v23 = vpop.eup %1630 }
0x178a   :  { %v1633_v1 = vpop.eup %1632 }
0x178b   :  { %v1048_v25 = vadd.f32 1.0, %v1633_v1 }
0x178d   :  { %1634 = vrcp.f32 %v1048_v25  ;;  %v1060_v58 = vand.u32 2147483648, %v1048_v25  ;;  %vm1054_vm3 = vweird.f32 %v1048_v25  ;;  %v1058_v31 = vand.u32 2147483647, %v1048_v25 }
0x178f   :  { %v1061_v33 = vor.u32 1.1754944e-38, %v1060_v58  ;;  %vm1059_vm5 = vcmp.eq.f32.partialorder %v1058_v31, 8.507059e+37 }
0x1791   :  { %655 = vrot.lane.b32.xlu1 %v1631_v23, %s1775_s0 }
0x1793   :  { %v1635_v26 = vpop.eup %1634 }
0x1794   :  { %v1050_v27 = vmul.f32 %v1635_v26, %v1048_v25  ;;  %vm1055_vm2 = vweird.f32 %v1635_v26 }
0x1795   :  { %vm1056_vm4 = vmor %vm1054_vm3, %vm1055_vm2 }
0x1796   :  { %v1051_v28 = vsub.f32 1.0, %v1050_v27 }
0x1798   :  { %v1052_v29 = vmul.f32 %v1635_v26, %v1051_v28 }
0x179a   :  { %v1053_v30 = vadd.f32 %v1635_v26, %v1052_v29 }
0x179c   :  { %v1057_v32 = vsel %vm1056_vm4, %v1635_v26, %v1053_v30  ;;  %vm1458_vm4 = vcmask 3072  }
0x179d   :  { %v1062_v35 = vsel %vm1059_vm5, %v1061_v33, %v1057_v32  ;;  %v1224_v32 = vld [vmem:[#allocation6 + $0x88] sm:$0xff]  ;;  %v1223_v33 = vld [vmem:[#allocation6 + $0x80] sm:$0xff] }
0x179e   :  { %v1065_v39 = vmul.f32 %v1062_v35, %v2059_v6  ;;  %1514 = vmatpush.msra.mxu3 %v1224_v32  ;;  %1262 = vmatpush.msrb.mxu1 %v1224_v32 }
0x17a0   :  { %1515 = vmatpush.msra.mxu3 %v1223_v33  ;;  %1263 = vmatpush.msrb.mxu1 %v1223_v33 }
0x17fb   :  { %v1068_v34 = vpop.permute.xlu1 %1067 }
0x17fc   :  { %v1070_v36 = vmul.f32 %v1068_v34, %v1062_v35  ;;  %v1222_v34 = vld [vmem:[#allocation6 + $0x78] sm:$0xff] }
0x17fd   :  { %1516 = vmatpush.msra.mxu3 %v1222_v34  ;;  %1264 = vmatpush.msrb.mxu1 %v1222_v34 }
0x17fe   :  { %1072 = vrot.lane.b32.xlu0 %v1070_v36, %s1776_s2  ;;  %v1221_v36 = vld [vmem:[#allocation6 + $0x70] sm:$0xff] }
0x17ff   :  { %1517 = vmatpush.msra.mxu3 %v1221_v36  ;;  %1265 = vmatpush.msrb.mxu1 %v1221_v36 }
0x1803   :  { %v656_v37 = vpop.permute.xlu1 %655 }
0x1804   :  { %v658_v38 = vmul.f32 %v656_v37, %v639_v8 }
0x1806   :  { %660 = vrot.lane.b32.xlu1 %v658_v38, %s1776_s2  ;;  %597 = vrot.lane.b32.xlu0 %v2007_v0, %s1776_s2 }
0x1870   :  { %v1073_v40 = vpop.permute.xlu0 %1072 }
0x1871   :  { %v1075_v41 = vadd.f32 %v1073_v40, %v1065_v39 }
0x1873   :  { %1636 = vtanh.f32 %v1075_v41 }
0x1878   :  { %v661_v44 = vpop.permute.xlu1 %660  ;;  %v598_v45 = vpop.permute.xlu0 %597 }
0x1879   :  { %v1637_v46 = vpop.eup %1636  ;;  %663 = vst.msk [vmem:[#allocation3 + $0x38] sm:$0xff] %vm221_vm7, %v661_v44 }
0x187a   :  { %600 = vst.msk [vmem:[#allocation3 + $0x30] sm:$0xff] %vm221_vm7, %v598_v45  ;;  %1078 = vrot.lane.b32.xlu2 %v1637_v46, %s1775_s0 }
0x1880   :  { %v671_v47 = vld [vmem:[#allocation3 + $0x38] sm:$0xff] }
0x1881   :  { %v670_v48 = vld [vmem:[#allocation3 + $0x30] sm:$0xff] }
0x1882   :  { %v687_v5 = vpack.c.bf16 %v671_v47, %v670_v48 }
0x1884   :  { %1488 = vmatmul.msk.bf16.gmra.mxu2 %vm221_vm7, %v687_v5 }
0x18d4   :  { %v1079_v0 = vpop.permute.xlu2 %1078 }
0x18d5   :  { %v2083_v51 = vmul.f32 %v1079_v0, %v1062_v35 }
0x18d7   :  { %v1087_v6 = vpack.c.bf16 %v2083_v51, %v2083_v51 }
0x18d9   :  { %1089 = vrot.lane.b32.xlu2 %v1087_v6, %s1776_s2 }
0x1907   :  { %v725_v55 = vpop.f32.mrf.mxu2 }
0x1908   :  { %v726_v53 = vadd.f32 %v725_v55, %v1945_v10 }
0x190f   :  { %v727_v1 = vpop.f32.mrf.mxu2 }
0x1910   :  { %v728_v25 = vadd.f32 %v727_v1, %v1945_v10 }
0x1933   :  { %v1090_v12 = vpop.permute.xlu2 %1089 }
0x1934   :  { %1500 = vmatmul.msk.bf16.vlgmr.msrb.gmra.mxu3 %vm221_vm7, %v1090_v12 }
0x19b7   :  { %v1103_v7 = vpop.f32.mrf.mxu3 }
0x19b8   :  { %v1107_v56 = vadd.f32 %v1103_v7, %v726_v53 }
0x19ba   :  { %1638 = vtanh.f32 %v1107_v56  ;;  %v1501_v61 = vmul.f32 -1.442695, %v1107_v56 }
0x19bc   :  { %1640 = vpow2.f32 %v1501_v61 }
0x19bf   :  { %v1105_v3 = vpop.f32.mrf.mxu3 }
0x19c0   :  { %v1639_v60 = vpop.eup %1638 }
0x19c1   :  { %1130 = vrot.lane.b32.xlu0 %v1639_v60, %s1775_s0 }
0x19c2   :  { %v1641_v16 = vpop.eup %1640 }
0x19c3   :  { %v1111_v50 = vadd.f32 1.0, %v1641_v16 }
0x19c5   :  { %1642 = vrcp.f32 %v1111_v50  ;;  %v1123_v52 = vand.u32 2147483648, %v1111_v50  ;;  %vm1117_vm0 = vweird.f32 %v1111_v50  ;;  %v1121_v8 = vand.u32 2147483647, %v1111_v50 }
0x19c7   :  { %v1124_v14 = vor.u32 1.1754944e-38, %v1123_v52  ;;  %vm1122_vm9 = vcmp.eq.f32.partialorder %v1121_v8, 8.507059e+37 }
0x19cb   :  { %v1643_v42 = vpop.eup %1642 }
0x19cc   :  { %v1113_v2 = vmul.f32 %v1643_v42, %v1111_v50  ;;  %vm1118_vm6 = vweird.f32 %v1643_v42 }
0x19cd   :  { %vm1119_vm8 = vmor %vm1117_vm0, %vm1118_vm6 }
0x19ce   :  { %v1114_v24 = vsub.f32 1.0, %v1113_v2 }
0x19d0   :  { %v1115_v49 = vmul.f32 %v1643_v42, %v1114_v24 }
0x19d2   :  { %v1116_v4 = vadd.f32 %v1643_v42, %v1115_v49 }
0x19d4   :  { %v1120_v13 = vsel %vm1119_vm8, %v1643_v42, %v1116_v4  ;;  %v2134_v4 = vld [vmem:[#allocation8] sm:$0xff] }
0x19d5   :  { %v1125_v17 = vsel %vm1122_vm9, %v1124_v14, %v1120_v13  ;;  %v1225_v52 = vperm.slane %v2134_v4, 2 }
0x19d6   :  { %v1128_v19 = vmul.f32 %v1125_v17, %v1075_v41 }
0x1a33   :  { %v1131_v15 = vpop.permute.xlu0 %1130 }
0x1a34   :  { %v1133_v18 = vmul.f32 %v1131_v15, %v1125_v17 }
0x1a36   :  { %1135 = vrot.lane.b32.xlu1 %v1133_v18, %s1776_s2 }
0x1aa8   :  { %v1136_v20 = vpop.permute.xlu1 %1135 }
0x1aa9   :  { %v2092_v21 = vadd.f32 %v1136_v20, %v1128_v19  ;;  %v1299_v19 = vperm.slane %v2134_v4, 3 }
0x1aab   :  { %1644 = vtanh.f32 %v2092_v21 }
0x1ab1   :  { %v1645_v22 = vpop.eup %1644 }
0x1ab2   :  { %1141 = vrot.lane.b32.xlu2 %v1645_v22, %s1775_s0 }
0x1b0c   :  { %v1142_v54 = vpop.permute.xlu2 %1141 }
0x1b0d   :  { %v2096_v57 = vmul.f32 %v1142_v54, %v1125_v17 }
0x1b0f   :  { %v1150_v23 = vpack.c.bf16 %v2096_v57, %v2096_v57 }
0x1b11   :  { %1152 = vrot.lane.b32.xlu0 %v1150_v23, %s1776_s2 }
0x1b83   :  { %v1153_v63 = vpop.permute.xlu0 %1152 }
0x1b84   :  { %1502 = vmatmul.msk.bf16.vlgmr.msrb.gmra.mxu0 %vm221_vm7, %v1153_v63 }
0x1c01   :  { %v1166_v26 = vpop.f32.mrf.mxu0 }
0x1c02   :  { %v1170_v27 = vadd.f32 %v1166_v26, %v728_v25 }
0x1c04   :  { %1646 = vtanh.f32 %v1170_v27  ;;  %v1503_v30 = vmul.f32 -1.442695, %v1170_v27 }
0x1c06   :  { %1648 = vpow2.f32 %v1503_v30 }
0x1c09   :  { %v1168_v28 = vpop.f32.mrf.mxu0 }
0x1c0a   :  { %v1647_v29 = vpop.eup %1646 }
0x1c0b   :  { %1193 = vrot.lane.b32.xlu1 %v1647_v29, %s1775_s0 }
0x1c0c   :  { %v1649_v58 = vpop.eup %1648 }
0x1c0d   :  { %v1174_v31 = vadd.f32 1.0, %v1649_v58 }
0x1c0f   :  { %1650 = vrcp.f32 %v1174_v31  ;;  %v1186_v40 = vand.u32 2147483648, %v1174_v31  ;;  %vm1180_vm11 = vweird.f32 %v1174_v31  ;;  %v1184_v41 = vand.u32 2147483647, %v1174_v31 }
0x1c11   :  { %v1187_v45 = vor.u32 1.1754944e-38, %v1186_v40  ;;  %vm1185_vm13 = vcmp.eq.f32.partialorder %v1184_v41, 8.507059e+37 }
0x1c13   :  { %1020 = vrot.lane.b32.xlu1 %v2063_v62, %s1776_s2 }
0x1c15   :  { %v1651_v10 = vpop.eup %1650 }
0x1c16   :  { %v1176_v35 = vmul.f32 %v1651_v10, %v1174_v31  ;;  %vm1181_vm10 = vweird.f32 %v1651_v10 }
0x1c17   :  { %vm1182_vm12 = vmor %vm1180_vm11, %vm1181_vm10 }
0x1c18   :  { %v1177_v37 = vsub.f32 1.0, %v1176_v35 }
0x1c1a   :  { %v1178_v38 = vmul.f32 %v1651_v10, %v1177_v37 }
0x1c1b   :  { %831 = vrot.lane.b32.xlu1 %v2013_v9, %s1776_s2 }
0x1c1c   :  { %v1179_v39 = vadd.f32 %v1651_v10, %v1178_v38 }
0x1c1e   :  { %v1183_v44 = vsel %vm1182_vm12, %v1651_v10, %v1179_v39 }
0x1c1f   :  { %v1188_v47 = vsel %vm1185_vm13, %v1187_v45, %v1183_v44 }
0x1c20   :  { %v1191_v12 = vmul.f32 %v1188_v47, %v2092_v21 }
0x1c7d   :  { %v1194_v46 = vpop.permute.xlu1 %1193 }
0x1c7e   :  { %v1196_v48 = vmul.f32 %v1194_v46, %v1188_v47 }
0x1c80   :  { %1198 = vrot.lane.b32.xlu2 %v1196_v48, %s1776_s2 }
0x1c85   :  { %v1021_v5 = vpop.permute.xlu1 %1020 }
0x1c86   :  { %1023 = vst.msk [vmem:[#allocation3 + $0x20] sm:$0xff] %vm221_vm7, %v1021_v5 }
0x1c88   :  { %768 = vrot.lane.b32.xlu2 %v1965_v59, %s1776_s2 }
0x1c8d   :  { %v832_v0 = vpop.permute.xlu1 %831  ;;  %v1217_v6 = vld [vmem:[#allocation3 + $0x20] sm:$0xff] }
0x1c8e   :  { %834 = vst.msk [vmem:[#allocation3 + $0x8] sm:$0xff] %vm221_vm7, %v832_v0  ;;  %1508 = vmatmul.msk.f32.vlgmr.msra.gmra.mxu3 %vm221_vm7, %v1217_v6 }
0x1c90   :  { %1146 = vrot.lane.b32.xlu2 %v2096_v57, %s1776_s2 }
0x1c95   :  { %v1214_v16 = vld [vmem:[#allocation3 + $0x8] sm:$0xff] }
0x1c98   :  { %957 = vrot.lane.b32.xlu2 %v2046_v11, %s1776_s2 }
0x1cda   :  { %v1199_v55 = vpop.permute.xlu2 %1198 }
0x1cdb   :  { %v1201_v53 = vadd.f32 %v1199_v55, %v1191_v12 }
0x1cdd   :  { %1652 = vtanh.f32 %v1201_v53 }
0x1ce2   :  { %v769_v7 = vpop.permute.xlu2 %768 }
0x1ce3   :  { %v1653_v56 = vpop.eup %1652  ;;  %771 = vst.msk [vmem:[#allocation3] sm:$0xff] %vm221_vm7, %v769_v7 }
0x1ce4   :  { %1204 = vrot.lane.b32.xlu0 %v1653_v56, %s1775_s0 }
0x1cea   :  { %v1147_v3 = vpop.permute.xlu2 %1146  ;;  %v1213_v60 = vld [vmem:[#allocation3] sm:$0xff] }
0x1ceb   :  { %1149 = vst.msk [vmem:[#allocation3 + $0x30] sm:$0xff] %vm221_vm7, %v1147_v3  ;;  %1504 = vmatmul.msk.f32.vlgmr.msrb.gmra.mxu1 %vm221_vm7, %v1213_v60 }
0x1cec   :  { %1083 = vrot.lane.b32.xlu0 %v2083_v51, %s1776_s2 }
0x1cf2   :  { %v958_v61 = vpop.permute.xlu2 %957  ;;  %v1219_v18 = vld [vmem:[#allocation3 + $0x30] sm:$0xff] }
0x1cf3   :  { %960 = vst.msk [vmem:[#allocation3 + $0x18] sm:$0xff] %vm221_vm7, %v958_v61  ;;  %1505 = vmatmul.msk.f32.gmra.mxu1 %vm221_vm7, %v1214_v16 }
0x1cf4   :  { %894 = vrot.lane.b32.xlu0 %v2029_v43, %s1776_s2 }
0x1cfa   :  { %v1216_v23 = vld [vmem:[#allocation3 + $0x18] sm:$0xff] }
0x1d11   :  { %v1279_v14 = vpop.f32.mrf.mxu3 }
0x1d12   :  { %v1280_v15 = vadd.f32 %v1279_v14, %v1225_v52 }
0x1d56   :  { %v1205_v50 = vpop.permute.xlu0 %1204 }
0x1d57   :  { %v2129_v42 = vmul.f32 %v1205_v50, %v1188_v47 }
0x1d59   :  { %1209 = vrot.lane.b32.xlu1 %v2129_v42, %s1776_s2 }
0x1d5e   :  { %v1084_v2 = vpop.permute.xlu0 %1083 }
0x1d5f   :  { %1086 = vst.msk [vmem:[#allocation3 + $0x28] sm:$0xff] %vm221_vm7, %v1084_v2 }
0x1d66   :  { %v895_v24 = vpop.permute.xlu0 %894  ;;  %v1218_v49 = vld [vmem:[#allocation3 + $0x28] sm:$0xff] }
0x1d67   :  { %897 = vst.msk [vmem:[#allocation3 + $0x10] sm:$0xff] %vm221_vm7, %v895_v24  ;;  %1509 = vmatmul.msk.f32.gmra.mxu3 %vm221_vm7, %v1218_v49 }
0x1d68   :  { %v1267_v8 = vpop.f32.mrf.mxu1 }
0x1d69   :  { %v1268_v13 = vadd.f32 %v1267_v8, %v1225_v52 }
0x1d6b   :  { %1654 = vtanh.f32 %v1268_v13 }
0x1d6c   :  { %1656 = vtanh.f32 %v1280_v15 }
0x1d6e   :  { %v1215_v17 = vld [vmem:[#allocation3 + $0x10] sm:$0xff] }
0x1d6f   :  { %1506 = vmatmul.msk.f32.gmra.mxu1 %vm221_vm7, %v1215_v17  ;;  %1510 = vmatmul.msk.f32.gmra.mxu3 %vm221_vm7, %v1219_v18 }
0x1d70   :  { %v1270_v21 = vpop.f32.mrf.mxu1 }
0x1d71   :  { %v1655_v20 = vpop.eup %1654  ;;  %v1271_v54 = vadd.f32 %v1270_v21, %v1225_v52 }
0x1d72   :  { %v1300_v22 = vmul.f32 %v1655_v20, %v1299_v19  ;;  %v1657_v63 = vpop.eup %1656 }
0x1d73   :  { %1658 = vtanh.f32 %v1271_v54  ;;  %v1304_v1 = vmul.f32 %v1657_v63, %v1299_v19 }
0x1d74   :  { %1308 = vadd.xlane.f32.xlu0 %v1300_v22 }
0x1d77   :  { %1507 = vmatmul.msk.f32.gmra.mxu1 %vm221_vm7, %v1216_v23 }
0x1d79   :  { %v1659_v25 = vpop.eup %1658 }
0x1d7a   :  { %v1301_v26 = vmul.f32 %v1659_v25, %v1299_v19 }
0x1d7c   :  { %1316 = vadd.xlane.f32.xlu0 %v1304_v1 }
0x1d83   :  { %1310 = vadd.xlane.f32.xlu1 %v1301_v26 }
0x1dcb   :  { %v1210_v27 = vpop.permute.xlu1 %1209 }
0x1dcc   :  { %1212 = vst.msk [vmem:[#allocation3 + $0x38] sm:$0xff] %vm221_vm7, %v1210_v27 }
0x1dd3   :  { %v1220_v28 = vld [vmem:[#allocation3 + $0x38] sm:$0xff] }
0x1dd4   :  { %1511 = vmatmul.msk.f32.gmra.mxu3 %vm221_vm7, %v1220_v28 }
0x1de7   :  { %v1309_v0 = vpop.xlane.xlu0 %1308 }
0x1dea   :  { %v1282_v29 = vpop.f32.mrf.mxu3 }
0x1deb   :  { %v1283_v30 = vadd.f32 %v1282_v29, %v1225_v52 }
0x1dec   :  { %v1273_v58 = vpop.f32.mrf.mxu1 }
0x1ded   :  { %1660 = vtanh.f32 %v1283_v30  ;;  %v1274_v31 = vadd.f32 %v1273_v58, %v1225_v52 }
0x1def   :  { %1662 = vtanh.f32 %v1274_v31  ;;  %v1317_v55 = vpop.xlane.xlu0 %1316 }
0x1df2   :  { %v1285_v36 = vpop.f32.mrf.mxu3 }
0x1df3   :  { %v1661_v32 = vpop.eup %1660  ;;  %v1286_v38 = vadd.f32 %v1285_v36, %v1225_v52 }
0x1df4   :  { %v1276_v10 = vpop.f32.mrf.mxu1  ;;  %v1305_v33 = vmul.f32 %v1661_v32, %v1299_v19 }
0x1df5   :  { %v1663_v34 = vpop.eup %1662  ;;  %v1277_v35 = vadd.f32 %v1276_v10, %v1225_v52 }
0x1df6   :  { %1318 = vadd.xlane.f32.xlu1 %v1305_v33  ;;  %v1302_v37 = vmul.f32 %v1663_v34, %v1299_v19  ;;  %v1311_v6 = vpop.xlane.xlu1 %1310 }
0x1df7   :  { %1664 = vtanh.f32 %v1277_v35  ;;  %v1324_v60 = vmax.f32 %v1309_v0, %v1311_v6 }
0x1df8   :  { %1312 = vadd.xlane.f32.xlu2 %v1302_v37  ;;  %1666 = vtanh.f32 %v1286_v38  ;;  %v1403_v37 = vld [vmem:[#allocation6 + $0xa8] sm:$0xff]  ;;  %v1402_v38 = vld [vmem:[#allocation6 + $0xa0] sm:$0xff] }
0x1df9   :  { %1422 = vmatpush.msrb.mxu3 %v1403_v37 }
0x1dfb   :  { %1423 = vmatpush.msrb.mxu3 %v1402_v38 }
0x1dfd   :  { %v1665_v39 = vpop.eup %1664 }
0x1dfe   :  { %v1303_v40 = vmul.f32 %v1665_v39, %v1299_v19  ;;  %v1667_v41 = vpop.eup %1666 }
0x1dff   :  { %v1306_v44 = vmul.f32 %v1667_v41, %v1299_v19  ;;  %v1400_v41 = vld [vmem:[#allocation6 + $0x90] sm:$0xff] }
0x1e00   :  { %1314 = vadd.xlane.f32.xlu2 %v1303_v40  ;;  %v1401_v40 = vld [vmem:[#allocation6 + $0x98] sm:$0xff] }
0x1e01   :  { %1424 = vmatpush.msrb.mxu3 %v1401_v40 }
0x1e03   :  { %1425 = vmatpush.msrb.mxu3 %v1400_v41 }
0x1e08   :  { %1320 = vadd.xlane.f32.xlu2 %v1306_v44 }
0x1e57   :  { %v1288_v45 = vpop.f32.mrf.mxu3 }
0x1e58   :  { %v1289_v46 = vadd.f32 %v1288_v45, %v1225_v52 }
0x1e5a   :  { %1668 = vtanh.f32 %v1289_v46 }
0x1e60   :  { %v1669_v47 = vpop.eup %1668 }
0x1e61   :  { %v1307_v48 = vmul.f32 %v1669_v47, %v1299_v19 }
0x1e63   :  { %1322 = vadd.xlane.f32.xlu0 %v1307_v48 }
0x1e69   :  { %v1319_v53 = vpop.xlane.xlu1 %1318 }
0x1e6a   :  { %v1326_v61 = vmax.f32 %v1317_v55, %v1319_v53 }
0x1e6b   :  { %v1313_v5 = vpop.xlane.xlu2 %1312 }
0x1e73   :  { %v1315_v12 = vpop.xlane.xlu2 %1314 }
0x1e74   :  { %v1325_v7 = vmax.f32 %v1313_v5, %v1315_v12 }
0x1e76   :  { %v1328_v50 = vmax.f32 %v1324_v60, %v1325_v7 }
0x1e7b   :  { %v1321_v56 = vpop.xlane.xlu2 %1320 }
0x1ed6   :  { %v1323_v3 = vpop.xlane.xlu0 %1322 }
0x1ed7   :  { %v1327_v16 = vmax.f32 %v1321_v56, %v1323_v3 }
0x1ed9   :  { %v1329_v2 = vmax.f32 %v1326_v61, %v1327_v16 }
0x1edb   :  { %v1330_v24 = vmax.f32 %v1328_v50, %v1329_v2 }
0x1edd   :  { %v1331_v49 = vsub.f32 %v1309_v0, %v1330_v24  ;;  %v1334_v52 = vsub.f32 %v1311_v6, %v1330_v24  ;;  %v1337_v8 = vsub.f32 %v1313_v5, %v1330_v24  ;;  %v1340_v13 = vsub.f32 %v1315_v12, %v1330_v24 }
0x1ede   :  { %v1343_v14 = vsub.f32 %v1317_v55, %v1330_v24  ;;  %v1346_v15 = vsub.f32 %v1319_v53, %v1330_v24  ;;  %v1349_v20 = vsub.f32 %v1321_v56, %v1330_v24  ;;  %v1352_v22 = vsub.f32 %v1323_v3, %v1330_v24 }
0x1edf   :  { %v1332_v17 = vmul.f32 1.442695, %v1331_v49  ;;  %v1335_v18 = vmul.f32 1.442695, %v1334_v52  ;;  %v1338_v19 = vmul.f32 1.442695, %v1337_v8 }
0x1ee0   :  { %v1341_v21 = vmul.f32 1.442695, %v1340_v13  ;;  %v1344_v54 = vmul.f32 1.442695, %v1343_v14  ;;  %v1347_v23 = vmul.f32 1.442695, %v1346_v15 }
0x1ee1   :  { %1670 = vpow2.f32 %v1332_v17  ;;  %v1350_v63 = vmul.f32 1.442695, %v1349_v20  ;;  %v1353_v1 = vmul.f32 1.442695, %v1352_v22 }
0x1ee2   :  { %1672 = vpow2.f32 %v1335_v18 }
0x1ee3   :  { %1674 = vpow2.f32 %v1338_v19 }
0x1ee4   :  { %1676 = vpow2.f32 %v1341_v21 }
0x1ee5   :  { %1678 = vpow2.f32 %v1344_v54 }
0x1ee6   :  { %1680 = vpow2.f32 %v1347_v23  ;;  %v1435_v23 = vperm.slane %v2134_v4, 7 }
0x1ee7   :  { %v1671_v25 = vpop.eup %1670  ;;  %1682 = vpow2.f32 %v1350_v63 }
0x1ee8   :  { %v1673_v26 = vpop.eup %1672  ;;  %1684 = vpow2.f32 %v1353_v1 }
0x1ee9   :  { %v1675_v27 = vpop.eup %1674  ;;  %v1355_v30 = vadd.f32 %v1673_v26, %v1671_v25 }
0x1eea   :  { %v1677_v28 = vpop.eup %1676 }
0x1eeb   :  { %v1679_v29 = vpop.eup %1678  ;;  %v1356_v58 = vadd.f32 %v1677_v28, %v1675_v27 }
0x1eec   :  { %v1681_v31 = vpop.eup %1680 }
0x1eed   :  { %v1683_v32 = vpop.eup %1682  ;;  %v1357_v10 = vadd.f32 %v1681_v31, %v1679_v29  ;;  %v1359_v35 = vadd.f32 %v1356_v58, %v1355_v30 }
0x1eee   :  { %v1685_v33 = vpop.eup %1684 }
0x1eef   :  { %v1358_v34 = vadd.f32 %v1685_v33, %v1683_v32 }
0x1ef1   :  { %v1360_v36 = vadd.f32 %v1358_v34, %v1357_v10 }
0x1ef3   :  { %v1361_v39 = vadd.f32 %v1360_v36, %v1359_v35 }
0x1ef5   :  { %1686 = vrcp.f32 %v1361_v39  ;;  %v1373_v47 = vand.u32 2147483648, %v1361_v39  ;;  %v1371_v5 = vand.u32 2147483647, %v1361_v39  ;;  %vm1367_vm15 = vweird.f32 %v1361_v39 }
0x1ef7   :  { %v1374_v6 = vor.u32 1.1754944e-38, %v1373_v47  ;;  %vm1372_vm2 = vcmp.eq.f32.partialorder %v1371_v5, 8.507059e+37 }
0x1efb   :  { %v1687_v44 = vpop.eup %1686 }
0x1efc   :  { %v1363_v45 = vmul.f32 %v1687_v44, %v1361_v39  ;;  %vm1368_vm14 = vweird.f32 %v1687_v44 }
0x1efd   :  { %vm1369_vm1 = vmor %vm1367_vm15, %vm1368_vm14 }
0x1efe   :  { %v1364_v46 = vsub.f32 1.0, %v1363_v45 }
0x1f00   :  { %v1365_v48 = vmul.f32 %v1687_v44, %v1364_v46 }
0x1f02   :  { %v1366_v0 = vadd.f32 %v1687_v44, %v1365_v48 }
0x1f04   :  { %v1370_v12 = vsel %vm1369_vm1, %v1687_v44, %v1366_v0 }
0x1f05   :  { %v1375_v55 = vsel %vm1372_vm2, %v1374_v6, %v1370_v12 }
0x1f06   :  { %v1391_v53 = vmul.f32 %v1685_v33, %v1375_v55  ;;  %v1377_v7 = vmul.f32 %v1671_v25, %v1375_v55  ;;  %v1379_v56 = vmul.f32 %v1673_v26, %v1375_v55  ;;  %v1381_v3 = vmul.f32 %v1675_v27, %v1375_v55 }
0x1f07   :  { %v1383_v60 = vmul.f32 %v1677_v28, %v1375_v55  ;;  %v1385_v61 = vmul.f32 %v1679_v29, %v1375_v55  ;;  %v1387_v16 = vmul.f32 %v1681_v31, %v1375_v55  ;;  %v1389_v50 = vmul.f32 %v1683_v32, %v1375_v55 }
0x1f08   :  { %v1378_v2 = vmul.f32 %v1377_v7, %v1965_v59  ;;  %v1380_v24 = vmul.f32 %v1379_v56, %v2013_v9  ;;  %v1382_v49 = vmul.f32 %v1381_v3, %v2029_v43  ;;  %v1392_v52 = vmul.f32 %v1391_v53, %v2129_v42 }
0x1f09   :  { %v1384_v8 = vmul.f32 %v1383_v60, %v2046_v11  ;;  %v1386_v13 = vmul.f32 %v1385_v61, %v2063_v62  ;;  %v1388_v14 = vmul.f32 %v1387_v16, %v2083_v51  ;;  %v1390_v15 = vmul.f32 %v1389_v50, %v2096_v57 }
0x1f0a   :  { %v1393_v17 = vadd.f32 %v1380_v24, %v1378_v2  ;;  %v1404_v43 = vperm.slane %v2134_v4, 4  ;;  %v1430_v11 = vperm.slane %v2134_v4, 5  ;;  %v1432_v57 = vperm.slane %v2134_v4, 6 }
0x1f0b   :  { %v1394_v18 = vadd.f32 %v1384_v8, %v1382_v49  ;;  %v1395_v19 = vadd.f32 %v1388_v14, %v1386_v13  ;;  %v1396_v20 = vadd.f32 %v1392_v52, %v1390_v15 }
0x1f0d   :  { %v1397_v21 = vadd.f32 %v1394_v18, %v1393_v17  ;;  %v1398_v59 = vadd.f32 %v1396_v20, %v1395_v19 }
0x1f0f   :  { %v1399_v22 = vadd.f32 %v1398_v59, %v1397_v21 }
0x1f11   :  { %1406 = vrot.lane.b32.xlu1 %v1399_v22, %s1776_s2 }
0x1f83   :  { %v1407_v9 = vpop.permute.xlu1 %1406 }
0x1f84   :  { %1512 = vmatmul.msk.f32.vlgmr.msrb.gmra.mxu3 %vm221_vm7, %v1407_v9 }
0x2007   :  { %v1427_v62 = vpop.f32.mrf.mxu3 }
0x2008   :  { %v1428_v51 = vadd.f32 %v1427_v62, %v1404_v43 }
0x200a   :  { %v1431_v42 = vmul.f32 %v1430_v11, %v1428_v51 }
0x200c   :  { %v1433_v54 = vadd.f32 %v1432_v57, %v1431_v42 }
0x200e   :  { %v1434_v63 = vmax.f32 %v1433_v54, 0.0 }
0x2010   :  { %v1436_v1 = vmul.f32 %v1435_v23, %v1434_v63 }
0x2012   :  { %1437 = vadd.xlane.f32.xlu2 %v1436_v1 }
0x2085   :  { %v1438_v25 = vpop.xlane.xlu2 %1437 }
0x2086   :  { %v1513_v26 = vmul.f32 -1.442695, %v1438_v25 }
0x2088   :  { %1688 = vpow2.f32 %v1513_v26 }
0x208e   :  { %v1689_v27 = vpop.eup %1688 }
0x208f   :  { %v1442_v28 = vadd.f32 1.0, %v1689_v27 }
0x2091   :  { %1690 = vrcp.f32 %v1442_v28  ;;  %v1454_v31 = vand.u32 2147483648, %v1442_v28  ;;  %v1452_v10 = vand.u32 2147483647, %v1442_v28  ;;  %vm1448_vm3 = vweird.f32 %v1442_v28 }
0x2093   :  { %v1455_v4 = vor.u32 1.1754944e-38, %v1454_v31  ;;  %vm1453_vm6 = vcmp.eq.f32.partialorder %v1452_v10, 8.507059e+37 }
0x2097   :  { %v1691_v29 = vpop.eup %1690 }
0x2098   :  { %v1444_v30 = vmul.f32 %v1691_v29, %v1442_v28  ;;  %vm1449_vm7 = vweird.f32 %v1691_v29 }
0x2099   :  { %vm1450_vm5 = vmor %vm1448_vm3, %vm1449_vm7 }
0x209a   :  { %v1445_v58 = vsub.f32 1.0, %v1444_v30 }
0x209c   :  { %v1446_v32 = vmul.f32 %v1691_v29, %v1445_v58 }
0x209e   :  { %v1447_v33 = vadd.f32 %v1691_v29, %v1446_v32 }
0x20a0   :  { %v1451_v34 = vsel %vm1450_vm5, %v1691_v29, %v1447_v33 }
0x20a1   :  { %v1456_v35 = vsel %vm1453_vm6, %v1455_v4, %v1451_v34 }
0x20a2   :  { %1459 = vst.msk [vmem:[%s2165_s3] sm:$0xf] %vm1458_vm4, %v1456_v35 }
0x20a3   :  { %1464 = vsyncpa [#allocation5], 1 }
0x20a4   :  { %1465 = vsyncpa [#allocation7], 1 }

</bundles_post_ra>
